<compile_context>
chip_gen: v7x
topology: tpu7x:2x2x1
jax: 0.10.0
libtpu: 0.0.40
codegen_flags: <defaults>
</compile_context>

<pallas_src>
import jax
import jax.numpy as jnp
from jax.experimental import pallas as pl
from jax.experimental.pallas import tpu as pltpu

D_IN, H1, H2, H3, D_OUT = 784, 1024, 512, 256, 1
MAX_TB = 256  # batch tile cap: fills MXU rows on all chips, modest VMEM use


def _disc_kernel(x_ref, w1_ref, b1_ref, w2_ref, b2_ref, w3_ref, b3_ref,
                 w4_ref, b4_ref, o_ref):
    # Layer 1: Linear(784 -> 1024) + ReLU   (Dropout = identity in eval)
    h = jnp.dot(x_ref[...], w1_ref[...], preferred_element_type=jnp.float32)
    h = jnp.maximum(h + b1_ref[...], 0.0)
    # Layer 2: Linear(1024 -> 512) + ReLU
    h = jnp.dot(h.astype(jnp.bfloat16), w2_ref[...],
                preferred_element_type=jnp.float32)
    h = jnp.maximum(h + b2_ref[...], 0.0)
    # Layer 3: Linear(512 -> 256) + ReLU
    h = jnp.dot(h.astype(jnp.bfloat16), w3_ref[...],
                preferred_element_type=jnp.float32)
    h = jnp.maximum(h + b3_ref[...], 0.0)
    # Layer 4: Linear(256 -> 1).  N=1 -> VPU mul + lane reduction, not MXU.
    logits = jnp.sum(h * w4_ref[...], axis=-1, keepdims=True) + b4_ref[...]
    # Sigmoid via tanh (EUP), numerically stable for large |logits|.
    o_ref[...] = (0.5 * (jnp.tanh(0.5 * logits) + 1.0)).astype(o_ref.dtype)


@jax.jit
def discriminator_forward(x, packed_params):
    """x: (B, C, H, W) float32 NCHW.  Returns (B, 1) float32."""
    w1, b1, w2, b2, w3, b3, w4_row, b4 = packed_params
    B = x.shape[0]
    x2d = x.reshape(B, -1).astype(jnp.bfloat16)          # (B, 784)
    assert x2d.shape[1] == D_IN

    # Choose the batch tile: whole (8-padded) batch if small, else 256.
    b_pad8 = ((B + 7) // 8) * 8
    if b_pad8 <= MAX_TB:
        tb = b_pad8
    else:
        tb = MAX_TB
    b_pad = ((B + tb - 1) // tb) * tb
    if b_pad != B:
        x2d = jnp.pad(x2d, ((0, b_pad - B), (0, 0)))

    grid = (b_pad // tb,)
    full = lambda shape: pl.BlockSpec(shape, lambda i: (0, 0))

    out = pl.pallas_call(
        _disc_kernel,
        out_shape=jax.ShapeDtypeStruct((b_pad, D_OUT), jnp.float32),
        grid_spec=pltpu.PrefetchScalarGridSpec(
            num_scalar_prefetch=0,
            grid=grid,
            in_specs=[
                pl.BlockSpec((tb, D_IN), lambda i: (i, 0)),   # x tile (bf16)
                full((D_IN, H1)), full((1, H1)),              # layer 1
                full((H1, H2)),   full((1, H2)),              # layer 2
                full((H2, H3)),   full((1, H3)),              # layer 3
                full((1, H3)),    full((1, D_OUT)),           # layer 4 (row + bias)
            ],
            out_specs=pl.BlockSpec((tb, D_OUT), lambda i: (i, 0)),
        ),
        compiler_params=pltpu.CompilerParams(
            dimension_semantics=("parallel",),
            vmem_limit_bytes=32 << 20,
        ),
    )(x2d, w1, b1, w2, b2, w3, b3, w4_row, b4)

    return out[:B]


def init_params(key):
    """Deterministic PyTorch-style (uniform +/- 1/sqrt(fan_in)) init, f32."""
    def linear(key, fan_in, fan_out):
        kw, kb = jax.random.split(key)
        bound = 1.0 / jnp.sqrt(fan_in)
        w = jax.random.uniform(kw, (fan_in, fan_out), jnp.float32, -bound, bound)
        b = jax.random.uniform(kb, (1, fan_out), jnp.float32, -bound, bound)
        return w, b

    k1, k2, k3, k4 = jax.random.split(key, 4)
    w1, b1 = linear(k1, D_IN, H1)
    w2, b2 = linear(k2, H1, H2)
    w3, b3 = linear(k3, H2, H3)
    w4, b4 = linear(k4, H3, D_OUT)
    return (w1, b1, w2, b2, w3, b3, w4, b4)


def pack_params(params_f32):
    """Kernel layout: bf16 weights for layers 1-3, w4 as an f32 (1,256) row."""
    w1, b1, w2, b2, w3, b3, w4, b4 = params_f32
    return (w1.astype(jnp.bfloat16), b1,
            w2.astype(jnp.bfloat16), b2,
            w3.astype(jnp.bfloat16), b3,
            w4.reshape(1, H3), b4)


def _reference_forward_f32(x, params_f32):
    """Pure f32 reference (module semantics)."""
    w1, b1, w2, b2, w3, b3, w4, b4 = params_f32
    h = x.reshape(x.shape[0], -1).astype(jnp.float32)
    h = jnp.maximum(h @ w1 + b1, 0.0)
    h = jnp.maximum(h @ w2 + b2, 0.0)
    h = jnp.maximum(h @ w3 + b3, 0.0)
    return jax.nn.sigmoid(h @ w4 + b4)


def _reference_forward_bf16(x, packed_params):
    """Emulates the kernel's mixed precision (bf16 matmuls, f32 accumulation)."""
    w1, b1, w2, b2, w3, b3, w4_row, b4 = packed_params
    h = x.reshape(x.shape[0], -1).astype(jnp.bfloat16)
    h = jnp.maximum(
        jnp.dot(h, w1, preferred_element_type=jnp.float32) + b1, 0.0)
    h = jnp.maximum(
        jnp.dot(h.astype(jnp.bfloat16), w2,
                preferred_element_type=jnp.float32) + b2, 0.0)
    h = jnp.maximum(
        jnp.dot(h.astype(jnp.bfloat16), w3,
                preferred_element_type=jnp.float32) + b3, 0.0)
    logits = jnp.sum(h * w4_row, axis=-1, keepdims=True) + b4
    return jax.nn.sigmoid(logits)


if __name__ == "__main__":
    key = jax.random.PRNGKey(0)
    kx, kp = jax.random.split(key)

    B = 8
    x = jax.random.normal(kx, (B, 1, 28, 28), dtype=jnp.float32)  # NCHW
    params_f32 = init_params(kp)
    params = pack_params(params_f32)

    y = discriminator_forward(x, params)
    y = jax.block_until_ready(y)

    y_emul = _reference_forward_bf16(x, params)      # same precision as kernel
    y_f32 = _reference_forward_f32(x, params_f32)    # module (f32) semantics

    assert y.shape == (B, 1), y.shape
    assert jnp.allclose(y, y_emul, atol=1e-4, rtol=1e-4), (
        float(jnp.max(jnp.abs(y - y_emul))))
    assert jnp.allclose(y, y_f32, atol=3e-2, rtol=0.0), (
        float(jnp.max(jnp.abs(y - y_f32))))

    print("KERNEL_OK")
</pallas_src>

<mosaic_0001>
module attributes {stable_mosaic.version = 11 : i64} {
  func.func @_disc_kernel(%arg0: i32, %arg1: memref<8x784xbf16, #tpu.memory_space<vmem>>, %arg2: memref<784x1024xbf16, #tpu.memory_space<vmem>>, %arg3: memref<1x1024xf32, #tpu.memory_space<vmem>>, %arg4: memref<1024x512xbf16, #tpu.memory_space<vmem>>, %arg5: memref<1x512xf32, #tpu.memory_space<vmem>>, %arg6: memref<512x256xbf16, #tpu.memory_space<vmem>>, %arg7: memref<1x256xf32, #tpu.memory_space<vmem>>, %arg8: memref<1x256xf32, #tpu.memory_space<vmem>>, %arg9: memref<1x1xf32, #tpu.memory_space<vmem>>, %arg10: memref<8x1xf32, #tpu.memory_space<vmem>>) attributes {dimension_semantics = [#tpu.dimension_semantics<parallel>], iteration_bounds = array<i64: 1>, scalar_prefetch = 0 : i64, scratch_operands = 0 : i64, tpu.core_type = #tpu.core_type<tc>, window_params = [{transform_indices = @transform_0, window_bounds = array<i64: 8, 784>}, {pipeline_mode = #tpu.pipeline_mode<synchronous>, transform_indices = @transform_1, window_bounds = array<i64: 784, 1024>}, {pipeline_mode = #tpu.pipeline_mode<synchronous>, transform_indices = @transform_2, window_bounds = array<i64: 1, 1024>}, {pipeline_mode = #tpu.pipeline_mode<synchronous>, transform_indices = @transform_3, window_bounds = array<i64: 1024, 512>}, {pipeline_mode = #tpu.pipeline_mode<synchronous>, transform_indices = @transform_4, window_bounds = array<i64: 1, 512>}, {pipeline_mode = #tpu.pipeline_mode<synchronous>, transform_indices = @transform_5, window_bounds = array<i64: 512, 256>}, {pipeline_mode = #tpu.pipeline_mode<synchronous>, transform_indices = @transform_6, window_bounds = array<i64: 1, 256>}, {pipeline_mode = #tpu.pipeline_mode<synchronous>, transform_indices = @transform_7, window_bounds = array<i64: 1, 256>}, {pipeline_mode = #tpu.pipeline_mode<synchronous>, transform_indices = @transform_8, window_bounds = array<i64: 1, 1>}, {transform_indices = @transform_9, window_bounds = array<i64: 8, 1>}]} {
    %c0 = arith.constant 0 : index
    %c0_0 = arith.constant 0 : index
    %0 = vector.load %arg1[%c0, %c0_0] : memref<8x784xbf16, #tpu.memory_space<vmem>>, vector<8x784xbf16>
    %c0_1 = arith.constant 0 : index
    %c0_2 = arith.constant 0 : index
    %1 = vector.load %arg2[%c0_1, %c0_2] : memref<784x1024xbf16, #tpu.memory_space<vmem>>, vector<784x1024xbf16>
    %cst = arith.constant dense<0.000000e+00> : vector<8x1024xf32>
    %2 = tpu.matmul %0, %1, %cst {dimension_numbers = #tpu.dot_dimension_numbers<[1], [0], [0], [1], [0, 0, 1, 1], [], []>} : vector<8x784xbf16>, vector<784x1024xbf16>, vector<8x1024xf32> -> vector<8x1024xf32>
    %c0_3 = arith.constant 0 : index
    %c0_4 = arith.constant 0 : index
    %3 = vector.load %arg3[%c0_3, %c0_4] : memref<1x1024xf32, #tpu.memory_space<vmem>>, vector<1x1024xf32>
    %4 = vector.broadcast %3 : vector<1x1024xf32> to vector<8x1024xf32>
    %5 = arith.addf %2, %4 : vector<8x1024xf32>
    %cst_5 = arith.constant 0.000000e+00 : f32
    %6 = vector.broadcast %cst_5 : f32 to vector<8x1024xf32>
    %7 = arith.maximumf %5, %6 : vector<8x1024xf32>
    %8 = arith.truncf %7 : vector<8x1024xf32> to vector<8x1024xbf16>
    %c0_6 = arith.constant 0 : index
    %c0_7 = arith.constant 0 : index
    %9 = vector.load %arg4[%c0_6, %c0_7] : memref<1024x512xbf16, #tpu.memory_space<vmem>>, vector<1024x512xbf16>
    %cst_8 = arith.constant dense<0.000000e+00> : vector<8x512xf32>
    %10 = tpu.matmul %8, %9, %cst_8 {dimension_numbers = #tpu.dot_dimension_numbers<[1], [0], [0], [1], [0, 0, 1, 1], [], []>} : vector<8x1024xbf16>, vector<1024x512xbf16>, vector<8x512xf32> -> vector<8x512xf32>
    %c0_9 = arith.constant 0 : index
    %c0_10 = arith.constant 0 : index
    %11 = vector.load %arg5[%c0_9, %c0_10] : memref<1x512xf32, #tpu.memory_space<vmem>>, vector<1x512xf32>
    %12 = vector.broadcast %11 : vector<1x512xf32> to vector<8x512xf32>
    %13 = arith.addf %10, %12 : vector<8x512xf32>
    %cst_11 = arith.constant 0.000000e+00 : f32
    %14 = vector.broadcast %cst_11 : f32 to vector<8x512xf32>
    %15 = arith.maximumf %13, %14 : vector<8x512xf32>
    %16 = arith.truncf %15 : vector<8x512xf32> to vector<8x512xbf16>
    %c0_12 = arith.constant 0 : index
    %c0_13 = arith.constant 0 : index
    %17 = vector.load %arg6[%c0_12, %c0_13] : memref<512x256xbf16, #tpu.memory_space<vmem>>, vector<512x256xbf16>
    %cst_14 = arith.constant dense<0.000000e+00> : vector<8x256xf32>
    %18 = tpu.matmul %16, %17, %cst_14 {dimension_numbers = #tpu.dot_dimension_numbers<[1], [0], [0], [1], [0, 0, 1, 1], [], []>} : vector<8x512xbf16>, vector<512x256xbf16>, vector<8x256xf32> -> vector<8x256xf32>
    %c0_15 = arith.constant 0 : index
    %c0_16 = arith.constant 0 : index
    %19 = vector.load %arg7[%c0_15, %c0_16] : memref<1x256xf32, #tpu.memory_space<vmem>>, vector<1x256xf32>
    %20 = vector.broadcast %19 : vector<1x256xf32> to vector<8x256xf32>
    %21 = arith.addf %18, %20 : vector<8x256xf32>
    %cst_17 = arith.constant 0.000000e+00 : f32
    %22 = vector.broadcast %cst_17 : f32 to vector<8x256xf32>
    %23 = arith.maximumf %21, %22 : vector<8x256xf32>
    %c0_18 = arith.constant 0 : index
    %c0_19 = arith.constant 0 : index
    %24 = vector.load %arg8[%c0_18, %c0_19] : memref<1x256xf32, #tpu.memory_space<vmem>>, vector<1x256xf32>
    %25 = vector.broadcast %24 : vector<1x256xf32> to vector<8x256xf32>
    %26 = arith.mulf %23, %25 : vector<8x256xf32>
    %cst_20 = arith.constant dense<0.000000e+00> : vector<8xf32>
    %27 = vector.multi_reduction <add>, %26, %cst_20 [1] : vector<8x256xf32> to vector<8xf32>
    %28 = vector.shape_cast %27 : vector<8xf32> to vector<8x1xf32>
    %c0_21 = arith.constant 0 : index
    %c0_22 = arith.constant 0 : index
    %29 = vector.load %arg9[%c0_21, %c0_22] : memref<1x1xf32, #tpu.memory_space<vmem>>, vector<1x1xf32>
    %30 = vector.broadcast %29 : vector<1x1xf32> to vector<8x1xf32>
    %31 = arith.addf %28, %30 : vector<8x1xf32>
    %cst_23 = arith.constant 5.000000e-01 : f32
    %32 = vector.broadcast %cst_23 : f32 to vector<8x1xf32>
    %33 = arith.mulf %32, %31 : vector<8x1xf32>
    %34 = math.tanh %33 : vector<8x1xf32>
    %cst_24 = arith.constant 1.000000e+00 : f32
    %35 = vector.broadcast %cst_24 : f32 to vector<8x1xf32>
    %36 = arith.addf %34, %35 : vector<8x1xf32>
    %cst_25 = arith.constant 5.000000e-01 : f32
    %37 = vector.broadcast %cst_25 : f32 to vector<8x1xf32>
    %38 = arith.mulf %37, %36 : vector<8x1xf32>
    %c0_26 = arith.constant 0 : index
    %c0_27 = arith.constant 0 : index
    %39 = vector.load %arg10[%c0_26, %c0_27] : memref<8x1xf32, #tpu.memory_space<vmem>>, vector<8x1xf32>
    tpu.vector_store %arg10[%c0_26, %c0_27], %38 {strides = array<i32>} : memref<8x1xf32, #tpu.memory_space<vmem>>, vector<8x1xf32>,
    return
  }
  func.func @transform_0(%arg0: i32) -> (i32, i32) {
    %c0_i32 = arith.constant 0 : i32
    %c0_i32_0 = arith.constant 0 : i32
    return %arg0, %c0_i32 : i32, i32
  }
  func.func @transform_1(%arg0: i32) -> (i32, i32) {
    %c0_i32 = arith.constant 0 : i32
    %c0_i32_0 = arith.constant 0 : i32
    %c0_i32_1 = arith.constant 0 : i32
    return %c0_i32, %c0_i32_0 : i32, i32
  }
  func.func @transform_2(%arg0: i32) -> (i32, i32) {
    %c0_i32 = arith.constant 0 : i32
    %c0_i32_0 = arith.constant 0 : i32
    %c0_i32_1 = arith.constant 0 : i32
    return %c0_i32, %c0_i32_0 : i32, i32
  }
  func.func @transform_3(%arg0: i32) -> (i32, i32) {
    %c0_i32 = arith.constant 0 : i32
    %c0_i32_0 = arith.constant 0 : i32
    %c0_i32_1 = arith.constant 0 : i32
    return %c0_i32, %c0_i32_0 : i32, i32
  }
  func.func @transform_4(%arg0: i32) -> (i32, i32) {
    %c0_i32 = arith.constant 0 : i32
    %c0_i32_0 = arith.constant 0 : i32
    %c0_i32_1 = arith.constant 0 : i32
    return %c0_i32, %c0_i32_0 : i32, i32
  }
  func.func @transform_5(%arg0: i32) -> (i32, i32) {
    %c0_i32 = arith.constant 0 : i32
    %c0_i32_0 = arith.constant 0 : i32
    %c0_i32_1 = arith.constant 0 : i32
    return %c0_i32, %c0_i32_0 : i32, i32
  }
  func.func @transform_6(%arg0: i32) -> (i32, i32) {
    %c0_i32 = arith.constant 0 : i32
    %c0_i32_0 = arith.constant 0 : i32
    %c0_i32_1 = arith.constant 0 : i32
    return %c0_i32, %c0_i32_0 : i32, i32
  }
  func.func @transform_7(%arg0: i32) -> (i32, i32) {
    %c0_i32 = arith.constant 0 : i32
    %c0_i32_0 = arith.constant 0 : i32
    %c0_i32_1 = arith.constant 0 : i32
    return %c0_i32, %c0_i32_0 : i32, i32
  }
  func.func @transform_8(%arg0: i32) -> (i32, i32) {
    %c0_i32 = arith.constant 0 : i32
    %c0_i32_0 = arith.constant 0 : i32
    %c0_i32_1 = arith.constant 0 : i32
    return %c0_i32, %c0_i32_0 : i32, i32
  }
  func.func @transform_9(%arg0: i32) -> (i32, i32) {
    %c0_i32 = arith.constant 0 : i32
    %c0_i32_0 = arith.constant 0 : i32
    return %arg0, %c0_i32 : i32, i32
  }
}

</mosaic_0001>

<bundles_post_ra>
// kernel: discriminator_forward.1
= control target key start
LH: loop header
LB: loop body
LE: loop exit
PB: predicated region body
PF: predicated region fallthrough
CT: control target
= control target key end

     0   :  { %s7439_s0 = inlined_call_operand.vmem [shape: bf16[8,784], index: 0, kind: input, shape index: {}]   ;;  %s7440_s1 = inlined_call_operand.hbm [shape: bf16[784,1024], index: 1, kind: input, shape index: {}]   ;;  %s7441_s2 = inlined_call_operand.hbm [shape: f32[1,1024], index: 2, kind: input, shape index: {}]   ;;  %s7442_s3 = inlined_call_operand.hbm [shape: bf16[1024,512], index: 3, kind: input, shape index: {}]   ;;  %s7443_s4 = inlined_call_operand.hbm [shape: f32[1,512], index: 4, kind: input, shape index: {}]   ;;  %s7444_s5 = inlined_call_operand.hbm [shape: bf16[512,256], index: 5, kind: input, shape index: {}]   ;;  %s7445_s6 = inlined_call_operand.hbm [shape: f32[1,256], index: 6, kind: input, shape index: {}]   ;;  %s7446_s7 = inlined_call_operand.hbm [shape: f32[1,256], index: 7, kind: input, shape index: {}]   ;;  %s7447_s8 = inlined_call_operand.<no memory space> [shape: f32[1,1], index: 8, kind: input, shape index: {}]   ;;  %s7448_s9 = inlined_call_operand.vmem [shape: f32[8,1], index: 9, kind: output, shape index: {}]  }
   0x1   :  { %v14_v0 = vstv %s7447_s8 }
   0x2   :  { %15 = vst [vmem:[#allocation2] sm:$0x1] %v14_v0 }
   0x3   :  { %16 = vsyncpa [#allocation4], 0 }
   0x4   :  { %17 = vsyncpa [#allocation6], 0 }
   0x5   :  { %18 = vsyncpa [#allocation9], 0 }
   0x6   :  { %19 = vsyncpa [#allocation12], 0  ;;  %s7113_s11 = smov [#allocation5]   ;;  %s7114_s13 = smov [#allocation8]  }
   0x7   :  { %s40_s12 = sshll.u32 %s7113_s11, 4  ;;  %s62_s14 = sshll.u32 %s7114_s13, 4  ;;  %s41_s12 = int_to_ptr.vmem [resolvable:$true] %s40_s12  ;;  %s63_s14 = int_to_ptr.vmem [resolvable:$true] %s62_s14 }
   0x8   :  { %s6951_s17 = scalar_lea.hbm %s7441_s2, 128 }
   0x9   :  { %p6952_p0 = scmp.ne.s32.totalorder %s7441_s2, %s6951_s17  ;;  %p6955_p1 = scmp.lt.u32.totalorder %s6951_s17, %s7441_s2 }
   0xb   :  { %p6957_p2 = pnand %p6955_p1, %p6952_p0 }
   0xd   :  { %6960 = shalt.err (!%p6957_p2)
}
   0xe   :  { %s6961_s21 = scalar_lea.vmem %s41_s12, 128  ;;  %p6966_p4 = scmp.lt.s32.totalorder %s41_s12, %s41_s12 }
   0xf   :  { %p6962_p3 = scmp.ne.s32.totalorder %s41_s12, %s6961_s21  ;;  %p6967_p5 = scmp.lt.s32.totalorder %s6961_s21, %s6961_s21 }
  0x11   :  { %p6968_p6 = por %p6967_p5, %p6966_p4 }
  0x13   :  { %p6969_p7 = pnand %p6968_p6, %p6962_p3 }
  0x15   :  { %6972 = shalt.err (!%p6969_p7)
}
  0x16   :  { %43 = dma.hbm_to_vmem [thread:$0]  %s7441_s2, 128, %s41_s12, [#allocation6]  }
  0x17   :  { %s6973_s26 = scalar_lea.hbm %s7443_s4, 64 }
  0x18   :  { %p6974_p8 = scmp.ne.s32.totalorder %s7443_s4, %s6973_s26  ;;  %p6977_p9 = scmp.lt.u32.totalorder %s6973_s26, %s7443_s4 }
  0x1a   :  { %p6979_p10 = pnand %p6977_p9, %p6974_p8 }
  0x1c   :  { %6982 = shalt.err (!%p6979_p10)
}
  0x1d   :  { %s6983_s10 = scalar_lea.vmem %s63_s14, 64  ;;  %p6988_p12 = scmp.lt.s32.totalorder %s63_s14, %s63_s14 }
  0x1e   :  { %p6984_p11 = scmp.ne.s32.totalorder %s63_s14, %s6983_s10  ;;  %p6989_p13 = scmp.lt.s32.totalorder %s6983_s10, %s6983_s10 }
  0x20   :  { %p6990_p0 = por %p6989_p13, %p6988_p12 }
  0x22   :  { %p6991_p1 = pnand %p6990_p0, %p6984_p11 }
  0x24   :  { %6994 = shalt.err (!%p6991_p1)
}
  0x25   :  { %65 = dma.hbm_to_vmem [thread:$0]  %s7443_s4, 64, %s63_s14, [#allocation9]  }
  0x26   :  { %s7115_s12 = smov [#allocation11]   ;;  %s7116_s15 = smov [#allocation3]  }
  0x27   :  { %s84_s13 = sshll.u32 %s7115_s12, 4  ;;  %s27_s16 = sshll.u32 %s7116_s15, 4  ;;  %s85_s13 = int_to_ptr.vmem [resolvable:$true] %s84_s13  ;;  %s7204_s16 = int_to_ptr.vmem [resolvable:$true] %s27_s16 }
  0x28   :  { %s6995_s19 = scalar_lea.hbm %s7445_s6, 32 }
  0x29   :  { %p6996_p2 = scmp.ne.s32.totalorder %s7445_s6, %s6995_s19  ;;  %p6999_p3 = scmp.lt.u32.totalorder %s6995_s19, %s7445_s6 }
  0x2b   :  { %p7001_p4 = pnand %p6999_p3, %p6996_p2 }
  0x2d   :  { %7004 = shalt.err (!%p7001_p4)
}
  0x2e   :  { %s7005_s4 = scalar_lea.vmem %s85_s13, 32  ;;  %p7010_p6 = scmp.lt.s32.totalorder %s85_s13, %s85_s13 }
  0x2f   :  { %p7006_p5 = scmp.ne.s32.totalorder %s85_s13, %s7005_s4  ;;  %p7011_p7 = scmp.lt.s32.totalorder %s7005_s4, %s7005_s4 }
  0x31   :  { %p7012_p8 = por %p7011_p7, %p7010_p6 }
  0x33   :  { %p7013_p9 = pnand %p7012_p8, %p7006_p5 }
  0x35   :  { %7016 = shalt.err (!%p7013_p9)
}
  0x36   :  { %87 = dma.hbm_to_vmem [thread:$0]  %s7445_s6, 32, %s85_s13, [#allocation12]  }
  0x37   :  { %s7017_s26 = scalar_lea.hbm %s7440_s1, 50176 }
  0x38   :  { %p7018_p10 = scmp.ne.s32.totalorder %s7440_s1, %s7017_s26  ;;  %p7021_p11 = scmp.lt.u32.totalorder %s7017_s26, %s7440_s1 }
  0x3a   :  { %p7023_p12 = pnand %p7021_p11, %p7018_p10 }
  0x3c   :  { %7026 = shalt.err (!%p7023_p12)
}
  0x3d   :  { %s7027_s10 = scalar_lea.vmem %s7204_s16, 50176  ;;  %p7032_p0 = scmp.lt.s32.totalorder %s7204_s16, %s7204_s16 }
  0x3e   :  { %p7028_p13 = scmp.ne.s32.totalorder %s7204_s16, %s7027_s10  ;;  %p7033_p1 = scmp.lt.s32.totalorder %s7027_s10, %s7027_s10 }
  0x40   :  { %p7034_p2 = por %p7033_p1, %p7032_p0 }
  0x42   :  { %p7035_p3 = pnand %p7034_p2, %p7028_p13 }
  0x44   :  { %7038 = shalt.err (!%p7035_p3)
}
  0x45   :  { %s7117_s6 = smov 512   ;;  %s7118_s2 = smov 32  }
  0x46   :  { %33 = dma.hbm_to_vmem [thread:$0]  %s7440_s1, 50176, %s7204_s16, [#allocation4], %s7117_s6, %s7117_s6, %s7118_s2  }
  0x47   :  { %s7119_s13 = smov [#allocation7]   ;;  %s7039_s19 = scalar_lea.hbm %s7442_s3, 32768 }
  0x48   :  { %s49_s15 = sshll.u32 %s7119_s13, 4  ;;  %p7040_p4 = scmp.ne.s32.totalorder %s7442_s3, %s7039_s19  ;;  %s50_s15 = int_to_ptr.vmem [resolvable:$true] %s49_s15 }
  0x49   :  { %p7043_p5 = scmp.lt.u32.totalorder %s7039_s19, %s7442_s3 }
  0x4b   :  { %p7045_p6 = pnand %p7043_p5, %p7040_p4 }
  0x4d   :  { %7048 = shalt.err (!%p7045_p6)
}
  0x4e   :  { %s7049_s4 = scalar_lea.vmem %s50_s15, 32768  ;;  %p7054_p8 = scmp.lt.s32.totalorder %s50_s15, %s50_s15 }
  0x4f   :  { %p7050_p7 = scmp.ne.s32.totalorder %s50_s15, %s7049_s4  ;;  %p7055_p9 = scmp.lt.s32.totalorder %s7049_s4, %s7049_s4 }
  0x51   :  { %p7056_p10 = por %p7055_p9, %p7054_p8 }
  0x53   :  { %p7057_p11 = pnand %p7056_p10, %p7050_p7 }
  0x55   :  { %7060 = shalt.err (!%p7057_p11)
}
  0x56   :  { %s7120_s1 = smov 256   ;;  %s7121_s16 = smov 16  }
  0x57   :  { %55 = dma.hbm_to_vmem [thread:$0]  %s7442_s3, 32768, %s50_s15, [#allocation6], %s7120_s1, %s7120_s1, %s7121_s16  }
  0x58   :  { %s7122_s24 = smov [#allocation10]   ;;  %s7061_s28 = scalar_lea.hbm %s7444_s5, 8192 }
  0x59   :  { %s71_s25 = sshll.u32 %s7122_s24, 4  ;;  %p7062_p12 = scmp.ne.s32.totalorder %s7444_s5, %s7061_s28  ;;  %s72_s25 = int_to_ptr.vmem [resolvable:$true] %s71_s25 }
  0x5a   :  { %p7065_p13 = scmp.lt.u32.totalorder %s7061_s28, %s7444_s5 }
  0x5c   :  { %p7067_p0 = pnand %p7065_p13, %p7062_p12 }
  0x5e   :  { %7070 = shalt.err (!%p7067_p0)
}
  0x5f   :  { %s7071_s2 = scalar_lea.vmem %s72_s25, 8192  ;;  %p7076_p2 = scmp.lt.s32.totalorder %s72_s25, %s72_s25 }
  0x60   :  { %p7072_p1 = scmp.ne.s32.totalorder %s72_s25, %s7071_s2  ;;  %p7077_p3 = scmp.lt.s32.totalorder %s7071_s2, %s7071_s2 }
  0x62   :  { %p7078_p4 = por %p7077_p3, %p7076_p2 }
  0x64   :  { %p7079_p5 = pnand %p7078_p4, %p7072_p1 }
  0x66   :  { %7082 = shalt.err (!%p7079_p5)
}
  0x67   :  { %s7123_s3 = smov 128   ;;  %s7124_s11 = smov 8  }
  0x68   :  { %77 = dma.hbm_to_vmem [thread:$0]  %s7444_s5, 8192, %s72_s25, [#allocation9], %s7123_s3, %s7123_s3, %s7124_s11  }
  0x69   :  { %s7125_s15 = smov [#allocation13]   ;;  %s7083_s8 = scalar_lea.hbm %s7446_s7, 32 }
  0x6a   :  { %s94_s17 = sshll.u32 %s7125_s15, 4  ;;  %p7084_p6 = scmp.ne.s32.totalorder %s7446_s7, %s7083_s8  ;;  %s95_s17 = int_to_ptr.vmem [resolvable:$true] %s94_s17 }
  0x6b   :  { %p7087_p7 = scmp.lt.u32.totalorder %s7083_s8, %s7446_s7 }
  0x6d   :  { %p7089_p8 = pnand %p7087_p7, %p7084_p6 }
  0x6f   :  { %7092 = shalt.err (!%p7089_p8)
}
  0x70   :  { %s7093_s1 = scalar_lea.vmem %s95_s17, 32  ;;  %p7098_p10 = scmp.lt.s32.totalorder %s95_s17, %s95_s17 }
  0x71   :  { %p7094_p9 = scmp.ne.s32.totalorder %s95_s17, %s7093_s1  ;;  %p7099_p11 = scmp.lt.s32.totalorder %s7093_s1, %s7093_s1 }
  0x73   :  { %p7100_p12 = por %p7099_p11, %p7098_p10 }
  0x75   :  { %p7101_p13 = pnand %p7100_p12, %p7094_p9 }
  0x77   :  { %7104 = shalt.err (!%p7101_p13)
}
  0x78   :  { %97 = dma.hbm_to_vmem [thread:$0]  %s7446_s7, 32, %s95_s17, [#allocation12]  }
  0x79   :  { %7105 = dma.done.wait [#allocation4], 50176  }
  0x7a   :  { %7106 = vsyncadd [#allocation4], 4294917120 }
  0x7b   :  { %7107 = dma.done.wait [#allocation6], 32896  }
  0x7c   :  { %7108 = vsyncadd [#allocation6], 4294934400 }
  0x7d   :  { %7109 = dma.done.wait [#allocation9], 8256  }
  0x7e   :  { %7110 = vsyncadd [#allocation9], 4294959040 }
  0x7f   :  { %7111 = dma.done.wait [#allocation12], 64  }
  0x80   :  { %7112 = vsyncadd [#allocation12], 4294967232  ;;  %v126_v1 = vld [vmem:[#allocation3] sm:$0xff]  ;;  %vm2544_vm0 = vcmask 130048   ;;  %vm5623_vm1 = vcmask 7168  }
  0x81   :  { %v130_v2 = vld [vmem:[#allocation3 + $0x20] sm:$0xff] }
  0x82   :  { %v254_v3 = vld [vmem:[#allocation3 + $0x400] sm:$0xff]  ;;  %v5641_v4 = vcombine.high %v126_v1, %v130_v2  ;;  %v5640_v6 = vcombine.low %v126_v1, %v130_v2 }
  0x83   :  { %v258_v5 = vld [vmem:[#allocation3 + $0x420] sm:$0xff] }
  0x84   :  { %v134_v7 = vld [vmem:[#allocation3 + $0x40] sm:$0xff]  ;;  %v5769_v9 = vcombine.high %v254_v3, %v258_v5  ;;  %v5768_v10 = vcombine.low %v254_v3, %v258_v5  ;;  %2548 = vmatprep.subr.bf16.mxu1 %v5641_v4 }
  0x85   :  { %v138_v8 = vld [vmem:[#allocation3 + $0x60] sm:$0xff]  ;;  %2549 = vmatpush1.bf16.msra.mxu1 %v5640_v6 }
  0x86   :  { %v5649_v11 = vcombine.high %v134_v7, %v138_v8  ;;  %v262_v12 = vld [vmem:[#allocation3 + $0x440] sm:$0xff]  ;;  %2589 = vmatprep.subr.bf16.mxu0 %v5769_v9  ;;  %v5648_v19 = vcombine.low %v134_v7, %v138_v8 }
  0x87   :  { %v266_v13 = vld [vmem:[#allocation3 + $0x460] sm:$0xff]  ;;  %2590 = vmatpush1.bf16.msra.mxu0 %v5768_v10 }
  0x88   :  { %v142_v14 = vld [vmem:[#allocation3 + $0x80] sm:$0xff]  ;;  %v5777_v15 = vcombine.high %v262_v12, %v266_v13  ;;  %2550 = vmatprep.subr.bf16.mxu1 %v5649_v11  ;;  %v5776_v20 = vcombine.low %v262_v12, %v266_v13 }
  0x89   :  { %v146_v16 = vld [vmem:[#allocation3 + $0xa0] sm:$0xff]  ;;  %2551 = vmatpush1.bf16.msra.mxu1 %v5648_v19 }
  0x8a   :  { %v270_v17 = vld [vmem:[#allocation3 + $0x480] sm:$0xff]  ;;  %v5657_v21 = vcombine.high %v142_v14, %v146_v16  ;;  %2591 = vmatprep.subr.bf16.mxu0 %v5777_v15  ;;  %v5656_v27 = vcombine.low %v142_v14, %v146_v16 }
  0x8b   :  { %v274_v18 = vld [vmem:[#allocation3 + $0x4a0] sm:$0xff]  ;;  %2592 = vmatpush1.bf16.msra.mxu0 %v5776_v20 }
  0x8c   :  { %v5785_v22 = vcombine.high %v270_v17, %v274_v18  ;;  %v150_v23 = vld [vmem:[#allocation3 + $0xc0] sm:$0xff]  ;;  %2552 = vmatprep.subr.bf16.mxu1 %v5657_v21  ;;  %v5784_v28 = vcombine.low %v270_v17, %v274_v18 }
  0x8d   :  { %v154_v24 = vld [vmem:[#allocation3 + $0xe0] sm:$0xff]  ;;  %2553 = vmatpush1.bf16.msra.mxu1 %v5656_v27 }
  0x8e   :  { %v278_v25 = vld [vmem:[#allocation3 + $0x4c0] sm:$0xff]  ;;  %v5665_v29 = vcombine.high %v150_v23, %v154_v24  ;;  %2593 = vmatprep.subr.bf16.mxu0 %v5785_v22  ;;  %v5664_v35 = vcombine.low %v150_v23, %v154_v24 }
  0x8f   :  { %v282_v26 = vld [vmem:[#allocation3 + $0x4e0] sm:$0xff]  ;;  %2594 = vmatpush1.bf16.msra.mxu0 %v5784_v28 }
  0x90   :  { %v5793_v30 = vcombine.high %v278_v25, %v282_v26  ;;  %v158_v31 = vld [vmem:[#allocation3 + $0x100] sm:$0xff]  ;;  %2554 = vmatprep.subr.bf16.mxu1 %v5665_v29  ;;  %v5792_v36 = vcombine.low %v278_v25, %v282_v26 }
  0x91   :  { %v162_v32 = vld [vmem:[#allocation3 + $0x120] sm:$0xff]  ;;  %2555 = vmatpush1.bf16.msra.mxu1 %v5664_v35 }
  0x92   :  { %v286_v33 = vld [vmem:[#allocation3 + $0x500] sm:$0xff]  ;;  %v5673_v37 = vcombine.high %v158_v31, %v162_v32  ;;  %2595 = vmatprep.subr.bf16.mxu0 %v5793_v30  ;;  %v5672_v43 = vcombine.low %v158_v31, %v162_v32 }
  0x93   :  { %v290_v34 = vld [vmem:[#allocation3 + $0x520] sm:$0xff]  ;;  %2596 = vmatpush1.bf16.msra.mxu0 %v5792_v36 }
  0x94   :  { %v5801_v38 = vcombine.high %v286_v33, %v290_v34  ;;  %v166_v39 = vld [vmem:[#allocation3 + $0x140] sm:$0xff]  ;;  %2556 = vmatprep.subr.bf16.mxu1 %v5673_v37  ;;  %v5800_v44 = vcombine.low %v286_v33, %v290_v34 }
  0x95   :  { %v170_v40 = vld [vmem:[#allocation3 + $0x160] sm:$0xff]  ;;  %2557 = vmatpush1.bf16.msra.mxu1 %v5672_v43 }
  0x96   :  { %v294_v41 = vld [vmem:[#allocation3 + $0x540] sm:$0xff]  ;;  %v5681_v45 = vcombine.high %v166_v39, %v170_v40  ;;  %2597 = vmatprep.subr.bf16.mxu0 %v5801_v38  ;;  %v5680_v51 = vcombine.low %v166_v39, %v170_v40 }
  0x97   :  { %v298_v42 = vld [vmem:[#allocation3 + $0x560] sm:$0xff]  ;;  %2598 = vmatpush1.bf16.msra.mxu0 %v5800_v44 }
  0x98   :  { %v5809_v46 = vcombine.high %v294_v41, %v298_v42  ;;  %v174_v47 = vld [vmem:[#allocation3 + $0x180] sm:$0xff]  ;;  %2558 = vmatprep.subr.bf16.mxu1 %v5681_v45  ;;  %v5808_v52 = vcombine.low %v294_v41, %v298_v42 }
  0x99   :  { %v178_v48 = vld [vmem:[#allocation3 + $0x1a0] sm:$0xff]  ;;  %2559 = vmatpush1.bf16.msra.mxu1 %v5680_v51 }
  0x9a   :  { %v302_v49 = vld [vmem:[#allocation3 + $0x580] sm:$0xff]  ;;  %v5689_v53 = vcombine.high %v174_v47, %v178_v48  ;;  %2599 = vmatprep.subr.bf16.mxu0 %v5809_v46  ;;  %v5688_v63 = vcombine.low %v174_v47, %v178_v48 }
  0x9b   :  { %v306_v50 = vld [vmem:[#allocation3 + $0x5a0] sm:$0xff]  ;;  %2600 = vmatpush1.bf16.msra.mxu0 %v5808_v52 }
  0x9c   :  { %v7274_v54 = vld [vmem:[%s7439_s0] sm:$0xff]  ;;  %v7279_v55 = vld [vmem:[%s7439_s0 + $0x8] sm:$0xff]  ;;  %v5817_v56 = vcombine.high %v302_v49, %v306_v50  ;;  %2560 = vmatprep.subr.bf16.mxu1 %v5689_v53  ;;  %v5816_v0 = vcombine.low %v302_v49, %v306_v50 }
  0x9d   :  { %v182_v57 = vld [vmem:[#allocation3 + $0x1c0] sm:$0xff]  ;;  %v7283_v59 = vcombine.high %v7274_v54, %v7274_v54  ;;  %v7287_v62 = vcombine.high %v7279_v55, %v7279_v55  ;;  %2561 = vmatpush1.bf16.msra.mxu1 %v5688_v63 }
  0x9e   :  { %v186_v58 = vld [vmem:[#allocation3 + $0x1e0] sm:$0xff]  ;;  %2601 = vmatprep.subr.bf16.mxu0 %v5817_v56 }
  0x9f   :  { %v310_v60 = vld [vmem:[#allocation3 + $0x5c0] sm:$0xff]  ;;  %2580 = vmatprep.mubr.bf16.mxu1 %v7283_v59  ;;  %v5697_v1 = vcombine.high %v182_v57, %v186_v58  ;;  %2621 = vmatprep.mubr.bf16.mxu0 %v7287_v62  ;;  %v5696_v7 = vcombine.low %v182_v57, %v186_v58 }
  0xa0   :  { %v314_v61 = vld [vmem:[#allocation3 + $0x5e0] sm:$0xff]  ;;  %2602 = vmatpush1.bf16.msra.mxu0 %v5816_v0 }
  0xa1   :  { %v5825_v2 = vcombine.high %v310_v60, %v314_v61  ;;  %v190_v3 = vld [vmem:[#allocation3 + $0x200] sm:$0xff]  ;;  %2562 = vmatprep.subr.bf16.mxu1 %v5697_v1  ;;  %v5824_v8 = vcombine.low %v310_v60, %v314_v61 }
  0xa2   :  { %v194_v4 = vld [vmem:[#allocation3 + $0x220] sm:$0xff]  ;;  %2563 = vmatpush1.bf16.msra.mxu1 %v5696_v7  ;;  %v127_v7 = vld [vmem:[#allocation3 + $0x8] sm:$0xff] }
  0xa3   :  { %v318_v5 = vld [vmem:[#allocation3 + $0x600] sm:$0xff]  ;;  %v5705_v9 = vcombine.high %v190_v3, %v194_v4  ;;  %2603 = vmatprep.subr.bf16.mxu0 %v5825_v2  ;;  %v5704_v15 = vcombine.low %v190_v3, %v194_v4 }
  0xa4   :  { %v322_v6 = vld [vmem:[#allocation3 + $0x620] sm:$0xff]  ;;  %2604 = vmatpush1.bf16.msra.mxu0 %v5824_v8  ;;  %v131_v8 = vld [vmem:[#allocation3 + $0x28] sm:$0xff] }
  0xa5   :  { %v5833_v10 = vcombine.high %v318_v5, %v322_v6  ;;  %v198_v11 = vld [vmem:[#allocation3 + $0x240] sm:$0xff]  ;;  %2564 = vmatprep.subr.bf16.mxu1 %v5705_v9  ;;  %v5832_v16 = vcombine.low %v318_v5, %v322_v6 }
  0xa6   :  { %v202_v12 = vld [vmem:[#allocation3 + $0x260] sm:$0xff]  ;;  %2565 = vmatpush1.bf16.msra.mxu1 %v5704_v15  ;;  %v135_v15 = vld [vmem:[#allocation3 + $0x48] sm:$0xff] }
  0xa7   :  { %v326_v13 = vld [vmem:[#allocation3 + $0x640] sm:$0xff]  ;;  %v5713_v17 = vcombine.high %v198_v11, %v202_v12  ;;  %2605 = vmatprep.subr.bf16.mxu0 %v5833_v10  ;;  %v5712_v23 = vcombine.low %v198_v11, %v202_v12 }
  0xa8   :  { %v330_v14 = vld [vmem:[#allocation3 + $0x660] sm:$0xff]  ;;  %2606 = vmatpush1.bf16.msra.mxu0 %v5832_v16  ;;  %v139_v16 = vld [vmem:[#allocation3 + $0x68] sm:$0xff] }
  0xa9   :  { %v5841_v18 = vcombine.high %v326_v13, %v330_v14  ;;  %v206_v19 = vld [vmem:[#allocation3 + $0x280] sm:$0xff]  ;;  %2566 = vmatprep.subr.bf16.mxu1 %v5713_v17  ;;  %v5840_v24 = vcombine.low %v326_v13, %v330_v14  ;;  %v5643_v13 = vcombine.high %v127_v7, %v131_v8  ;;  %v7293_v17 = vcombine.low %v7274_v54, %v7274_v54 }
  0xaa   :  { %v210_v20 = vld [vmem:[#allocation3 + $0x2a0] sm:$0xff]  ;;  %2567 = vmatpush1.bf16.msra.mxu1 %v5712_v23 }
  0xab   :  { %v334_v21 = vld [vmem:[#allocation3 + $0x680] sm:$0xff]  ;;  %v5721_v25 = vcombine.high %v206_v19, %v210_v20  ;;  %2607 = vmatprep.subr.bf16.mxu0 %v5841_v18  ;;  %v5720_v31 = vcombine.low %v206_v19, %v210_v20  ;;  %v7298_v20 = vld [vmem:[%s7439_s0 + $0x10] sm:$0xff] }
  0xac   :  { %v338_v22 = vld [vmem:[#allocation3 + $0x6a0] sm:$0xff]  ;;  %2608 = vmatpush1.bf16.msra.mxu0 %v5840_v24  ;;  %v5651_v24 = vcombine.high %v135_v15, %v139_v16 }
  0xad   :  { %v5849_v26 = vcombine.high %v334_v21, %v338_v22  ;;  %v214_v27 = vld [vmem:[#allocation3 + $0x2c0] sm:$0xff]  ;;  %2568 = vmatprep.subr.bf16.mxu1 %v5721_v25  ;;  %v5848_v32 = vcombine.low %v334_v21, %v338_v22  ;;  %v5642_v21 = vcombine.low %v127_v7, %v131_v8  ;;  %v7302_v22 = vcombine.low %v7279_v55, %v7279_v55  ;;  %v183_v7 = vld [vmem:[#allocation3 + $0x1c8] sm:$0xff] }
  0xae   :  { %v218_v28 = vld [vmem:[#allocation3 + $0x2e0] sm:$0xff]  ;;  %2569 = vmatpush1.bf16.msra.mxu1 %v5720_v31  ;;  %v5650_v55 = vcombine.low %v135_v15, %v139_v16  ;;  %v187_v8 = vld [vmem:[#allocation3 + $0x1e8] sm:$0xff] }
  0xaf   :  { %v342_v29 = vld [vmem:[#allocation3 + $0x6c0] sm:$0xff]  ;;  %v5729_v33 = vcombine.high %v214_v27, %v218_v28  ;;  %2609 = vmatprep.subr.bf16.mxu0 %v5849_v26  ;;  %v5728_v39 = vcombine.low %v214_v27, %v218_v28  ;;  %v143_v27 = vld [vmem:[#allocation3 + $0x88] sm:$0xff] }
  0xb0   :  { %v346_v30 = vld [vmem:[#allocation3 + $0x6e0] sm:$0xff]  ;;  %2610 = vmatpush1.bf16.msra.mxu0 %v5848_v32  ;;  %v147_v28 = vld [vmem:[#allocation3 + $0xa8] sm:$0xff] }
  0xb1   :  { %v5857_v34 = vcombine.high %v342_v29, %v346_v30  ;;  %v222_v35 = vld [vmem:[#allocation3 + $0x300] sm:$0xff]  ;;  %2570 = vmatprep.subr.bf16.mxu1 %v5729_v33  ;;  %v5856_v40 = vcombine.low %v342_v29, %v346_v30  ;;  %v7306_v29 = vcombine.high %v7298_v20, %v7298_v20  ;;  %v5659_v31 = vcombine.high %v143_v27, %v147_v28  ;;  %v191_v15 = vld [vmem:[#allocation3 + $0x208] sm:$0xff] }
  0xb2   :  { %v226_v36 = vld [vmem:[#allocation3 + $0x320] sm:$0xff]  ;;  %2571 = vmatpush1.bf16.msra.mxu1 %v5728_v39  ;;  %v195_v16 = vld [vmem:[#allocation3 + $0x228] sm:$0xff] }
  0xb3   :  { %v350_v37 = vld [vmem:[#allocation3 + $0x700] sm:$0xff]  ;;  %v5737_v41 = vcombine.high %v222_v35, %v226_v36  ;;  %2611 = vmatprep.subr.bf16.mxu0 %v5857_v34  ;;  %v5736_v47 = vcombine.low %v222_v35, %v226_v36  ;;  %v151_v35 = vld [vmem:[#allocation3 + $0xc8] sm:$0xff] }
  0xb4   :  { %v354_v38 = vld [vmem:[#allocation3 + $0x720] sm:$0xff]  ;;  %2612 = vmatpush1.bf16.msra.mxu0 %v5856_v40  ;;  %v155_v36 = vld [vmem:[#allocation3 + $0xe8] sm:$0xff] }
  0xb5   :  { %v5865_v42 = vcombine.high %v350_v37, %v354_v38  ;;  %v230_v43 = vld [vmem:[#allocation3 + $0x340] sm:$0xff]  ;;  %2572 = vmatprep.subr.bf16.mxu1 %v5737_v41  ;;  %v5864_v48 = vcombine.low %v350_v37, %v354_v38  ;;  %v5658_v37 = vcombine.low %v143_v27, %v147_v28  ;;  %v5667_v39 = vcombine.high %v151_v35, %v155_v36 }
  0xb6   :  { %v234_v44 = vld [vmem:[#allocation3 + $0x360] sm:$0xff]  ;;  %2573 = vmatpush1.bf16.msra.mxu1 %v5736_v47  ;;  %v5706_v27 = vcombine.low %v191_v15, %v195_v16 }
  0xb7   :  { %v358_v45 = vld [vmem:[#allocation3 + $0x740] sm:$0xff]  ;;  %v5745_v49 = vcombine.high %v230_v43, %v234_v44  ;;  %2613 = vmatprep.subr.bf16.mxu0 %v5865_v42  ;;  %v5744_v57 = vcombine.low %v230_v43, %v234_v44  ;;  %v159_v43 = vld [vmem:[#allocation3 + $0x108] sm:$0xff] }
  0xb8   :  { %v362_v46 = vld [vmem:[#allocation3 + $0x760] sm:$0xff]  ;;  %2614 = vmatpush1.bf16.msra.mxu0 %v5864_v48  ;;  %v163_v44 = vld [vmem:[#allocation3 + $0x128] sm:$0xff] }
  0xb9   :  { %v5873_v50 = vcombine.high %v358_v45, %v362_v46  ;;  %v238_v51 = vld [vmem:[#allocation3 + $0x380] sm:$0xff]  ;;  %2574 = vmatprep.subr.bf16.mxu1 %v5745_v49  ;;  %v5872_v58 = vcombine.low %v358_v45, %v362_v46  ;;  %v5666_v45 = vcombine.low %v151_v35, %v155_v36  ;;  %v5675_v47 = vcombine.high %v159_v43, %v163_v44 }
  0xba   :  { %v242_v52 = vld [vmem:[#allocation3 + $0x3a0] sm:$0xff]  ;;  %2575 = vmatpush1.bf16.msra.mxu1 %v5744_v57 }
  0xbb   :  { %v366_v53 = vld [vmem:[#allocation3 + $0x780] sm:$0xff]  ;;  %v5753_v60 = vcombine.high %v238_v51, %v242_v52  ;;  %2615 = vmatprep.subr.bf16.mxu0 %v5873_v50  ;;  %v5752_v3 = vcombine.low %v238_v51, %v242_v52  ;;  %v167_v51 = vld [vmem:[#allocation3 + $0x148] sm:$0xff] }
  0xbc   :  { %v370_v56 = vld [vmem:[#allocation3 + $0x7a0] sm:$0xff]  ;;  %2616 = vmatpush1.bf16.msra.mxu0 %v5872_v58  ;;  %v171_v52 = vld [vmem:[#allocation3 + $0x168] sm:$0xff] }
  0xbd   :  { %v5881_v61 = vcombine.high %v366_v53, %v370_v56  ;;  %v246_v63 = vld [vmem:[#allocation3 + $0x3c0] sm:$0xff]  ;;  %2576 = vmatprep.subr.bf16.mxu1 %v5753_v60  ;;  %v5880_v4 = vcombine.low %v366_v53, %v370_v56  ;;  %v5674_v53 = vcombine.low %v159_v43, %v163_v44  ;;  %v5683_v57 = vcombine.high %v167_v51, %v171_v52 }
  0xbe   :  { %v250_v0 = vld [vmem:[#allocation3 + $0x3e0] sm:$0xff]  ;;  %2577 = vmatpush1.bf16.msra.mxu1 %v5752_v3 }
  0xbf   :  { %v374_v1 = vld [vmem:[#allocation3 + $0x7c0] sm:$0xff]  ;;  %v5761_v5 = vcombine.high %v246_v63, %v250_v0  ;;  %2617 = vmatprep.subr.bf16.mxu0 %v5881_v61  ;;  %v5760_v11 = vcombine.low %v246_v63, %v250_v0  ;;  %v175_v63 = vld [vmem:[#allocation3 + $0x188] sm:$0xff] }
  0xc0   :  { %v378_v2 = vld [vmem:[#allocation3 + $0x7e0] sm:$0xff]  ;;  %2618 = vmatpush1.bf16.msra.mxu0 %v5880_v4  ;;  %v179_v0 = vld [vmem:[#allocation3 + $0x1a8] sm:$0xff] }
  0xc1   :  { %v5889_v6 = vcombine.high %v374_v1, %v378_v2  ;;  %v382_v9 = vld [vmem:[#allocation3 + $0x800] sm:$0xff]  ;;  %2578 = vmatprep.subr.bf16.mxu1 %v5761_v5  ;;  %v5888_v12 = vcombine.low %v374_v1, %v378_v2  ;;  %v5682_v1 = vcombine.low %v167_v51, %v171_v52  ;;  %v5691_v3 = vcombine.high %v175_v63, %v179_v0 }
  0xc2   :  { %v386_v10 = vld [vmem:[#allocation3 + $0x820] sm:$0xff]  ;;  %2579 = vmatpush1.bf16.msra.mxu1 %v5760_v11  ;;  %v5699_v11 = vcombine.high %v183_v7, %v187_v8 }
  0xc3   :  { %2619 = vmatprep.subr.bf16.mxu0 %v5889_v6  ;;  %v5897_v14 = vcombine.high %v382_v9, %v386_v10  ;;  %v390_v18 = vld [vmem:[#allocation3 + $0x840] sm:$0xff]  ;;  %v5896_v23 = vcombine.low %v382_v9, %v386_v10  ;;  %2712 = vmatprep.subr.bf16.mxu1 %v5643_v13  ;;  %v5690_v9 = vcombine.low %v175_v63, %v179_v0 }
  0xc4   :  { %v394_v19 = vld [vmem:[#allocation3 + $0x860] sm:$0xff]  ;;  %2620 = vmatpush1.bf16.msra.mxu0 %v5888_v12 }
  0xc5   :  { %v398_v25 = vld [vmem:[#allocation3 + $0x880] sm:$0xff]  ;;  %2630 = vmatprep.subr.bf16.mxu0 %v5897_v14  ;;  %v5905_v26 = vcombine.high %v390_v18, %v394_v19  ;;  %2581 = vmatmul.mubr.bf16.vlgmr.msra.gmra.mrb[0].mxu1 %v7293_v17  ;;  %v5904_v30 = vcombine.low %v390_v18, %v394_v19  ;;  %v5698_v18 = vcombine.low %v183_v7, %v187_v8 }
  0xc6   :  { %v402_v54 = vld [vmem:[#allocation3 + $0x8a0] sm:$0xff]  ;;  %2713 = vmatpush1.bf16.msra.mxu1 %v5642_v21  ;;  %2744 = vmatprep.mubr.bf16.mxu1 %v7283_v59  ;;  %v5707_v21 = vcombine.high %v191_v15, %v195_v16 }
  0xc7   :  { %2622 = vmatmul.mubr.bf16.vlgmr.msra.gmra.mrb[0].mxu0 %v7302_v22  ;;  %2714 = vmatprep.subr.bf16.mxu1 %v5651_v24  ;;  %v406_v32 = vld [vmem:[#allocation3 + $0x8c0] sm:$0xff]  ;;  %v5913_v34 = vcombine.high %v398_v25, %v402_v54  ;;  %v5912_v38 = vcombine.low %v398_v25, %v402_v54  ;;  %v199_v54 = vld [vmem:[#allocation3 + $0x248] sm:$0xff] }
  0xc8   :  { %2631 = vmatpush1.bf16.msra.mxu0 %v5896_v23  ;;  %v410_v33 = vld [vmem:[#allocation3 + $0x8e0] sm:$0xff]  ;;  %2662 = vmatprep.mubr.bf16.mxu0 %v7306_v29 }
  0xc9   :  { %2632 = vmatprep.subr.bf16.mxu0 %v5905_v26  ;;  %v414_v40 = vld [vmem:[#allocation3 + $0x900] sm:$0xff]  ;;  %v5921_v42 = vcombine.high %v406_v32, %v410_v33  ;;  %v5920_v46 = vcombine.low %v406_v32, %v410_v33  ;;  %v203_v26 = vld [vmem:[#allocation3 + $0x268] sm:$0xff] }
  0xca   :  { %2715 = vmatpush1.bf16.msra.mxu1 %v5650_v55  ;;  %v418_v41 = vld [vmem:[#allocation3 + $0x920] sm:$0xff]  ;;  %v5715_v55 = vcombine.high %v199_v54, %v203_v26  ;;  %v207_v33 = vld [vmem:[#allocation3 + $0x288] sm:$0xff]  ;;  %v5714_v35 = vcombine.low %v199_v54, %v203_v26 }
  0xcb   :  { %2716 = vmatprep.subr.bf16.mxu1 %v5659_v31  ;;  %v422_v48 = vld [vmem:[#allocation3 + $0x940] sm:$0xff]  ;;  %v5929_v50 = vcombine.high %v414_v40, %v418_v41  ;;  %v5928_v56 = vcombine.low %v414_v40, %v418_v41  ;;  %v215_v41 = vld [vmem:[#allocation3 + $0x2c8] sm:$0xff] }
  0xcc   :  { %2633 = vmatpush1.bf16.msra.mxu0 %v5904_v30  ;;  %v426_v49 = vld [vmem:[#allocation3 + $0x960] sm:$0xff] }
  0xcd   :  { %2634 = vmatprep.subr.bf16.mxu0 %v5913_v34  ;;  %v430_v58 = vld [vmem:[#allocation3 + $0x980] sm:$0xff]  ;;  %v5937_v61 = vcombine.high %v422_v48, %v426_v49  ;;  %v5936_v2 = vcombine.low %v422_v48, %v426_v49  ;;  %v211_v34 = vld [vmem:[#allocation3 + $0x2a8] sm:$0xff] }
  0xce   :  { %2717 = vmatpush1.bf16.msra.mxu1 %v5658_v37  ;;  %v434_v60 = vld [vmem:[#allocation3 + $0x9a0] sm:$0xff]  ;;  %v5723_v37 = vcombine.high %v207_v33, %v211_v34  ;;  %v5722_v43 = vcombine.low %v207_v33, %v211_v34  ;;  %v223_v49 = vld [vmem:[#allocation3 + $0x308] sm:$0xff]  ;;  %v7314_v33 = vcombine.low %v7298_v20, %v7298_v20 }
  0xcf   :  { %2718 = vmatprep.subr.bf16.mxu1 %v5667_v39  ;;  %v438_v4 = vld [vmem:[#allocation3 + $0x9c0] sm:$0xff]  ;;  %v5945_v6 = vcombine.high %v430_v58, %v434_v60  ;;  %v5944_v10 = vcombine.low %v430_v58, %v434_v60  ;;  %v231_v60 = vld [vmem:[#allocation3 + $0x348] sm:$0xff] }
  0xd0   :  { %2635 = vmatpush1.bf16.msra.mxu0 %v5912_v38  ;;  %v442_v5 = vld [vmem:[#allocation3 + $0x9e0] sm:$0xff]  ;;  %v279_v20 = vld [vmem:[#allocation3 + $0x4c8] sm:$0xff] }
  0xd1   :  { %2636 = vmatprep.subr.bf16.mxu0 %v5921_v42  ;;  %v446_v12 = vld [vmem:[#allocation3 + $0xa00] sm:$0xff]  ;;  %v5953_v14 = vcombine.high %v438_v4, %v442_v5  ;;  %v5952_v19 = vcombine.low %v438_v4, %v442_v5  ;;  %v219_v42 = vld [vmem:[#allocation3 + $0x2e8] sm:$0xff] }
  0xd2   :  { %2719 = vmatpush1.bf16.msra.mxu1 %v5666_v45  ;;  %v450_v13 = vld [vmem:[#allocation3 + $0xa20] sm:$0xff]  ;;  %v5731_v45 = vcombine.high %v215_v41, %v219_v42  ;;  %v5730_v51 = vcombine.low %v215_v41, %v219_v42  ;;  %v239_v5 = vld [vmem:[#allocation3 + $0x388] sm:$0xff] }
  0xd3   :  { %2720 = vmatprep.subr.bf16.mxu1 %v5675_v47  ;;  %v454_v23 = vld [vmem:[#allocation3 + $0xa40] sm:$0xff]  ;;  %v5961_v25 = vcombine.high %v446_v12, %v450_v13  ;;  %v5960_v28 = vcombine.low %v446_v12, %v450_v13  ;;  %v247_v13 = vld [vmem:[#allocation3 + $0x3c8] sm:$0xff] }
  0xd4   :  { %2637 = vmatpush1.bf16.msra.mxu0 %v5920_v46  ;;  %v458_v24 = vld [vmem:[#allocation3 + $0xa60] sm:$0xff]  ;;  %v283_v42 = vld [vmem:[#allocation3 + $0x4e8] sm:$0xff] }
  0xd5   :  { %2638 = vmatprep.subr.bf16.mxu0 %v5929_v50  ;;  %v462_v30 = vld [vmem:[#allocation3 + $0xa80] sm:$0xff]  ;;  %v5969_v32 = vcombine.high %v454_v23, %v458_v24  ;;  %v5968_v36 = vcombine.low %v454_v23, %v458_v24  ;;  %v227_v50 = vld [vmem:[#allocation3 + $0x328] sm:$0xff] }
  0xd6   :  { %2721 = vmatpush1.bf16.msra.mxu1 %v5674_v53  ;;  %v466_v31 = vld [vmem:[#allocation3 + $0xaa0] sm:$0xff]  ;;  %v5739_v53 = vcombine.high %v223_v49, %v227_v50  ;;  %v5738_v63 = vcombine.low %v223_v49, %v227_v50  ;;  %v291_v49 = vld [vmem:[#allocation3 + $0x528] sm:$0xff]  ;;  %v6465_v50 = vld [vmem:[%s7439_s0 + $0x18] ss:$0 sps:$4 sm:$0xff]  }
  0xd7   :  { %2722 = vmatprep.subr.bf16.mxu1 %v5683_v57  ;;  %v470_v38 = vld [vmem:[#allocation3 + $0xac0] sm:$0xff]  ;;  %v5977_v40 = vcombine.high %v462_v30, %v466_v31  ;;  %v5976_v44 = vcombine.low %v462_v30, %v466_v31  ;;  %v128_v31 = vld [vmem:[#allocation3 + $0x10] sm:$0xff] }
  0xd8   :  { %2639 = vmatpush1.bf16.msra.mxu0 %v5928_v56  ;;  %v474_v39 = vld [vmem:[#allocation3 + $0xae0] sm:$0xff] }
  0xd9   :  { %2640 = vmatprep.subr.bf16.mxu0 %v5937_v61  ;;  %v478_v46 = vld [vmem:[#allocation3 + $0xb00] sm:$0xff]  ;;  %v5985_v48 = vcombine.high %v470_v38, %v474_v39  ;;  %v5984_v52 = vcombine.low %v470_v38, %v474_v39  ;;  %v235_v61 = vld [vmem:[#allocation3 + $0x368] sm:$0xff] }
  0xda   :  { %2723 = vmatpush1.bf16.msra.mxu1 %v5682_v1  ;;  %v482_v47 = vld [vmem:[#allocation3 + $0xb20] sm:$0xff]  ;;  %v5747_v1 = vcombine.high %v231_v60, %v235_v61  ;;  %v5746_v7 = vcombine.low %v231_v60, %v235_v61  ;;  %v275_v38 = vld [vmem:[#allocation3 + $0x4a8] sm:$0xff] }
  0xdb   :  { %2724 = vmatprep.subr.bf16.mxu1 %v5691_v3  ;;  %v486_v56 = vld [vmem:[#allocation3 + $0xb40] sm:$0xff]  ;;  %v5993_v58 = vcombine.high %v478_v46, %v482_v47  ;;  %v5992_v0 = vcombine.low %v478_v46, %v482_v47  ;;  %v136_v46 = vld [vmem:[#allocation3 + $0x50] sm:$0xff]  ;;  %v299_v61 = vld [vmem:[#allocation3 + $0x568] sm:$0xff] }
  0xdc   :  { %2641 = vmatpush1.bf16.msra.mxu0 %v5936_v2  ;;  %v490_v57 = vld [vmem:[#allocation3 + $0xb60] sm:$0xff]  ;;  %v140_v47 = vld [vmem:[#allocation3 + $0x70] sm:$0xff] }
  0xdd   :  { %2642 = vmatprep.subr.bf16.mxu0 %v5945_v6  ;;  %v494_v2 = vld [vmem:[#allocation3 + $0xb80] sm:$0xff]  ;;  %v6001_v4 = vcombine.high %v486_v56, %v490_v57  ;;  %v243_v6 = vld [vmem:[#allocation3 + $0x3a8] sm:$0xff]  ;;  %v6000_v8 = vcombine.low %v486_v56, %v490_v57  ;;  %v144_v56 = vld [vmem:[#allocation3 + $0x90] sm:$0xff]  ;;  %v5653_v60 = vcombine.high %v136_v46, %v140_v47 }
  0xde   :  { %2725 = vmatpush1.bf16.msra.mxu1 %v5690_v9  ;;  %v498_v3 = vld [vmem:[#allocation3 + $0xba0] sm:$0xff]  ;;  %v5755_v9 = vcombine.high %v239_v5, %v243_v6  ;;  %v5754_v15 = vcombine.low %v239_v5, %v243_v6  ;;  %v148_v57 = vld [vmem:[#allocation3 + $0xb0] sm:$0xff]  ;;  %v307_v6 = vld [vmem:[#allocation3 + $0x5a8] sm:$0xff] }
  0xdf   :  { %2726 = vmatprep.subr.bf16.mxu1 %v5699_v11  ;;  %v506_v11 = vld [vmem:[#allocation3 + $0xbe0] sm:$0xff]  ;;  %v6009_v12 = vcombine.high %v494_v2, %v498_v3  ;;  %v6008_v16 = vcombine.low %v494_v2, %v498_v3  ;;  %v152_v2 = vld [vmem:[#allocation3 + $0xd0] sm:$0xff]  ;;  %v5661_v5 = vcombine.high %v144_v56, %v148_v57 }
  0xe0   :  { %2643 = vmatpush1.bf16.msra.mxu0 %v5944_v10  ;;  %v502_v10 = vld [vmem:[#allocation3 + $0xbc0] sm:$0xff]  ;;  %v156_v3 = vld [vmem:[#allocation3 + $0xf0] sm:$0xff] }
  0xe1   :  { %2644 = vmatprep.subr.bf16.mxu0 %v5953_v14  ;;  %v251_v14 = vld [vmem:[#allocation3 + $0x3e8] sm:$0xff]  ;;  %v6017_v23 = vcombine.high %v502_v10, %v506_v11  ;;  %v510_v24 = vld [vmem:[#allocation3 + $0xc00] sm:$0xff]  ;;  %v6016_v26 = vcombine.low %v502_v10, %v506_v11  ;;  %v160_v10 = vld [vmem:[#allocation3 + $0x110] sm:$0xff] }
  0xe2   :  { %2727 = vmatpush1.bf16.msra.mxu1 %v5698_v18  ;;  %v5763_v18 = vcombine.high %v247_v13, %v251_v14  ;;  %v5762_v54 = vcombine.low %v247_v13, %v251_v14  ;;  %v164_v11 = vld [vmem:[#allocation3 + $0x130] sm:$0xff]  ;;  %v311_v13 = vld [vmem:[#allocation3 + $0x5c8] sm:$0xff] }
  0xe3   :  { %2728 = vmatprep.subr.bf16.mxu1 %v5707_v21  ;;  %v259_v21 = vld [vmem:[#allocation3 + $0x428] sm:$0xff] }
  0xe4   :  { %2645 = vmatpush1.bf16.msra.mxu0 %v5952_v19  ;;  %v255_v19 = vld [vmem:[#allocation3 + $0x408] sm:$0xff] }
  0xe5   :  { %2646 = vmatprep.subr.bf16.mxu0 %v5961_v25  ;;  %v514_v25 = vld [vmem:[#allocation3 + $0xc20] sm:$0xff]  ;;  %v5770_v34 = vcombine.low %v255_v19, %v259_v21  ;;  %v315_v14 = vld [vmem:[#allocation3 + $0x5e8] sm:$0xff] }
  0xe6   :  { %2729 = vmatpush1.bf16.msra.mxu1 %v5706_v27  ;;  %v5771_v27 = vcombine.high %v255_v19, %v259_v21  ;;  %v6025_v30 = vcombine.high %v510_v24, %v514_v25  ;;  %v168_v19 = vld [vmem:[#allocation3 + $0x150] sm:$0xff] }
  0xe7   :  { %2730 = vmatprep.subr.bf16.mxu1 %v5715_v55  ;;  %v267_v55 = vld [vmem:[#allocation3 + $0x468] sm:$0xff]  ;;  %v172_v21 = vld [vmem:[#allocation3 + $0x170] sm:$0xff] }
  0xe8   :  { %2647 = vmatpush1.bf16.msra.mxu0 %v5960_v28  ;;  %v263_v28 = vld [vmem:[#allocation3 + $0x448] sm:$0xff] }
  0xe9   :  { %2648 = vmatprep.subr.bf16.mxu0 %v5969_v32  ;;  %v132_v32 = vld [vmem:[#allocation3 + $0x30] sm:$0xff] }
  0xea   :  { %2731 = vmatpush1.bf16.msra.mxu1 %v5714_v35  ;;  %v5779_v35 = vcombine.high %v263_v28, %v267_v55  ;;  %v5645_v39 = vcombine.high %v128_v31, %v132_v32 }
  0xeb   :  { %2732 = vmatprep.subr.bf16.mxu1 %v5723_v37  ;;  %v271_v37 = vld [vmem:[#allocation3 + $0x488] sm:$0xff] }
  0xec   :  { %2649 = vmatpush1.bf16.msra.mxu0 %v5968_v36  ;;  %v6024_v36 = vcombine.low %v510_v24, %v514_v25  ;;  %v5787_v41 = vcombine.high %v271_v37, %v275_v38  ;;  %v5677_v24 = vcombine.high %v160_v10, %v164_v11  ;;  %v323_v25 = vld [vmem:[#allocation3 + $0x628] sm:$0xff] }
  0xed   :  { %2650 = vmatprep.subr.bf16.mxu0 %v5977_v40  ;;  %v5778_v40 = vcombine.low %v263_v28, %v267_v55  ;;  %v176_v28 = vld [vmem:[#allocation3 + $0x190] sm:$0xff] }
  0xee   :  { %2733 = vmatpush1.bf16.msra.mxu1 %v5722_v43  ;;  %v7126_v43 = vmov 0   ;;  %v180_v55 = vld [vmem:[#allocation3 + $0x1b0] sm:$0xff] }
  0xef   :  { %2734 = vmatprep.subr.bf16.mxu1 %v5731_v45  ;;  %v5795_v45 = vcombine.high %v279_v20, %v283_v42 }
  0xf0   :  { %2651 = vmatpush1.bf16.msra.mxu0 %v5976_v44  ;;  %v5786_v44 = vcombine.low %v271_v37, %v275_v38  ;;  %v184_v37 = vld [vmem:[#allocation3 + $0x1d0] sm:$0xff] }
  0xf1   :  { %2652 = vmatprep.subr.bf16.mxu0 %v5985_v48  ;;  %v287_v48 = vld [vmem:[#allocation3 + $0x508] sm:$0xff]  ;;  %v188_v38 = vld [vmem:[#allocation3 + $0x1f0] sm:$0xff] }
  0xf2   :  { %2735 = vmatpush1.bf16.msra.mxu1 %v5730_v51  ;;  %v5794_v51 = vcombine.low %v279_v20, %v283_v42  ;;  %v5692_v42 = vcombine.low %v176_v28, %v180_v55 }
  0xf3   :  { %2736 = vmatprep.subr.bf16.mxu1 %v5739_v53  ;;  %v5803_v53 = vcombine.high %v287_v48, %v291_v49 }
  0xf4   :  { %2653 = vmatpush1.bf16.msra.mxu0 %v5984_v52  ;;  %v5644_v52 = vcombine.low %v128_v31, %v132_v32  ;;  %v5685_v31 = vcombine.high %v168_v19, %v172_v21  ;;  %v331_v32 = vld [vmem:[#allocation3 + $0x668] sm:$0xff] }
  0xf5   :  { %2654 = vmatprep.subr.bf16.mxu0 %v5993_v58  ;;  %v295_v58 = vld [vmem:[#allocation3 + $0x548] sm:$0xff] }
  0xf6   :  { %2737 = vmatpush1.bf16.msra.mxu1 %v5738_v63  ;;  %v5802_v63 = vcombine.low %v287_v48, %v291_v49  ;;  %v5701_v48 = vcombine.high %v184_v37, %v188_v38  ;;  %v347_v49 = vld [vmem:[#allocation3 + $0x6e8] sm:$0xff] }
  0xf7   :  { %2738 = vmatprep.subr.bf16.mxu1 %v5747_v1  ;;  %v5811_v1 = vcombine.high %v295_v58, %v299_v61 }
  0xf8   :  { %2655 = vmatpush1.bf16.msra.mxu0 %v5992_v0  ;;  %v5652_v0 = vcombine.low %v136_v46, %v140_v47  ;;  %v196_v46 = vld [vmem:[#allocation3 + $0x230] sm:$0xff]  ;;  %v343_v47 = vld [vmem:[#allocation3 + $0x6c8] sm:$0xff] }
  0xf9   :  { %2656 = vmatprep.subr.bf16.mxu0 %v6001_v4  ;;  %v303_v4 = vld [vmem:[#allocation3 + $0x588] sm:$0xff] }
  0xfa   :  { %2739 = vmatpush1.bf16.msra.mxu1 %v5746_v7  ;;  %v5810_v7 = vcombine.low %v295_v58, %v299_v61  ;;  %v5858_v61 = vcombine.low %v343_v47, %v347_v49 }
  0xfb   :  { %2740 = vmatprep.subr.bf16.mxu1 %v5755_v9  ;;  %v5819_v9 = vcombine.high %v303_v4, %v307_v6 }
  0xfc   :  { %2657 = vmatpush1.bf16.msra.mxu0 %v6000_v8  ;;  %v5660_v8 = vcombine.low %v144_v56, %v148_v57  ;;  %v204_v56 = vld [vmem:[#allocation3 + $0x270] sm:$0xff]  ;;  %v351_v57 = vld [vmem:[#allocation3 + $0x708] sm:$0xff] }
  0xfd   :  { %2658 = vmatprep.subr.bf16.mxu0 %v6009_v12  ;;  %v5669_v12 = vcombine.high %v152_v2, %v156_v3 }
  0xfe   :  { %2741 = vmatpush1.bf16.msra.mxu1 %v5754_v15  ;;  %v5818_v15 = vcombine.low %v303_v4, %v307_v6 }
  0xff   :  { %2742 = vmatprep.subr.bf16.mxu1 %v5763_v18  ;;  %v5827_v18 = vcombine.high %v311_v13, %v315_v14 }
 0x100   :  { %2659 = vmatpush1.bf16.msra.mxu0 %v6008_v16  ;;  %v5668_v16 = vcombine.low %v152_v2, %v156_v3  ;;  %v212_v2 = vld [vmem:[#allocation3 + $0x2b0] sm:$0xff]  ;;  %v359_v3 = vld [vmem:[#allocation3 + $0x748] sm:$0xff] }
 0x101   :  { %2660 = vmatprep.subr.bf16.mxu0 %v6017_v23  ;;  %v319_v23 = vld [vmem:[#allocation3 + $0x608] sm:$0xff] }
 0x102   :  { %2743 = vmatpush1.bf16.msra.mxu1 %v5762_v54  ;;  %v5826_v54 = vcombine.low %v311_v13, %v315_v14  ;;  %v371_v13 = vld [vmem:[#allocation3 + $0x7a8] sm:$0xff] }
 0x103   :  { %2753 = vmatprep.subr.bf16.mxu1 %v5771_v27  ;;  %v5835_v27 = vcombine.high %v319_v23, %v323_v25 }
 0x104   :  { %2661 = vmatpush1.bf16.msra.mxu0 %v6016_v26  ;;  %v5676_v26 = vcombine.low %v160_v10, %v164_v11  ;;  %v220_v10 = vld [vmem:[#allocation3 + $0x2f0] sm:$0xff]  ;;  %v367_v11 = vld [vmem:[#allocation3 + $0x788] sm:$0xff] }
 0x105   :  { %2671 = vmatprep.subr.bf16.mxu0 %v6025_v30  ;;  %2745 = vmatmul.mubr.bf16.vlgmr.msra.gmra.mrb[4].mxu1 %v7293_v17  ;;  %v327_v30 = vld [vmem:[#allocation3 + $0x648] sm:$0xff] }
 0x106   :  { %2754 = vmatpush1.bf16.msra.mxu1 %v5770_v34  ;;  %2785 = vmatprep.mubr.bf16.mxu1 %v7287_v62  ;;  %v5834_v34 = vcombine.low %v319_v23, %v323_v25  ;;  %v5842_v20 = vcombine.low %v327_v30, %v331_v32  ;;  %v5882_v25 = vcombine.low %v367_v11, %v371_v13 }
 0x107   :  { %2663 = vmatmul.mubr.bf16.vlgmr.msra.gmra.mrb[0].mxu0 %v7314_v33  ;;  %2755 = vmatprep.subr.bf16.mxu1 %v5779_v35  ;;  %v5684_v35 = vcombine.low %v168_v19, %v172_v21  ;;  %v228_v19 = vld [vmem:[#allocation3 + $0x330] sm:$0xff]  ;;  %v375_v21 = vld [vmem:[#allocation3 + $0x7c8] sm:$0xff] }
 0x108   :  { %2672 = vmatpush1.bf16.msra.mxu0 %v6024_v36  ;;  %2703 = vmatprep.mubr.bf16.mxu0 %v7126_v43  ;;  %v5843_v36 = vcombine.high %v327_v30, %v331_v32 }
 0x109   :  { %2876 = vmatprep.subr.bf16.mxu0 %v5645_v39  ;;  %v335_v39 = vld [vmem:[#allocation3 + $0x688] sm:$0xff] }
 0x10a   :  { %2756 = vmatpush1.bf16.msra.mxu1 %v5778_v40  ;;  %v5693_v40 = vcombine.high %v176_v28, %v180_v55  ;;  %v236_v28 = vld [vmem:[#allocation3 + $0x370] sm:$0xff]  ;;  %v383_v55 = vld [vmem:[#allocation3 + $0x808] sm:$0xff] }
 0x10b   :  { %2757 = vmatprep.subr.bf16.mxu1 %v5787_v41  ;;  %v339_v41 = vld [vmem:[#allocation3 + $0x6a8] sm:$0xff] }
 0x10e   :  { %2758 = vmatpush1.bf16.msra.mxu1 %v5786_v44  ;;  %v5851_v44 = vcombine.high %v335_v39, %v339_v41 }
 0x10f   :  { %2759 = vmatprep.subr.bf16.mxu1 %v5795_v45  ;;  %v192_v45 = vld [vmem:[#allocation3 + $0x210] sm:$0xff] }
 0x110   :  { %v5709_v58 = vcombine.high %v192_v45, %v196_v46 }
 0x112   :  { %2760 = vmatpush1.bf16.msra.mxu1 %v5794_v51  ;;  %v5700_v51 = vcombine.low %v184_v37, %v188_v38  ;;  %v244_v37 = vld [vmem:[#allocation3 + $0x3b0] sm:$0xff]  ;;  %v391_v38 = vld [vmem:[#allocation3 + $0x848] sm:$0xff] }
 0x113   :  { %6032 = vmatmul.mubr.msk.bf16.vlgmr.msra.gmra.mrb[0].mxu0 %vm2544_vm0, %v6465_v50  ;;  %2761 = vmatprep.subr.bf16.mxu1 %v5803_v53  ;;  %v5850_v50 = vcombine.low %v335_v39, %v339_v41  ;;  %v200_v53 = vld [vmem:[#allocation3 + $0x250] sm:$0xff] }
 0x114   :  { %2877 = vmatpush1.bf16.msra.mxu0 %v5644_v52  ;;  %2908 = vmatprep.mubr.bf16.mxu0 %v7283_v59  ;;  %v5859_v52 = vcombine.high %v343_v47, %v347_v49  ;;  %v5717_v4 = vcombine.high %v200_v53, %v204_v56 }
 0x115   :  { %2878 = vmatprep.subr.bf16.mxu0 %v5653_v60  ;;  %v355_v60 = vld [vmem:[#allocation3 + $0x728] sm:$0xff] }
 0x116   :  { %2762 = vmatpush1.bf16.msra.mxu1 %v5802_v63  ;;  %v5708_v63 = vcombine.low %v192_v45, %v196_v46  ;;  %v5866_v6 = vcombine.low %v351_v57, %v355_v60  ;;  %v252_v45 = vld [vmem:[#allocation3 + $0x3f0] sm:$0xff]  ;;  %v399_v46 = vld [vmem:[#allocation3 + $0x888] sm:$0xff] }
 0x117   :  { %2763 = vmatprep.subr.bf16.mxu1 %v5811_v1  ;;  %v208_v1 = vld [vmem:[#allocation3 + $0x290] sm:$0xff] }
 0x118   :  { %2879 = vmatpush1.bf16.msra.mxu0 %v5652_v0  ;;  %v5867_v0 = vcombine.high %v351_v57, %v355_v60 }
 0x119   :  { %2880 = vmatprep.subr.bf16.mxu0 %v5661_v5  ;;  %v363_v5 = vld [vmem:[#allocation3 + $0x768] sm:$0xff] }
 0x11a   :  { %2764 = vmatpush1.bf16.msra.mxu1 %v5810_v7  ;;  %v5716_v7 = vcombine.low %v200_v53, %v204_v56  ;;  %v5874_v14 = vcombine.low %v359_v3, %v363_v5  ;;  %v260_v53 = vld [vmem:[#allocation3 + $0x430] sm:$0xff]  ;;  %v407_v56 = vld [vmem:[#allocation3 + $0x8c8] sm:$0xff] }
 0x11b   :  { %2765 = vmatprep.subr.bf16.mxu1 %v5819_v9  ;;  %v216_v9 = vld [vmem:[#allocation3 + $0x2d0] sm:$0xff] }
 0x11c   :  { %2881 = vmatpush1.bf16.msra.mxu0 %v5660_v8  ;;  %v5875_v8 = vcombine.high %v359_v3, %v363_v5  ;;  %v5733_v23 = vcombine.high %v216_v9, %v220_v10 }
 0x11d   :  { %2882 = vmatprep.subr.bf16.mxu0 %v5669_v12  ;;  %v5725_v12 = vcombine.high %v208_v1, %v212_v2 }
 0x11e   :  { %2766 = vmatpush1.bf16.msra.mxu1 %v5818_v15  ;;  %v5724_v15 = vcombine.low %v208_v1, %v212_v2  ;;  %v268_v1 = vld [vmem:[#allocation3 + $0x470] sm:$0xff]  ;;  %v415_v2 = vld [vmem:[#allocation3 + $0x908] sm:$0xff] }
 0x11f   :  { %2767 = vmatprep.subr.bf16.mxu1 %v5827_v18  ;;  %v224_v18 = vld [vmem:[#allocation3 + $0x310] sm:$0xff] }
 0x120   :  { %2883 = vmatpush1.bf16.msra.mxu0 %v5668_v16  ;;  %v5883_v16 = vcombine.high %v367_v11, %v371_v13  ;;  %v5741_v30 = vcombine.high %v224_v18, %v228_v19  ;;  %v427_v11 = vld [vmem:[#allocation3 + $0x968] sm:$0xff] }
 0x121   :  { %2884 = vmatprep.subr.bf16.mxu0 %v5677_v24  ;;  %v379_v24 = vld [vmem:[#allocation3 + $0x7e8] sm:$0xff] }
 0x122   :  { %2768 = vmatpush1.bf16.msra.mxu1 %v5826_v54  ;;  %v5732_v54 = vcombine.low %v216_v9, %v220_v10  ;;  %v5890_v32 = vcombine.low %v375_v21, %v379_v24  ;;  %v276_v9 = vld [vmem:[#allocation3 + $0x4b0] sm:$0xff]  ;;  %v423_v10 = vld [vmem:[#allocation3 + $0x948] sm:$0xff] }
 0x123   :  { %2769 = vmatprep.subr.bf16.mxu1 %v5835_v27  ;;  %v232_v27 = vld [vmem:[#allocation3 + $0x350] sm:$0xff] }
 0x124   :  { %2885 = vmatpush1.bf16.msra.mxu0 %v5676_v26  ;;  %v5891_v26 = vcombine.high %v375_v21, %v379_v24  ;;  %v5749_v39 = vcombine.high %v232_v27, %v236_v28  ;;  %v284_v21 = vld [vmem:[#allocation3 + $0x4f0] sm:$0xff]  ;;  %v5938_v24 = vcombine.low %v423_v10, %v427_v11 }
 0x125   :  { %2886 = vmatprep.subr.bf16.mxu0 %v5685_v31  ;;  %v387_v31 = vld [vmem:[#allocation3 + $0x828] sm:$0xff] }
 0x126   :  { %2770 = vmatpush1.bf16.msra.mxu1 %v5834_v34  ;;  %v5740_v34 = vcombine.low %v224_v18, %v228_v19  ;;  %v5898_v41 = vcombine.low %v383_v55, %v387_v31  ;;  %v5939_v18 = vcombine.high %v423_v10, %v427_v11  ;;  %v280_v19 = vld [vmem:[#allocation3 + $0x4d0] sm:$0xff] }
 0x127   :  { %2771 = vmatprep.subr.bf16.mxu1 %v5843_v36  ;;  %v240_v36 = vld [vmem:[#allocation3 + $0x390] sm:$0xff] }
 0x128   :  { %2887 = vmatpush1.bf16.msra.mxu0 %v5684_v35  ;;  %v5899_v35 = vcombine.high %v383_v55, %v387_v31  ;;  %v5757_v47 = vcombine.high %v240_v36, %v244_v37  ;;  %v443_v55 = vld [vmem:[#allocation3 + $0x9e8] sm:$0xff]  ;;  %v328_v10 = vld [vmem:[#allocation3 + $0x650] sm:$0xff] }
 0x129   :  { %2888 = vmatprep.subr.bf16.mxu0 %v5693_v40  ;;  %v395_v40 = vld [vmem:[#allocation3 + $0x868] sm:$0xff]  ;;  %v332_v11 = vld [vmem:[#allocation3 + $0x670] sm:$0xff] }
 0x12a   :  { %2772 = vmatpush1.bf16.msra.mxu1 %v5842_v20  ;;  %v5748_v20 = vcombine.low %v232_v27, %v236_v28  ;;  %v5906_v49 = vcombine.low %v391_v38, %v395_v40  ;;  %v288_v27 = vld [vmem:[#allocation3 + $0x510] sm:$0xff] }
 0x12b   :  { %2773 = vmatprep.subr.bf16.mxu1 %v5851_v44  ;;  %v248_v44 = vld [vmem:[#allocation3 + $0x3d0] sm:$0xff] }
 0x12c   :  { %2889 = vmatpush1.bf16.msra.mxu0 %v5692_v42  ;;  %v5907_v42 = vcombine.high %v391_v38, %v395_v40  ;;  %v5765_v57 = vcombine.high %v248_v44, %v252_v45  ;;  %v292_v28 = vld [vmem:[#allocation3 + $0x530] sm:$0xff]  ;;  %v451_v38 = vld [vmem:[#allocation3 + $0xa28] sm:$0xff] }
 0x12d   :  { %2890 = vmatprep.subr.bf16.mxu0 %v5701_v48  ;;  %v403_v48 = vld [vmem:[#allocation3 + $0x8a8] sm:$0xff] }
 0x12e   :  { %2774 = vmatpush1.bf16.msra.mxu1 %v5850_v50  ;;  %v5756_v50 = vcombine.low %v240_v36, %v244_v37  ;;  %v5914_v60 = vcombine.low %v399_v46, %v403_v48  ;;  %v300_v36 = vld [vmem:[#allocation3 + $0x570] sm:$0xff]  ;;  %v447_v37 = vld [vmem:[#allocation3 + $0xa08] sm:$0xff] }
 0x12f   :  { %2775 = vmatprep.subr.bf16.mxu1 %v5859_v52  ;;  %v256_v52 = vld [vmem:[#allocation3 + $0x410] sm:$0xff] }
 0x130   :  { %2891 = vmatpush1.bf16.msra.mxu0 %v5700_v51  ;;  %v5915_v51 = vcombine.high %v399_v46, %v403_v48  ;;  %v5773_v3 = vcombine.high %v256_v52, %v260_v53  ;;  %v304_v46 = vld [vmem:[#allocation3 + $0x590] sm:$0xff]  ;;  %v5962_v48 = vcombine.low %v447_v37, %v451_v38 }
 0x131   :  { %2892 = vmatprep.subr.bf16.mxu0 %v5709_v58  ;;  %v411_v58 = vld [vmem:[#allocation3 + $0x8e8] sm:$0xff] }
 0x132   :  { %2776 = vmatpush1.bf16.msra.mxu1 %v5858_v61  ;;  %v5764_v61 = vcombine.low %v248_v44, %v252_v45  ;;  %v5922_v5 = vcombine.low %v407_v56, %v411_v58  ;;  %v455_v44 = vld [vmem:[#allocation3 + $0xa48] sm:$0xff] }
 0x133   :  { %2777 = vmatprep.subr.bf16.mxu1 %v5867_v0  ;;  %v264_v0 = vld [vmem:[#allocation3 + $0x450] sm:$0xff]  ;;  %v459_v45 = vld [vmem:[#allocation3 + $0xa68] sm:$0xff] }
 0x134   :  { %2893 = vmatpush1.bf16.msra.mxu0 %v5708_v63  ;;  %v5923_v63 = vcombine.high %v407_v56, %v411_v58  ;;  %v312_v56 = vld [vmem:[#allocation3 + $0x5d0] sm:$0xff]  ;;  %v5970_v58 = vcombine.low %v455_v44, %v459_v45 }
 0x135   :  { %2894 = vmatprep.subr.bf16.mxu0 %v5717_v4  ;;  %v419_v4 = vld [vmem:[#allocation3 + $0x928] sm:$0xff] }
 0x136   :  { %2778 = vmatpush1.bf16.msra.mxu1 %v5866_v6  ;;  %v5772_v6 = vcombine.low %v256_v52, %v260_v53  ;;  %v5930_v13 = vcombine.low %v415_v2, %v419_v4  ;;  %v463_v52 = vld [vmem:[#allocation3 + $0xa88] sm:$0xff] }
 0x137   :  { %2779 = vmatprep.subr.bf16.mxu1 %v5875_v8  ;;  %v272_v8 = vld [vmem:[#allocation3 + $0x490] sm:$0xff]  ;;  %v467_v53 = vld [vmem:[#allocation3 + $0xaa8] sm:$0xff] }
 0x138   :  { %2895 = vmatpush1.bf16.msra.mxu0 %v5716_v7  ;;  %v5931_v7 = vcombine.high %v415_v2, %v419_v4  ;;  %v320_v2 = vld [vmem:[#allocation3 + $0x610] sm:$0xff]  ;;  %v5978_v4 = vcombine.low %v463_v52, %v467_v53 }
 0x139   :  { %2896 = vmatprep.subr.bf16.mxu0 %v5725_v12  ;;  %v5781_v12 = vcombine.high %v264_v0, %v268_v1 }
 0x13a   :  { %2780 = vmatpush1.bf16.msra.mxu1 %v5874_v14  ;;  %v431_v14 = vld [vmem:[#allocation3 + $0x988] sm:$0xff] }
 0x13b   :  { %2781 = vmatprep.subr.bf16.mxu1 %v5883_v16  ;;  %v5780_v16 = vcombine.low %v264_v0, %v268_v1  ;;  %v471_v0 = vld [vmem:[#allocation3 + $0xac8] sm:$0xff] }
 0x13c   :  { %2897 = vmatpush1.bf16.msra.mxu0 %v5724_v15  ;;  %v435_v15 = vld [vmem:[#allocation3 + $0x9a8] sm:$0xff] }
 0x13d   :  { %2898 = vmatprep.subr.bf16.mxu0 %v5733_v23  ;;  %v5789_v23 = vcombine.high %v272_v8, %v276_v9  ;;  %v5946_v31 = vcombine.low %v431_v14, %v435_v15  ;;  %v475_v1 = vld [vmem:[#allocation3 + $0xae8] sm:$0xff] }
 0x13e   :  { %2782 = vmatpush1.bf16.msra.mxu1 %v5882_v25  ;;  %v439_v25 = vld [vmem:[#allocation3 + $0x9c8] sm:$0xff] }
 0x13f   :  { %2783 = vmatprep.subr.bf16.mxu1 %v5891_v26  ;;  %v5947_v26 = vcombine.high %v431_v14, %v435_v15  ;;  %v5954_v40 = vcombine.low %v439_v25, %v443_v55  ;;  %v5845_v15 = vcombine.high %v328_v10, %v332_v11 }
 0x140   :  { %2899 = vmatpush1.bf16.msra.mxu0 %v5732_v54  ;;  %v5788_v54 = vcombine.low %v272_v8, %v276_v9  ;;  %v479_v8 = vld [vmem:[#allocation3 + $0xb08] sm:$0xff] }
 0x141   :  { %2900 = vmatprep.subr.bf16.mxu0 %v5741_v30  ;;  %v5797_v30 = vcombine.high %v280_v19, %v284_v21  ;;  %v483_v9 = vld [vmem:[#allocation3 + $0xb28] sm:$0xff] }
 0x142   :  { %2784 = vmatpush1.bf16.msra.mxu1 %v5890_v32  ;;  %v5796_v32 = vcombine.low %v280_v19, %v284_v21  ;;  %v5995_v14 = vcombine.high %v479_v8, %v483_v9  ;;  %v336_v19 = vld [vmem:[#allocation3 + $0x690] sm:$0xff] }
 0x143   :  { %2794 = vmatprep.subr.bf16.mxu1 %v5899_v35  ;;  %v296_v35 = vld [vmem:[#allocation3 + $0x550] sm:$0xff] }
 0x144   :  { %2901 = vmatpush1.bf16.msra.mxu0 %v5740_v34  ;;  %v5955_v34 = vcombine.high %v439_v25, %v443_v55  ;;  %v340_v21 = vld [vmem:[#allocation3 + $0x6b0] sm:$0xff] }
 0x145   :  { %2902 = vmatprep.subr.bf16.mxu0 %v5749_v39  ;;  %2786 = vmatmul.mubr.bf16.vlgmr.msra.gmra.mrb[4].mxu1 %v7302_v22  ;;  %v5805_v39 = vcombine.high %v288_v27, %v292_v28  ;;  %v348_v55 = vld [vmem:[#allocation3 + $0x6f0] sm:$0xff] }
 0x146   :  { %2795 = vmatpush1.bf16.msra.mxu1 %v5898_v41  ;;  %2826 = vmatprep.mubr.bf16.mxu1 %v7306_v29  ;;  %v5804_v41 = vcombine.low %v288_v27, %v292_v28  ;;  %v499_v27 = vld [vmem:[#allocation3 + $0xba8] sm:$0xff]  ;;  %v344_v28 = vld [vmem:[#allocation3 + $0x6d0] sm:$0xff] }
 0x147   :  { %2796 = vmatprep.subr.bf16.mxu1 %v5907_v42  ;;  %v5813_v42 = vcombine.high %v296_v35, %v300_v36 }
 0x148   :  { %2903 = vmatpush1.bf16.msra.mxu0 %v5748_v20  ;;  %v5963_v20 = vcombine.high %v447_v37, %v451_v38  ;;  %v352_v37 = vld [vmem:[#allocation3 + $0x710] sm:$0xff] }
 0x149   :  { %2904 = vmatprep.subr.bf16.mxu0 %v5757_v47  ;;  %v308_v47 = vld [vmem:[#allocation3 + $0x5b0] sm:$0xff] }
 0x14a   :  { %2797 = vmatpush1.bf16.msra.mxu1 %v5906_v49  ;;  %v5812_v49 = vcombine.low %v296_v35, %v300_v36  ;;  %v503_v35 = vld [vmem:[#allocation3 + $0xbc8] sm:$0xff]  ;;  %v356_v38 = vld [vmem:[#allocation3 + $0x730] sm:$0xff] }
 0x14b   :  { %2798 = vmatprep.subr.bf16.mxu1 %v5915_v51  ;;  %v5821_v51 = vcombine.high %v304_v46, %v308_v47  ;;  %v507_v36 = vld [vmem:[#allocation3 + $0xbe8] sm:$0xff] }
 0x14c   :  { %2905 = vmatpush1.bf16.msra.mxu0 %v5756_v50  ;;  %v5971_v50 = vcombine.high %v455_v44, %v459_v45  ;;  %v515_v44 = vld [vmem:[#allocation3 + $0xc28] sm:$0xff]  ;;  %v360_v45 = vld [vmem:[#allocation3 + $0x750] sm:$0xff] }
 0x14d   :  { %2906 = vmatprep.subr.bf16.mxu0 %v5765_v57  ;;  %v316_v57 = vld [vmem:[#allocation3 + $0x5f0] sm:$0xff] }
 0x14e   :  { %2799 = vmatpush1.bf16.msra.mxu1 %v5914_v60  ;;  %v5820_v60 = vcombine.low %v304_v46, %v308_v47  ;;  %v364_v46 = vld [vmem:[#allocation3 + $0x770] sm:$0xff]  ;;  %v6018_v47 = vcombine.low %v503_v35, %v507_v36 }
 0x14f   :  { %2800 = vmatprep.subr.bf16.mxu1 %v5923_v63  ;;  %v5829_v63 = vcombine.high %v312_v56, %v316_v57 }
 0x150   :  { %2907 = vmatpush1.bf16.msra.mxu0 %v5764_v61  ;;  %v5979_v61 = vcombine.high %v463_v52, %v467_v53  ;;  %v133_v52 = vld [vmem:[#allocation3 + $0x38] sm:$0xff]  ;;  %v368_v53 = vld [vmem:[#allocation3 + $0x790] sm:$0xff] }
 0x151   :  { %2917 = vmatprep.subr.bf16.mxu0 %v5773_v3  ;;  %v324_v3 = vld [vmem:[#allocation3 + $0x630] sm:$0xff] }
 0x152   :  { %2801 = vmatpush1.bf16.msra.mxu1 %v5922_v5  ;;  %v5828_v5 = vcombine.low %v312_v56, %v316_v57  ;;  %v372_v56 = vld [vmem:[#allocation3 + $0x7b0] sm:$0xff] }
 0x153   :  { %2909 = vmatmul.mubr.bf16.vlgmr.msra.gmra.mrb[4].mxu0 %v7293_v17  ;;  %2802 = vmatprep.subr.bf16.mxu1 %v5931_v7  ;;  %v5837_v7 = vcombine.high %v320_v2, %v324_v3 }
 0x154   :  { %2918 = vmatpush1.bf16.msra.mxu0 %v5772_v6  ;;  %2949 = vmatprep.mubr.bf16.mxu0 %v7287_v62  ;;  %v5987_v6 = vcombine.high %v471_v0, %v475_v1 }
 0x155   :  { %2919 = vmatprep.subr.bf16.mxu0 %v5781_v12  ;;  %v5986_v12 = vcombine.low %v471_v0, %v475_v1  ;;  %v380_v0 = vld [vmem:[#allocation3 + $0x7f0] sm:$0xff]  ;;  %v5884_v1 = vcombine.low %v368_v53, %v372_v56 }
 0x156   :  { %2803 = vmatpush1.bf16.msra.mxu1 %v5930_v13  ;;  %v5836_v13 = vcombine.low %v320_v2, %v324_v3  ;;  %v384_v3 = vld [vmem:[#allocation3 + $0x810] sm:$0xff] }
 0x157   :  { %2804 = vmatprep.subr.bf16.mxu1 %v5939_v18  ;;  %v491_v18 = vld [vmem:[#allocation3 + $0xb68] sm:$0xff] }
 0x158   :  { %2920 = vmatpush1.bf16.msra.mxu0 %v5780_v16  ;;  %v487_v16 = vld [vmem:[#allocation3 + $0xb48] sm:$0xff] }
 0x159   :  { %2921 = vmatprep.subr.bf16.mxu0 %v5789_v23  ;;  %v5994_v23 = vcombine.low %v479_v8, %v483_v9  ;;  %v6003_v25 = vcombine.high %v487_v16, %v491_v18  ;;  %v141_v8 = vld [vmem:[#allocation3 + $0x78] sm:$0xff]  ;;  %v392_v9 = vld [vmem:[#allocation3 + $0x850] sm:$0xff] }
 0x15a   :  { %2805 = vmatpush1.bf16.msra.mxu1 %v5938_v24  ;;  %v5844_v24 = vcombine.low %v328_v10, %v332_v11  ;;  %v396_v10 = vld [vmem:[#allocation3 + $0x870] sm:$0xff] }
 0x15b   :  { %2806 = vmatprep.subr.bf16.mxu1 %v5947_v26  ;;  %v495_v26 = vld [vmem:[#allocation3 + $0xb88] sm:$0xff] }
 0x15c   :  { %2922 = vmatpush1.bf16.msra.mxu0 %v5788_v54  ;;  %v5853_v54 = vcombine.high %v336_v19, %v340_v21 }
 0x15d   :  { %2923 = vmatprep.subr.bf16.mxu0 %v5797_v30  ;;  %v6002_v30 = vcombine.low %v487_v16, %v491_v18  ;;  %v149_v16 = vld [vmem:[#allocation3 + $0xb8] sm:$0xff]  ;;  %v7334_v18 = vld [vmem:[%s7439_s0 + $0x18] ss:$0 sps:$4 sm:$0xff]  }
 0x15e   :  { %2807 = vmatpush1.bf16.msra.mxu1 %v5946_v31  ;;  %v5852_v31 = vcombine.low %v336_v19, %v340_v21  ;;  %v400_v19 = vld [vmem:[#allocation3 + $0x890] sm:$0xff] }
 0x15f   :  { %2808 = vmatprep.subr.bf16.mxu1 %v5955_v34  ;;  %v5861_v34 = vcombine.high %v344_v28, %v348_v55  ;;  %v404_v21 = vld [vmem:[#allocation3 + $0x8b0] sm:$0xff] }
 0x160   :  { %2924 = vmatpush1.bf16.msra.mxu0 %v5796_v32  ;;  %v6011_v32 = vcombine.high %v495_v26, %v499_v27 }
 0x161   :  { %2925 = vmatprep.subr.bf16.mxu0 %v5805_v39  ;;  %v6010_v39 = vcombine.low %v495_v26, %v499_v27  ;;  %v153_v26 = vld [vmem:[#allocation3 + $0xd8] sm:$0xff] }
 0x162   :  { %2809 = vmatpush1.bf16.msra.mxu1 %v5954_v40  ;;  %v5860_v40 = vcombine.low %v344_v28, %v348_v55  ;;  %v157_v27 = vld [vmem:[#allocation3 + $0xf8] sm:$0xff]  ;;  %v408_v28 = vld [vmem:[#allocation3 + $0x8d0] sm:$0xff] }
 0x163   :  { %2810 = vmatprep.subr.bf16.mxu1 %v5963_v20  ;;  %v5869_v20 = vcombine.high %v352_v37, %v356_v38  ;;  %v412_v55 = vld [vmem:[#allocation3 + $0x8f0] sm:$0xff] }
 0x164   :  { %2926 = vmatpush1.bf16.msra.mxu0 %v5804_v41  ;;  %v6019_v41 = vcombine.high %v503_v35, %v507_v36  ;;  %v5925_v35 = vcombine.high %v408_v28, %v412_v55  ;;  %v161_v36 = vld [vmem:[#allocation3 + $0x118] sm:$0xff] }
 0x165   :  { %2927 = vmatprep.subr.bf16.mxu0 %v5813_v42  ;;  %v511_v42 = vld [vmem:[#allocation3 + $0xc08] sm:$0xff] }
 0x166   :  { %2811 = vmatpush1.bf16.msra.mxu1 %v5962_v48  ;;  %v5868_v48 = vcombine.low %v352_v37, %v356_v38  ;;  %v6026_v57 = vcombine.low %v511_v42, %v515_v44  ;;  %v165_v37 = vld [vmem:[#allocation3 + $0x138] sm:$0xff] }
 0x167   :  { %2812 = vmatprep.subr.bf16.mxu1 %v5971_v50  ;;  %v5877_v50 = vcombine.high %v360_v45, %v364_v46 }
 0x168   :  { %2928 = vmatpush1.bf16.msra.mxu0 %v5812_v49  ;;  %v6027_v49 = vcombine.high %v511_v42, %v515_v44  ;;  %v5924_v42 = vcombine.low %v408_v28, %v412_v55  ;;  %v5679_v44 = vcombine.high %v161_v36, %v165_v37  ;;  %v209_v55 = vld [vmem:[#allocation3 + $0x298] sm:$0xff] }
 0x169   :  { %2929 = vmatprep.subr.bf16.mxu0 %v5821_v51  ;;  %v129_v51 = vld [vmem:[#allocation3 + $0x18] sm:$0xff] }
 0x16a   :  { %2813 = vmatpush1.bf16.msra.mxu1 %v5970_v58  ;;  %v5876_v58 = vcombine.low %v360_v45, %v364_v46  ;;  %v5646_v11 = vcombine.low %v129_v51, %v133_v52  ;;  %v169_v46 = vld [vmem:[#allocation3 + $0x158] sm:$0xff] }
 0x16b   :  { %2814 = vmatprep.subr.bf16.mxu1 %v5979_v61  ;;  %v5885_v61 = vcombine.high %v368_v53, %v372_v56  ;;  %v177_v56 = vld [vmem:[#allocation3 + $0x198] sm:$0xff] }
 0x16c   :  { %2930 = vmatpush1.bf16.msra.mxu0 %v5820_v60  ;;  %v5647_v60 = vcombine.high %v129_v51, %v133_v52 }
 0x16d   :  { %2931 = vmatprep.subr.bf16.mxu0 %v5829_v63  ;;  %v376_v63 = vld [vmem:[#allocation3 + $0x7d0] sm:$0xff] }
 0x16e   :  { %2815 = vmatpush1.bf16.msra.mxu1 %v5978_v4  ;;  %v5893_v2 = vcombine.high %v376_v63, %v380_v0  ;;  %v388_v4 = vld [vmem:[#allocation3 + $0x830] sm:$0xff] }
 0x16f   :  { %2816 = vmatprep.subr.bf16.mxu1 %v5987_v6  ;;  %v5901_v6 = vcombine.high %v384_v3, %v388_v4 }
 0x170   :  { %2932 = vmatpush1.bf16.msra.mxu0 %v5828_v5  ;;  %v5892_v5 = vcombine.low %v376_v63, %v380_v0 }
 0x171   :  { %2933 = vmatprep.subr.bf16.mxu0 %v5837_v7  ;;  %v137_v7 = vld [vmem:[#allocation3 + $0x58] sm:$0xff] }
 0x172   :  { %2817 = vmatpush1.bf16.msra.mxu1 %v5986_v12  ;;  %v5900_v12 = vcombine.low %v384_v3, %v388_v4  ;;  %v189_v3 = vld [vmem:[#allocation3 + $0x1f8] sm:$0xff]  ;;  %v440_v4 = vld [vmem:[#allocation3 + $0x9d0] sm:$0xff] }
 0x173   :  { %2818 = vmatprep.subr.bf16.mxu1 %v5995_v14  ;;  %v5909_v14 = vcombine.high %v392_v9, %v396_v10 }
 0x174   :  { %2934 = vmatpush1.bf16.msra.mxu0 %v5836_v13  ;;  %v5655_v13 = vcombine.high %v137_v7, %v141_v8 }
 0x175   :  { %2935 = vmatprep.subr.bf16.mxu0 %v5845_v15  ;;  %v145_v15 = vld [vmem:[#allocation3 + $0x98] sm:$0xff] }
 0x176   :  { %2819 = vmatpush1.bf16.msra.mxu1 %v5994_v23  ;;  %v5654_v23 = vcombine.low %v137_v7, %v141_v8 }
 0x177   :  { %2820 = vmatprep.subr.bf16.mxu1 %v6003_v25  ;;  %v5663_v25 = vcombine.high %v145_v15, %v149_v16 }
 0x178   :  { %2936 = vmatpush1.bf16.msra.mxu0 %v5844_v24  ;;  %v5908_v24 = vcombine.low %v392_v9, %v396_v10  ;;  %v193_v10 = vld [vmem:[#allocation3 + $0x218] sm:$0xff] }
 0x179   :  { %2937 = vmatprep.subr.bf16.mxu0 %v5853_v54  ;;  %v5917_v54 = vcombine.high %v400_v19, %v404_v21 }
 0x17a   :  { %2821 = vmatpush1.bf16.msra.mxu1 %v6002_v30  ;;  %v5662_v30 = vcombine.low %v145_v15, %v149_v16 }
 0x17b   :  { %2822 = vmatprep.subr.bf16.mxu1 %v6011_v32  ;;  %v5671_v32 = vcombine.high %v153_v26, %v157_v27 }
 0x17c   :  { %2938 = vmatpush1.bf16.msra.mxu0 %v5852_v31  ;;  %v5916_v31 = vcombine.low %v400_v19, %v404_v21  ;;  %v201_v21 = vld [vmem:[#allocation3 + $0x258] sm:$0xff] }
 0x17d   :  { %2939 = vmatprep.subr.bf16.mxu0 %v5861_v34 }
 0x17e   :  { %2823 = vmatpush1.bf16.msra.mxu1 %v6010_v39  ;;  %v416_v39 = vld [vmem:[#allocation3 + $0x910] sm:$0xff] }
 0x17f   :  { %2824 = vmatprep.subr.bf16.mxu1 %v6019_v41 }
 0x180   :  { %2940 = vmatpush1.bf16.msra.mxu0 %v5860_v40  ;;  %v420_v40 = vld [vmem:[#allocation3 + $0x930] sm:$0xff] }
 0x181   :  { %2941 = vmatprep.subr.bf16.mxu0 %v5869_v20  ;;  %v5670_v20 = vcombine.low %v153_v26, %v157_v27  ;;  %v5933_v45 = vcombine.high %v416_v39, %v420_v40  ;;  %v5932_v51 = vcombine.low %v416_v39, %v420_v40  ;;  %v217_v40 = vld [vmem:[#allocation3 + $0x2d8] sm:$0xff] }
 0x182   :  { %2825 = vmatpush1.bf16.msra.mxu1 %v6018_v47  ;;  %v173_v47 = vld [vmem:[#allocation3 + $0x178] sm:$0xff] }
 0x183   :  { %2835 = vmatprep.subr.bf16.mxu1 %v6027_v49  ;;  %v428_v49 = vld [vmem:[#allocation3 + $0x970] sm:$0xff]  ;;  %v5687_v52 = vcombine.high %v169_v46, %v173_v47 }
 0x184   :  { %2942 = vmatpush1.bf16.msra.mxu0 %v5868_v48  ;;  %v424_v48 = vld [vmem:[#allocation3 + $0x950] sm:$0xff] }
 0x185   :  { %2943 = vmatprep.subr.bf16.mxu0 %v5877_v50  ;;  %2827 = vmatmul.mubr.bf16.vlgmr.msra.gmra.mrb[4].mxu1 %v7314_v33  ;;  %v5678_v50 = vcombine.low %v161_v36, %v165_v37  ;;  %v5941_v53 = vcombine.high %v424_v48, %v428_v49  ;;  %v5940_v63 = vcombine.low %v424_v48, %v428_v49  ;;  %v229_v48 = vld [vmem:[#allocation3 + $0x338] sm:$0xff]  ;;  %v480_v49 = vld [vmem:[#allocation3 + $0xb10] sm:$0xff] }
 0x186   :  { %2836 = vmatpush1.bf16.msra.mxu1 %v6026_v57  ;;  %2867 = vmatprep.mubr.bf16.mxu1 %v7126_v43  ;;  %v181_v57 = vld [vmem:[#allocation3 + $0x1b8] sm:$0xff] }
 0x187   :  { %3040 = vmatprep.subr.bf16.mxu1 %v5647_v60  ;;  %v436_v60 = vld [vmem:[#allocation3 + $0x9b0] sm:$0xff]  ;;  %v5695_v0 = vcombine.high %v177_v56, %v181_v57 }
 0x188   :  { %2944 = vmatpush1.bf16.msra.mxu0 %v5876_v58  ;;  %v432_v58 = vld [vmem:[#allocation3 + $0x990] sm:$0xff] }
 0x189   :  { %2945 = vmatprep.subr.bf16.mxu0 %v5885_v61  ;;  %v5686_v61 = vcombine.low %v169_v46, %v173_v47  ;;  %v5948_v7 = vcombine.low %v432_v58, %v436_v60  ;;  %v225_v47 = vld [vmem:[#allocation3 + $0x318] sm:$0xff] }
 0x18c   :  { %2946 = vmatpush1.bf16.msra.mxu0 %v5884_v1  ;;  %v5949_v1 = vcombine.high %v432_v58, %v436_v60  ;;  %v237_v58 = vld [vmem:[#allocation3 + $0x378] sm:$0xff]  ;;  %v488_v60 = vld [vmem:[#allocation3 + $0xb50] sm:$0xff] }
 0x18d   :  { %2947 = vmatprep.subr.bf16.mxu0 %v5893_v2  ;;  %v185_v2 = vld [vmem:[#allocation3 + $0x1d8] sm:$0xff] }
 0x18e   :  { %v5703_v8 = vcombine.high %v185_v2, %v189_v3 }
 0x190   :  { %2948 = vmatpush1.bf16.msra.mxu0 %v5892_v5  ;;  %v444_v5 = vld [vmem:[#allocation3 + $0x9f0] sm:$0xff] }
 0x191   :  { %2958 = vmatprep.subr.bf16.mxu0 %v5901_v6  ;;  %6033 = vmatmul.mubr.msk.bf16.vlgmr.msra.gmra.mrb[4].mxu1 %vm2544_vm0, %v7334_v18  ;;  %v5694_v6 = vcombine.low %v177_v56, %v181_v57  ;;  %v5957_v9 = vcombine.high %v440_v4, %v444_v5  ;;  %v5956_v15 = vcombine.low %v440_v4, %v444_v5  ;;  %v233_v57 = vld [vmem:[#allocation3 + $0x358] sm:$0xff]  ;;  %v496_v5 = vld [vmem:[#allocation3 + $0xb90] sm:$0xff] }
 0x192   :  { %3041 = vmatpush1.bf16.msra.mxu1 %v5646_v11  ;;  %3072 = vmatprep.mubr.bf16.mxu1 %v7283_v59  ;;  %v197_v11 = vld [vmem:[#allocation3 + $0x238] sm:$0xff] }
 0x193   :  { %2950 = vmatmul.mubr.bf16.vlgmr.msra.gmra.mrb[4].mxu0 %v7302_v22  ;;  %3042 = vmatprep.subr.bf16.mxu1 %v5655_v13  ;;  %v452_v13 = vld [vmem:[#allocation3 + $0xa30] sm:$0xff]  ;;  %v5711_v16 = vcombine.high %v193_v10, %v197_v11  ;;  %v245_v4 = vld [vmem:[#allocation3 + $0x3b8] sm:$0xff] }
 0x194   :  { %2959 = vmatpush1.bf16.msra.mxu0 %v5900_v12  ;;  %2990 = vmatprep.mubr.bf16.mxu0 %v7306_v29  ;;  %v448_v12 = vld [vmem:[#allocation3 + $0xa10] sm:$0xff] }
 0x195   :  { %2960 = vmatprep.subr.bf16.mxu0 %v5909_v14  ;;  %v5702_v14 = vcombine.low %v185_v2, %v189_v3  ;;  %v5965_v19 = vcombine.high %v448_v12, %v452_v13  ;;  %v5964_v26 = vcombine.low %v448_v12, %v452_v13  ;;  %v241_v3 = vld [vmem:[#allocation3 + $0x398] sm:$0xff]  ;;  %v504_v13 = vld [vmem:[#allocation3 + $0xbd0] sm:$0xff] }
 0x196   :  { %3043 = vmatpush1.bf16.msra.mxu1 %v5654_v23  ;;  %v205_v23 = vld [vmem:[#allocation3 + $0x278] sm:$0xff] }
 0x197   :  { %3044 = vmatprep.subr.bf16.mxu1 %v5663_v25  ;;  %v460_v25 = vld [vmem:[#allocation3 + $0xa70] sm:$0xff]  ;;  %v5719_v27 = vcombine.high %v201_v21, %v205_v23  ;;  %v253_v12 = vld [vmem:[#allocation3 + $0x3f8] sm:$0xff] }
 0x198   :  { %2961 = vmatpush1.bf16.msra.mxu0 %v5908_v24  ;;  %v7341_v34 = vpop.f32.mrb[0].mxu1  ;;  %v456_v24 = vld [vmem:[#allocation3 + $0xa50] sm:$0xff] }
 0x199   :  { %2962 = vmatprep.subr.bf16.mxu0 %v5917_v54  ;;  %v7343_v38 = vpop.f32.mrb[1].mxu1  ;;  %v5710_v54 = vcombine.low %v193_v10, %v197_v11  ;;  %v5973_v28 = vcombine.high %v456_v24, %v460_v25  ;;  %v5972_v36 = vcombine.low %v456_v24, %v460_v25  ;;  %v249_v11 = vld [vmem:[#allocation3 + $0x3d8] sm:$0xff]  ;;  %v512_v25 = vld [vmem:[#allocation3 + $0xc10] sm:$0xff] }
 0x19a   :  { %3045 = vmatpush1.bf16.msra.mxu1 %v5662_v30  ;;  %v2586_v41 = vpop.f32.mrb[2].mxu1  ;;  %v213_v30 = vld [vmem:[#allocation3 + $0x2b8] sm:$0xff] }
 0x19b   :  { %v2587_v59 = vpop.f32.mrb[3].mxu1  ;;  %3046 = vmatprep.subr.bf16.mxu1 %v5671_v32  ;;  %v468_v32 = vld [vmem:[#allocation3 + $0xab0] sm:$0xff]  ;;  %v5727_v37 = vcombine.high %v209_v55, %v213_v30  ;;  %v221_v41 = vld [vmem:[#allocation3 + $0x2f8] sm:$0xff] }
 0x19c   :  { %2963 = vmatpush1.bf16.msra.mxu0 %v5916_v31  ;;  %v464_v31 = vld [vmem:[#allocation3 + $0xa90] sm:$0xff]  ;;  %v261_v24 = vld [vmem:[#allocation3 + $0x438] sm:$0xff] }
 0x19d   :  { %2964 = vmatprep.subr.bf16.mxu0 %v5925_v35  ;;  %v5718_v35 = vcombine.low %v201_v21, %v205_v23  ;;  %v5981_v39 = vcombine.high %v464_v31, %v468_v32  ;;  %v476_v59 = vld [vmem:[#allocation3 + $0xaf0] sm:$0xff]  ;;  %v257_v23 = vld [vmem:[#allocation3 + $0x418] sm:$0xff] }
 0x19e   :  { %3047 = vmatpush1.bf16.msra.mxu1 %v5670_v20  ;;  %v472_v20 = vld [vmem:[#allocation3 + $0xad0] sm:$0xff] }
 0x19f   :  { %3048 = vmatprep.subr.bf16.mxu1 %v5679_v44  ;;  %v5980_v44 = vcombine.low %v464_v31, %v468_v32  ;;  %v5989_v46 = vcombine.high %v472_v20, %v476_v59  ;;  %v5774_v32 = vcombine.low %v257_v23, %v261_v24 }
 0x1a0   :  { %2965 = vmatpush1.bf16.msra.mxu0 %v5924_v42  ;;  %v5726_v42 = vcombine.low %v209_v55, %v213_v30  ;;  %v265_v55 = vld [vmem:[#allocation3 + $0x458] sm:$0xff] }
 0x1a1   :  { %2966 = vmatprep.subr.bf16.mxu0 %v5933_v45  ;;  %v5735_v45 = vcombine.high %v217_v40, %v221_v41  ;;  %v269_v30 = vld [vmem:[#allocation3 + $0x478] sm:$0xff] }
 0x1a2   :  { %3049 = vmatpush1.bf16.msra.mxu1 %v5678_v50  ;;  %v484_v50 = vld [vmem:[#allocation3 + $0xb30] sm:$0xff] }
 0x1a3   :  { %3050 = vmatprep.subr.bf16.mxu1 %v5687_v52  ;;  %v5988_v52 = vcombine.low %v472_v20, %v476_v59  ;;  %v5997_v56 = vcombine.high %v480_v49, %v484_v50  ;;  %v520_v59 = vlaneseq }
 0x1a4   :  { %2967 = vmatpush1.bf16.msra.mxu0 %v5932_v51  ;;  %v5734_v51 = vcombine.low %v217_v40, %v221_v41  ;;  %v6468_v40 = vld [vmem:[#allocation7 + $0x4] ss:$16 sps:$4 sm:$0xff]   ;;  %v5782_v41 = vcombine.low %v265_v55, %v269_v30 }
 0x1a5   :  { %2968 = vmatprep.subr.bf16.mxu0 %v5941_v53  ;;  %v5743_v53 = vcombine.high %v225_v47, %v229_v48 }
 0x1a6   :  { %3051 = vmatpush1.bf16.msra.mxu1 %v5686_v61  ;;  %v492_v61 = vld [vmem:[#allocation3 + $0xb70] sm:$0xff] }
 0x1a7   :  { %3052 = vmatprep.subr.bf16.mxu1 %v5695_v0  ;;  %v5996_v0 = vcombine.low %v480_v49, %v484_v50  ;;  %v6005_v2 = vcombine.high %v488_v60, %v492_v61  ;;  %v6466_v50 = vld [vmem:[#allocation7] ss:$16 sps:$4 sm:$0xff]  }
 0x1a8   :  { %2969 = vmatpush1.bf16.msra.mxu0 %v5940_v63  ;;  %v5742_v63 = vcombine.low %v225_v47, %v229_v48  ;;  %v289_v47 = vld [vmem:[#allocation3 + $0x518] sm:$0xff] }
 0x1a9   :  { %2970 = vmatprep.subr.bf16.mxu0 %v5949_v1  ;;  %v5751_v1 = vcombine.high %v233_v57, %v237_v58  ;;  %v293_v48 = vld [vmem:[#allocation3 + $0x538] sm:$0xff] }
 0x1aa   :  { %3053 = vmatpush1.bf16.msra.mxu1 %v5694_v6  ;;  %v500_v6 = vld [vmem:[#allocation3 + $0xbb0] sm:$0xff] }
 0x1ab   :  { %3054 = vmatprep.subr.bf16.mxu1 %v5703_v8  ;;  %v6004_v8 = vcombine.low %v488_v60, %v492_v61  ;;  %v6013_v10 = vcombine.high %v496_v5, %v500_v6  ;;  %v5806_v60 = vcombine.low %v289_v47, %v293_v48  ;;  %v6469_v61 = vld [vmem:[#allocation7 + $0x20] ss:$16 sps:$4 sm:$0xff]  }
 0x1ac   :  { %2971 = vmatpush1.bf16.msra.mxu0 %v5948_v7  ;;  %v5750_v7 = vcombine.low %v233_v57, %v237_v58  ;;  %v301_v57 = vld [vmem:[#allocation3 + $0x578] sm:$0xff] }
 0x1ad   :  { %2972 = vmatprep.subr.bf16.mxu0 %v5957_v9  ;;  %v5759_v9 = vcombine.high %v241_v3, %v245_v4 }
 0x1ae   :  { %3055 = vmatpush1.bf16.msra.mxu1 %v5702_v14  ;;  %v508_v14 = vld [vmem:[#allocation3 + $0xbf0] sm:$0xff] }
 0x1af   :  { %3056 = vmatprep.subr.bf16.mxu1 %v5711_v16  ;;  %v6012_v16 = vcombine.low %v496_v5, %v500_v6  ;;  %v6021_v21 = vcombine.high %v504_v13, %v508_v14 }
 0x1b0   :  { %2973 = vmatpush1.bf16.msra.mxu0 %v5956_v15  ;;  %v5758_v15 = vcombine.low %v241_v3, %v245_v4  ;;  %v309_v3 = vld [vmem:[#allocation3 + $0x5b8] sm:$0xff] }
 0x1b1   :  { %2974 = vmatprep.subr.bf16.mxu0 %v5965_v19  ;;  %v5767_v19 = vcombine.high %v249_v11, %v253_v12 }
 0x1b2   :  { %3057 = vmatpush1.bf16.msra.mxu1 %v5710_v54  ;;  %v516_v54 = vld [vmem:[#allocation3 + $0xc30] sm:$0xff] }
 0x1b3   :  { %3058 = vmatprep.subr.bf16.mxu1 %v5719_v27  ;;  %v6020_v27 = vcombine.low %v504_v13, %v508_v14  ;;  %v6029_v31 = vcombine.high %v512_v25, %v516_v54 }
 0x1b4   :  { %2975 = vmatpush1.bf16.msra.mxu0 %v5964_v26  ;;  %v5766_v26 = vcombine.low %v249_v11, %v253_v12 }
 0x1b5   :  { %2976 = vmatprep.subr.bf16.mxu0 %v5973_v28  ;;  %v5775_v28 = vcombine.high %v257_v23, %v261_v24 }
 0x1b6   :  { %3059 = vmatpush1.bf16.msra.mxu1 %v5718_v35  ;;  %v5783_v35 = vcombine.high %v265_v55, %v269_v30  ;;  %v6483_v30 = vld [vmem:[#allocation7 + $0xa4] ss:$16 sps:$4 sm:$0xff]  }
 0x1b7   :  { %3060 = vmatprep.subr.bf16.mxu1 %v5727_v37  ;;  %v273_v37 = vld [vmem:[#allocation3 + $0x498] sm:$0xff] }
 0x1b8   :  { %2977 = vmatpush1.bf16.msra.mxu0 %v5972_v36  ;;  %v6028_v36 = vcombine.low %v512_v25, %v516_v54  ;;  %v321_v25 = vld [vmem:[#allocation3 + $0x618] sm:$0xff] }
 0x1b9   :  { %2978 = vmatprep.subr.bf16.mxu0 %v5981_v39  ;;  %v277_v39 = vld [vmem:[#allocation3 + $0x4b8] sm:$0xff] }
 0x1ba   :  { %3061 = vmatpush1.bf16.msra.mxu1 %v5726_v42  ;;  %v5791_v20 = vcombine.high %v273_v37, %v277_v39  ;;  %v281_v42 = vld [vmem:[#allocation3 + $0x4d8] sm:$0xff] }
 0x1bb   :  { %3062 = vmatprep.subr.bf16.mxu1 %v5735_v45  ;;  %v5790_v45 = vcombine.low %v273_v37, %v277_v39  ;;  %v325_v54 = vld [vmem:[#allocation3 + $0x638] sm:$0xff] }
 0x1bc   :  { %2979 = vmatpush1.bf16.msra.mxu0 %v5980_v44  ;;  %v285_v44 = vld [vmem:[#allocation3 + $0x4f8] sm:$0xff]  ;;  %v5839_v55 = vcombine.high %v321_v25, %v325_v54 }
 0x1bd   :  { %2980 = vmatprep.subr.bf16.mxu0 %v5989_v46  ;;  %v5799_v46 = vcombine.high %v281_v42, %v285_v44  ;;  %v5798_v49 = vcombine.low %v281_v42, %v285_v44  ;;  %v6486_v39 = vld [vmem:[#allocation7 + $0xc4] ss:$16 sps:$4 sm:$0xff]  }
 0x1be   :  { %3063 = vmatpush1.bf16.msra.mxu1 %v5734_v51  ;;  %v5807_v51 = vcombine.high %v289_v47, %v293_v48  ;;  %v6489_v44 = vld [vmem:[#allocation7 + $0xe4] ss:$16 sps:$4 sm:$0xff]   ;;  %v6487_v48 = vld [vmem:[#allocation7 + $0xe0] ss:$16 sps:$4 sm:$0xff]  }
 0x1bf   :  { %3064 = vmatprep.subr.bf16.mxu1 %v5743_v53  ;;  %v6471_v53 = vld [vmem:[#allocation7 + $0x24] ss:$16 sps:$4 sm:$0xff]  }
 0x1c0   :  { %2981 = vmatpush1.bf16.msra.mxu0 %v5988_v52 }
 0x1c1   :  { %2982 = vmatprep.subr.bf16.mxu0 %v5997_v56  ;;  %v297_v56 = vld [vmem:[#allocation3 + $0x558] sm:$0xff] }
 0x1c2   :  { %3065 = vmatpush1.bf16.msra.mxu1 %v5742_v63  ;;  %v5815_v63 = vcombine.high %v297_v56, %v301_v57  ;;  %v5814_v5 = vcombine.low %v297_v56, %v301_v57  ;;  %v6490_v57 = vld [vmem:[#allocation7 + $0x100] ss:$16 sps:$4 sm:$0xff]  }
 0x1c3   :  { %3066 = vmatprep.subr.bf16.mxu1 %v5751_v1  ;;  %v6474_v1 = vld [vmem:[#allocation7 + $0x44] ss:$16 sps:$4 sm:$0xff]  }
 0x1c4   :  { %2983 = vmatpush1.bf16.msra.mxu0 %v5996_v0 }
 0x1c5   :  { %2984 = vmatprep.subr.bf16.mxu0 %v6005_v2  ;;  %v305_v2 = vld [vmem:[#allocation3 + $0x598] sm:$0xff] }
 0x1c6   :  { %3067 = vmatpush1.bf16.msra.mxu1 %v5750_v7  ;;  %v5823_v6 = vcombine.high %v305_v2, %v309_v3 }
 0x1c7   :  { %3068 = vmatprep.subr.bf16.mxu1 %v5759_v9  ;;  %v313_v9 = vld [vmem:[#allocation3 + $0x5d8] sm:$0xff] }
 0x1c8   :  { %2985 = vmatpush1.bf16.msra.mxu0 %v6004_v8  ;;  %v6477_v8 = vld [vmem:[#allocation7 + $0x64] ss:$16 sps:$4 sm:$0xff]  }
 0x1c9   :  { %2986 = vmatprep.subr.bf16.mxu0 %v6013_v10  ;;  %v317_v10 = vld [vmem:[#allocation3 + $0x5f8] sm:$0xff] }
 0x1ca   :  { %3069 = vmatpush1.bf16.msra.mxu1 %v5758_v15  ;;  %v5822_v15 = vcombine.low %v305_v2, %v309_v3  ;;  %v5831_v23 = vcombine.high %v313_v9, %v317_v10  ;;  %v6493_v2 = vld [vmem:[#allocation7 + $0x120] ss:$16 sps:$4 sm:$0xff]  }
 0x1cb   :  { %3070 = vmatprep.subr.bf16.mxu1 %v5767_v19 }
 0x1cc   :  { %2987 = vmatpush1.bf16.msra.mxu0 %v6012_v16 }
 0x1cd   :  { %2988 = vmatprep.subr.bf16.mxu0 %v6021_v21  ;;  %v6475_v21 = vld [vmem:[#allocation7 + $0x60] ss:$16 sps:$4 sm:$0xff]  }
 0x1ce   :  { %3071 = vmatpush1.bf16.msra.mxu1 %v5766_v26 }
 0x1cf   :  { %3081 = vmatprep.subr.bf16.mxu1 %v5775_v28  ;;  %v6478_v28 = vld [vmem:[#allocation7 + $0x80] ss:$16 sps:$4 sm:$0xff]  }
 0x1d0   :  { %2989 = vmatpush1.bf16.msra.mxu0 %v6020_v27 }
 0x1d1   :  { %2999 = vmatprep.subr.bf16.mxu0 %v6029_v31  ;;  %3073 = vmatmul.mubr.bf16.vlgmr.msra.gmra.mrb[8].mxu1 %v7293_v17  ;;  %v7349_v17 = vshrl.u32 %v520_v59, 7  ;;  %v329_v31 = vld [vmem:[#allocation3 + $0x658] sm:$0xff] }
 0x1d2   :  { %3082 = vmatpush1.bf16.msra.mxu1 %v5774_v32  ;;  %3113 = vmatprep.mubr.bf16.mxu1 %v7287_v62  ;;  %v7354_v62 = vld [vmem:[#allocation5] sm:$0xff]  ;;  %v333_v32 = vld [vmem:[#allocation3 + $0x678] sm:$0xff] }
 0x1d3   :  { %2991 = vmatmul.mubr.bf16.vlgmr.msra.gmra.mrb[4].mxu0 %v7314_v33  ;;  %3083 = vmatprep.subr.bf16.mxu1 %v5783_v35  ;;  %v7352_v52 = vsub.s32 0, %v7349_v17  ;;  %v7357_v58 = vsub.s32 1, %v7349_v17  ;;  %v5838_v35 = vcombine.low %v321_v25, %v325_v54  ;;  %v5847_v37 = vcombine.high %v329_v31, %v333_v32  ;;  %v6484_v59 = vld [vmem:[#allocation7 + $0xc0] ss:$16 sps:$4 sm:$0xff]   ;;  %v6507_v25 = vld [vmem:[#allocation7 + $0x1a4] ss:$16 sps:$4 sm:$0xff]  }
 0x1d4   :  { %3000 = vmatpush1.bf16.msra.mxu0 %v6028_v36  ;;  %3031 = vmatprep.mubr.bf16.mxu0 %v7126_v43  ;;  %v6481_v36 = vld [vmem:[#allocation7 + $0xa0] ss:$16 sps:$4 sm:$0xff]  }
 0x1d5   :  { %4778 = vmatprep.subr.bf16.mxu0 %v6468_v40  ;;  %v523_v0 = vrot.slane %v7354_v62, %v7352_v52  ;;  %v527_v4 = vrot.slane %v7354_v62, %v7357_v58  ;;  %v337_v40 = vld [vmem:[#allocation3 + $0x698] sm:$0xff] }
 0x1d6   :  { %3084 = vmatpush1.bf16.msra.mxu1 %v5782_v41  ;;  %v341_v41 = vld [vmem:[#allocation3 + $0x6b8] sm:$0xff] }
 0x1d7   :  { %3085 = vmatprep.subr.bf16.mxu1 %v5791_v20  ;;  %v2583_v7 = vadd.f32 %v7341_v34, %v523_v0  ;;  %v2585_v11 = vadd.f32 %v7343_v38, %v527_v4  ;;  %v6480_v34 = vld [vmem:[#allocation7 + $0x84] ss:$16 sps:$4 sm:$0xff]   ;;  %v5830_v38 = vcombine.low %v313_v9, %v317_v10  ;;  %v5846_v20 = vcombine.low %v329_v31, %v333_v32 }
 0x1d8   :  { %v5855_v42 = vcombine.high %v337_v40, %v341_v41  ;;  %v5854_v47 = vcombine.low %v337_v40, %v341_v41  ;;  %v365_v0 = vld [vmem:[#allocation3 + $0x778] sm:$0xff] }
 0x1d9   :  { %v6498_v4 = vld [vmem:[#allocation7 + $0x144] ss:$16 sps:$4 sm:$0xff]  }
 0x1da   :  { %3086 = vmatpush1.bf16.msra.mxu1 %v5790_v45  ;;  %v345_v45 = vld [vmem:[#allocation3 + $0x6d8] sm:$0xff] }
 0x1db   :  { %3087 = vmatprep.subr.bf16.mxu1 %v5799_v46  ;;  %v349_v46 = vld [vmem:[#allocation3 + $0x6f8] sm:$0xff] }
 0x1dc   :  { %v5862_v56 = vcombine.low %v345_v45, %v349_v46  ;;  %v6501_v9 = vld [vmem:[#allocation7 + $0x164] ss:$16 sps:$4 sm:$0xff]  }
 0x1dd   :  { %v377_v10 = vld [vmem:[#allocation3 + $0x7d8] sm:$0xff] }
 0x1de   :  { %3088 = vmatpush1.bf16.msra.mxu1 %v5798_v49  ;;  %v5863_v49 = vcombine.high %v345_v45, %v349_v46  ;;  %v393_v54 = vld [vmem:[#allocation3 + $0x858] sm:$0xff] }
 0x1df   :  { %6034 = vmatmul.mubr.msk.bf16.vlgmr.msra.gmra.mrb[4].mxu0 %vm2544_vm0, %v7334_v18  ;;  %3089 = vmatprep.subr.bf16.mxu1 %v5807_v51  ;;  %v6472_v18 = vld [vmem:[#allocation7 + $0x40] ss:$16 sps:$4 sm:$0xff]  }
 0x1e0   :  { %4779 = vmatpush1.bf16.msra.mxu0 %v6466_v50  ;;  %v6492_v50 = vld [vmem:[#allocation7 + $0x104] ss:$16 sps:$4 sm:$0xff]  }
 0x1e1   :  { %4780 = vmatprep.subr.bf16.mxu0 %v6471_v53  ;;  %v353_v51 = vld [vmem:[#allocation3 + $0x718] sm:$0xff] }
 0x1e2   :  { %3090 = vmatpush1.bf16.msra.mxu1 %v5806_v60  ;;  %v357_v53 = vld [vmem:[#allocation3 + $0x738] sm:$0xff] }
 0x1e3   :  { %3091 = vmatprep.subr.bf16.mxu1 %v5815_v63  ;;  %v5871_v60 = vcombine.high %v353_v51, %v357_v53  ;;  %v361_v63 = vld [vmem:[#allocation3 + $0x758] sm:$0xff] }
 0x1e4   :  { %4781 = vmatpush1.bf16.msra.mxu0 %v6469_v61  ;;  %v6495_v61 = vld [vmem:[#allocation7 + $0x124] ss:$16 sps:$4 sm:$0xff]   ;;  %v5879_v3 = vcombine.high %v361_v63, %v365_v0 }
 0x1e5   :  { %4782 = vmatprep.subr.bf16.mxu0 %v6474_v1  ;;  %v5870_v1 = vcombine.low %v353_v51, %v357_v53  ;;  %v401_v31 = vld [vmem:[#allocation3 + $0x898] sm:$0xff] }
 0x1e6   :  { %v2705_v12 = vpop.f32.mrb[0].mxu0  ;;  %3092 = vmatpush1.bf16.msra.mxu1 %v5814_v5  ;;  %v369_v5 = vld [vmem:[#allocation3 + $0x798] sm:$0xff] }
 0x1e7   :  { %v7367_v13 = vadd.f32 %v2705_v12, %v2583_v7  ;;  %v2707_v14 = vpop.f32.mrb[1].mxu0  ;;  %3093 = vmatprep.subr.bf16.mxu1 %v5823_v6  ;;  %v5878_v6 = vcombine.low %v361_v63, %v365_v0  ;;  %v6496_v7 = vld [vmem:[#allocation7 + $0x140] ss:$16 sps:$4 sm:$0xff]   ;;  %v6519_v53 = vld [vmem:[#allocation7 + $0x224] ss:$16 sps:$4 sm:$0xff]  }
 0x1e8   :  { %4783 = vmatpush1.bf16.msra.mxu0 %v6472_v18  ;;  %v6360_v16 = vadd.f32 %v2707_v14, %v2585_v11  ;;  %v2709_v19 = vpop.f32.mrb[2].mxu0  ;;  %v373_v18 = vld [vmem:[#allocation3 + $0x7b8] sm:$0xff] }
 0x1e9   :  { %v2710_v24 = vpop.f32.mrb[3].mxu0  ;;  %4784 = vmatprep.subr.bf16.mxu0 %v6477_v8  ;;  %v5887_v8 = vcombine.high %v369_v5, %v373_v18  ;;  %v381_v11 = vld [vmem:[#allocation3 + $0x7f8] sm:$0xff]  ;;  %v5886_v12 = vcombine.low %v369_v5, %v373_v18 }
 0x1ea   :  { %v3205_v26 = vmax.f32 %v6360_v16, 0.0  ;;  %3094 = vmatpush1.bf16.msra.mxu1 %v5822_v15  ;;  %v6499_v14 = vld [vmem:[#allocation7 + $0x160] ss:$16 sps:$4 sm:$0xff]   ;;  %v5895_v15 = vcombine.high %v377_v10, %v381_v11  ;;  %v6504_v16 = vld [vmem:[#allocation7 + $0x184] ss:$16 sps:$4 sm:$0xff]  }
 0x1eb   :  { %3095 = vmatprep.subr.bf16.mxu1 %v5831_v23  ;;  %v385_v19 = vld [vmem:[#allocation3 + $0x818] sm:$0xff]  ;;  %v5894_v23 = vcombine.low %v377_v10, %v381_v11 }
 0x1ec   :  { %v7369_v27 = vpack.c.bf16 %v3205_v26, %v3205_v26  ;;  %4785 = vmatpush1.bf16.msra.mxu0 %v6475_v21  ;;  %v389_v21 = vld [vmem:[#allocation3 + $0x838] sm:$0xff] }
 0x1ed   :  { %4786 = vmatprep.subr.bf16.mxu0 %v6480_v34  ;;  %v6502_v24 = vld [vmem:[#allocation7 + $0x180] ss:$16 sps:$4 sm:$0xff]   ;;  %v5903_v34 = vcombine.high %v385_v19, %v389_v21  ;;  %v6522_v63 = vld [vmem:[#allocation7 + $0x244] ss:$16 sps:$4 sm:$0xff]  }
 0x1ee   :  { %4810 = vmatprep.mubr.bf16.mxu0 %v7369_v27  ;;  %3096 = vmatpush1.bf16.msra.mxu1 %v5830_v38  ;;  %v397_v26 = vld [vmem:[#allocation3 + $0x878] sm:$0xff]  ;;  %v5902_v38 = vcombine.low %v385_v19, %v389_v21 }
 0x1ef   :  { %3097 = vmatprep.subr.bf16.mxu1 %v5839_v55  ;;  %v5911_v55 = vcombine.high %v393_v54, %v397_v26  ;;  %v405_v32 = vld [vmem:[#allocation3 + $0x8b8] sm:$0xff] }
 0x1f0   :  { %4787 = vmatpush1.bf16.msra.mxu0 %v6478_v28  ;;  %v6505_v28 = vld [vmem:[#allocation7 + $0x1a0] ss:$16 sps:$4 sm:$0xff]   ;;  %v6525_v5 = vld [vmem:[#allocation7 + $0x264] ss:$16 sps:$4 sm:$0xff]  }
 0x1f1   :  { %4788 = vmatprep.subr.bf16.mxu0 %v6483_v30  ;;  %v6510_v30 = vld [vmem:[#allocation7 + $0x1c4] ss:$16 sps:$4 sm:$0xff]  }
 0x1f2   :  { %3098 = vmatpush1.bf16.msra.mxu1 %v5838_v35  ;;  %v5910_v35 = vcombine.low %v393_v54, %v397_v26  ;;  %v409_v40 = vld [vmem:[#allocation3 + $0x8d8] sm:$0xff] }
 0x1f3   :  { %3099 = vmatprep.subr.bf16.mxu1 %v5847_v37  ;;  %v5919_v37 = vcombine.high %v401_v31, %v405_v32  ;;  %v413_v41 = vld [vmem:[#allocation3 + $0x8f8] sm:$0xff] }
 0x1f4   :  { %4789 = vmatpush1.bf16.msra.mxu0 %v6481_v36  ;;  %v6508_v36 = vld [vmem:[#allocation7 + $0x1c0] ss:$16 sps:$4 sm:$0xff]   ;;  %v5926_v46 = vcombine.low %v409_v40, %v413_v41  ;;  %v6528_v10 = vld [vmem:[#allocation7 + $0x284] ss:$16 sps:$4 sm:$0xff]  }
 0x1f5   :  { %4790 = vmatprep.subr.bf16.mxu0 %v6486_v39  ;;  %v6513_v39 = vld [vmem:[#allocation7 + $0x1e4] ss:$16 sps:$4 sm:$0xff]  }
 0x1f6   :  { %3100 = vmatpush1.bf16.msra.mxu1 %v5846_v20  ;;  %v5918_v20 = vcombine.low %v401_v31, %v405_v32  ;;  %v421_v45 = vld [vmem:[#allocation3 + $0x938] sm:$0xff] }
 0x1f7   :  { %3101 = vmatprep.subr.bf16.mxu1 %v5855_v42  ;;  %v5927_v42 = vcombine.high %v409_v40, %v413_v41  ;;  %v429_v51 = vld [vmem:[#allocation3 + $0x978] sm:$0xff] }
 0x1f8   :  { %4791 = vmatpush1.bf16.msra.mxu0 %v6484_v59  ;;  %v6511_v59 = vld [vmem:[#allocation7 + $0x1e0] ss:$16 sps:$4 sm:$0xff]   ;;  %v6531_v19 = vld [vmem:[#allocation7 + $0x2a4] ss:$16 sps:$4 sm:$0xff]  }
 0x1f9   :  { %4792 = vmatprep.subr.bf16.mxu0 %v6489_v44  ;;  %v417_v44 = vld [vmem:[#allocation3 + $0x918] sm:$0xff] }
 0x1fa   :  { %3102 = vmatpush1.bf16.msra.mxu1 %v5854_v47  ;;  %v5935_v47 = vcombine.high %v417_v44, %v421_v45  ;;  %v6534_v54 = vld [vmem:[#allocation7 + $0x2c4] ss:$16 sps:$4 sm:$0xff]  }
 0x1fb   :  { %3103 = vmatprep.subr.bf16.mxu1 %v5863_v49  ;;  %v6537_v31 = vld [vmem:[#allocation7 + $0x2e4] ss:$16 sps:$4 sm:$0xff]  }
 0x1fc   :  { %4793 = vmatpush1.bf16.msra.mxu0 %v6487_v48  ;;  %v6514_v48 = vld [vmem:[#allocation7 + $0x200] ss:$16 sps:$4 sm:$0xff]   ;;  %v6540_v40 = vld [vmem:[#allocation7 + $0x304] ss:$16 sps:$4 sm:$0xff]  }
 0x1fd   :  { %4794 = vmatprep.subr.bf16.mxu0 %v6492_v50  ;;  %v425_v50 = vld [vmem:[#allocation3 + $0x958] sm:$0xff] }
 0x1fe   :  { %3104 = vmatpush1.bf16.msra.mxu1 %v5862_v56  ;;  %v5943_v56 = vcombine.high %v425_v50, %v429_v51  ;;  %v5942_v0 = vcombine.low %v425_v50, %v429_v51  ;;  %v6546_v50 = vld [vmem:[#allocation7 + $0x344] ss:$16 sps:$4 sm:$0xff]  }
 0x1ff   :  { %3105 = vmatprep.subr.bf16.mxu1 %v5871_v60  ;;  %v433_v60 = vld [vmem:[#allocation3 + $0x998] sm:$0xff] }
 0x200   :  { %4795 = vmatpush1.bf16.msra.mxu0 %v6490_v57  ;;  %v6517_v57 = vld [vmem:[#allocation7 + $0x220] ss:$16 sps:$4 sm:$0xff]  }
 0x201   :  { %4796 = vmatprep.subr.bf16.mxu0 %v6495_v61  ;;  %v437_v61 = vld [vmem:[#allocation3 + $0x9b8] sm:$0xff] }
 0x202   :  { %3106 = vmatpush1.bf16.msra.mxu1 %v5870_v1  ;;  %v5951_v1 = vcombine.high %v433_v60, %v437_v61  ;;  %v5950_v18 = vcombine.low %v433_v60, %v437_v61  ;;  %v6549_v60 = vld [vmem:[#allocation7 + $0x364] ss:$16 sps:$4 sm:$0xff]  }
 0x203   :  { %3107 = vmatprep.subr.bf16.mxu1 %v5879_v3  ;;  %v441_v3 = vld [vmem:[#allocation3 + $0x9d8] sm:$0xff] }
 0x204   :  { %4797 = vmatpush1.bf16.msra.mxu0 %v6493_v2  ;;  %v6520_v2 = vld [vmem:[#allocation7 + $0x240] ss:$16 sps:$4 sm:$0xff]  }
 0x205   :  { %4798 = vmatprep.subr.bf16.mxu0 %v6498_v4  ;;  %v445_v4 = vld [vmem:[#allocation3 + $0x9f8] sm:$0xff] }
 0x206   :  { %3108 = vmatpush1.bf16.msra.mxu1 %v5878_v6  ;;  %v5959_v6 = vcombine.high %v441_v3, %v445_v4  ;;  %v5958_v11 = vcombine.low %v441_v3, %v445_v4  ;;  %v6555_v3 = vld [vmem:[#allocation7 + $0x384] ss:$16 sps:$4 sm:$0xff]  }
 0x207   :  { %3109 = vmatprep.subr.bf16.mxu1 %v5887_v8  ;;  %v449_v8 = vld [vmem:[#allocation3 + $0xa18] sm:$0xff] }
 0x208   :  { %4799 = vmatpush1.bf16.msra.mxu0 %v6496_v7  ;;  %v6523_v7 = vld [vmem:[#allocation7 + $0x260] ss:$16 sps:$4 sm:$0xff]  }
 0x209   :  { %4800 = vmatprep.subr.bf16.mxu0 %v6501_v9  ;;  %v453_v9 = vld [vmem:[#allocation3 + $0xa38] sm:$0xff] }
 0x20a   :  { %3110 = vmatpush1.bf16.msra.mxu1 %v5886_v12  ;;  %v5967_v12 = vcombine.high %v449_v8, %v453_v9  ;;  %v5966_v21 = vcombine.low %v449_v8, %v453_v9  ;;  %v6552_v8 = vld [vmem:[#allocation7 + $0xc] ss:$16 sps:$4 sm:$0xff]   ;;  %v6559_v9 = vld [vmem:[#allocation7 + $0x3a0] ss:$16 sps:$4 sm:$0xff]  }
 0x20b   :  { %3111 = vmatprep.subr.bf16.mxu1 %v5895_v15  ;;  %v457_v15 = vld [vmem:[#allocation3 + $0xa58] sm:$0xff] }
 0x20c   :  { %4801 = vmatpush1.bf16.msra.mxu0 %v6499_v14  ;;  %v6526_v14 = vld [vmem:[#allocation7 + $0x280] ss:$16 sps:$4 sm:$0xff]  }
 0x20d   :  { %4802 = vmatprep.subr.bf16.mxu0 %v6504_v16  ;;  %v461_v16 = vld [vmem:[#allocation3 + $0xa78] sm:$0xff] }
 0x20e   :  { %3112 = vmatpush1.bf16.msra.mxu1 %v5894_v23  ;;  %v5975_v23 = vcombine.high %v457_v15, %v461_v16  ;;  %v5974_v26 = vcombine.low %v457_v15, %v461_v16  ;;  %v6588_v15 = vld [vmem:[#allocation7 + $0x404] ss:$16 sps:$4 sm:$0xff]   ;;  %v6550_v16 = vld [vmem:[#allocation7 + $0x8] ss:$16 sps:$4 sm:$0xff]  }
 0x20f   :  { %3122 = vmatprep.subr.bf16.mxu1 %v5903_v34  ;;  %v465_v34 = vld [vmem:[#allocation3 + $0xa98] sm:$0xff] }
 0x210   :  { %4803 = vmatpush1.bf16.msra.mxu0 %v6502_v24  ;;  %v6529_v24 = vld [vmem:[#allocation7 + $0x2a0] ss:$16 sps:$4 sm:$0xff]  }
 0x211   :  { %4804 = vmatprep.subr.bf16.mxu0 %v6507_v25  ;;  %3114 = vmatmul.mubr.bf16.vlgmr.msra.gmra.mrb[8].mxu1 %v7302_v22  ;;  %v3204_v22 = vmax.f32 %v7367_v13, 0.0  ;;  %v5934_v13 = vcombine.low %v417_v44, %v421_v45  ;;  %v469_v25 = vld [vmem:[#allocation3 + $0xab8] sm:$0xff] }
 0x212   :  { %3123 = vmatpush1.bf16.msra.mxu1 %v5902_v38  ;;  %3154 = vmatprep.mubr.bf16.mxu1 %v7306_v29  ;;  %v6516_v29 = vld [vmem:[#allocation7 + $0x204] ss:$16 sps:$4 sm:$0xff]   ;;  %v5983_v38 = vcombine.high %v465_v34, %v469_v25  ;;  %v5982_v32 = vcombine.low %v465_v34, %v469_v25  ;;  %v6562_v25 = vld [vmem:[#allocation7 + $0x48] ss:$16 sps:$4 sm:$0xff]  }
 0x213   :  { %3124 = vmatprep.subr.bf16.mxu1 %v5911_v55  ;;  %v7375_v49 = vpack.c.bf16 %v3204_v22, %v3204_v22  ;;  %v473_v55 = vld [vmem:[#allocation3 + $0xad8] sm:$0xff] }
 0x214   :  { %4805 = vmatpush1.bf16.msra.mxu0 %v6505_v28  ;;  %v6532_v28 = vld [vmem:[#allocation7 + $0x2c0] ss:$16 sps:$4 sm:$0xff]   ;;  %v6543_v44 = vld [vmem:[#allocation7 + $0x324] ss:$16 sps:$4 sm:$0xff]  }
 0x215   :  { %4806 = vmatprep.subr.bf16.mxu0 %v6510_v30  ;;  %v477_v30 = vld [vmem:[#allocation3 + $0xaf8] sm:$0xff] }
 0x216   :  { %3125 = vmatpush1.bf16.msra.mxu1 %v5910_v35  ;;  %v5991_v35 = vcombine.high %v473_v55, %v477_v30  ;;  %v5990_v41 = vcombine.low %v473_v55, %v477_v30  ;;  %v493_v22 = vld [vmem:[#allocation3 + $0xb78] sm:$0xff] }
 0x217   :  { %3126 = vmatprep.subr.bf16.mxu1 %v5919_v37  ;;  %v481_v37 = vld [vmem:[#allocation3 + $0xb18] sm:$0xff] }
 0x218   :  { %4807 = vmatpush1.bf16.msra.mxu0 %v6508_v36  ;;  %v6535_v36 = vld [vmem:[#allocation7 + $0x2e0] ss:$16 sps:$4 sm:$0xff]  }
 0x219   :  { %4808 = vmatprep.subr.bf16.mxu0 %v6513_v39  ;;  %v485_v39 = vld [vmem:[#allocation3 + $0xb38] sm:$0xff] }
 0x21a   :  { %3127 = vmatpush1.bf16.msra.mxu1 %v5918_v20  ;;  %v5999_v20 = vcombine.high %v481_v37, %v485_v39  ;;  %v5998_v45 = vcombine.low %v481_v37, %v485_v39 }
 0x21b   :  { %3128 = vmatprep.subr.bf16.mxu1 %v5927_v42  ;;  %v489_v42 = vld [vmem:[#allocation3 + $0xb58] sm:$0xff] }
 0x21c   :  { %4809 = vmatpush1.bf16.msra.mxu0 %v6511_v59  ;;  %v6538_v59 = vld [vmem:[#allocation7 + $0x300] ss:$16 sps:$4 sm:$0xff]   ;;  %v6006_v51 = vcombine.low %v489_v42, %v493_v22 }
 0x21d   :  { %4819 = vmatprep.subr.bf16.mxu0 %v6516_v29  ;;  %v6007_v29 = vcombine.high %v489_v42, %v493_v22  ;;  %v6594_v42 = vld [vmem:[#allocation7 + $0x424] ss:$16 sps:$4 sm:$0xff]   ;;  %v6577_v22 = vld [vmem:[#allocation7 + $0xa8] ss:$16 sps:$4 sm:$0xff]  }
 0x21e   :  { %3129 = vmatpush1.bf16.msra.mxu1 %v5926_v46  ;;  %v6541_v46 = vld [vmem:[#allocation7 + $0x320] ss:$16 sps:$4 sm:$0xff]  }
 0x21f   :  { %4811 = vmatmul.mubr.bf16.vlgmr.msra.gmra.mrb[8].mxu0 %v7375_v49  ;;  %3130 = vmatprep.subr.bf16.mxu1 %v5935_v47  ;;  %v497_v47 = vld [vmem:[#allocation3 + $0xb98] sm:$0xff] }
 0x220   :  { %4820 = vmatpush1.bf16.msra.mxu0 %v6514_v48  ;;  %v501_v48 = vld [vmem:[#allocation3 + $0xbb8] sm:$0xff] }
 0x221   :  { %4821 = vmatprep.subr.bf16.mxu0 %v6519_v53  ;;  %v6015_v53 = vcombine.high %v497_v47, %v501_v48  ;;  %v6014_v61 = vcombine.low %v497_v47, %v501_v48  ;;  %v6598_v47 = vld [vmem:[#allocation7 + $0x440] ss:$16 sps:$4 sm:$0xff]   ;;  %v6585_v48 = vld [vmem:[#allocation7 + $0xec] ss:$16 sps:$4 sm:$0xff]  }
 0x222   :  { %3131 = vmatpush1.bf16.msra.mxu1 %v5934_v13  ;;  %v6544_v13 = vld [vmem:[#allocation7 + $0x340] ss:$16 sps:$4 sm:$0xff]  }
 0x223   :  { %3132 = vmatprep.subr.bf16.mxu1 %v5943_v56  ;;  %v505_v56 = vld [vmem:[#allocation3 + $0xbd8] sm:$0xff] }
 0x224   :  { %4822 = vmatpush1.bf16.msra.mxu0 %v6517_v57  ;;  %v509_v57 = vld [vmem:[#allocation3 + $0xbf8] sm:$0xff] }
 0x225   :  { %4823 = vmatprep.subr.bf16.mxu0 %v6522_v63  ;;  %v6023_v63 = vcombine.high %v505_v56, %v509_v57  ;;  %v6022_v4 = vcombine.low %v505_v56, %v509_v57  ;;  %v6612_v56 = vld [vmem:[#allocation7 + $0x484] ss:$16 sps:$4 sm:$0xff]   ;;  %v6589_v57 = vld [vmem:[#allocation7 + $0x108] ss:$16 sps:$4 sm:$0xff]  }
 0x226   :  { %3133 = vmatpush1.bf16.msra.mxu1 %v5942_v0  ;;  %v6547_v0 = vld [vmem:[#allocation7 + $0x360] ss:$16 sps:$4 sm:$0xff]  }
 0x227   :  { %3134 = vmatprep.subr.bf16.mxu1 %v5951_v1  ;;  %v513_v1 = vld [vmem:[#allocation3 + $0xc18] sm:$0xff] }
 0x228   :  { %4824 = vmatpush1.bf16.msra.mxu0 %v6520_v2  ;;  %v517_v2 = vld [vmem:[#allocation3 + $0xc38] sm:$0xff] }
 0x229   :  { %4825 = vmatprep.subr.bf16.mxu0 %v6525_v5  ;;  %v6031_v5 = vcombine.high %v513_v1, %v517_v2 }
 0x22a   :  { %3135 = vmatpush1.bf16.msra.mxu1 %v5950_v18  ;;  %v6553_v18 = vld [vmem:[#allocation7 + $0x380] ss:$16 sps:$4 sm:$0xff]  }
 0x22b   :  { %3136 = vmatprep.subr.bf16.mxu1 %v5959_v6  ;;  %v6561_v6 = vld [vmem:[#allocation7 + $0x3a4] ss:$16 sps:$4 sm:$0xff]  }
 0x22c   :  { %4826 = vmatpush1.bf16.msra.mxu0 %v6523_v7  ;;  %v6030_v7 = vcombine.low %v513_v1, %v517_v2  ;;  %v6616_v1 = vld [vmem:[#allocation7 + $0x4a0] ss:$16 sps:$4 sm:$0xff]   ;;  %v6603_v2 = vld [vmem:[#allocation7 + $0x14c] ss:$16 sps:$4 sm:$0xff]  }
 0x22d   :  { %4827 = vmatprep.subr.bf16.mxu0 %v6528_v10  ;;  %v6567_v10 = vld [vmem:[#allocation7 + $0x3c4] ss:$16 sps:$4 sm:$0xff]  }
 0x22e   :  { %3137 = vmatpush1.bf16.msra.mxu1 %v5958_v11  ;;  %v6565_v11 = vld [vmem:[#allocation7 + $0x3c0] ss:$16 sps:$4 sm:$0xff]  }
 0x22f   :  { %3138 = vmatprep.subr.bf16.mxu1 %v5967_v12  ;;  %v6573_v12 = vld [vmem:[#allocation7 + $0x3e4] ss:$16 sps:$4 sm:$0xff]  }
 0x230   :  { %4828 = vmatpush1.bf16.msra.mxu0 %v6526_v14  ;;  %v6571_v14 = vld [vmem:[#allocation7 + $0x3e0] ss:$16 sps:$4 sm:$0xff]  }
 0x231   :  { %4829 = vmatprep.subr.bf16.mxu0 %v6531_v19  ;;  %v6558_v19 = vld [vmem:[#allocation7 + $0x2c] ss:$16 sps:$4 sm:$0xff]  }
 0x232   :  { %3139 = vmatpush1.bf16.msra.mxu1 %v5966_v21  ;;  %v6556_v21 = vld [vmem:[#allocation7 + $0x28] ss:$16 sps:$4 sm:$0xff]  }
 0x233   :  { %3140 = vmatprep.subr.bf16.mxu1 %v5975_v23  ;;  %v534_v23 = vsub.s32 3, %v7349_v17 }
 0x234   :  { %4830 = vmatpush1.bf16.msra.mxu0 %v6529_v24  ;;  %v6564_v24 = vld [vmem:[#allocation7 + $0x4c] ss:$16 sps:$4 sm:$0xff]  }
 0x235   :  { %4831 = vmatprep.subr.bf16.mxu0 %v6534_v54  ;;  %v535_v54 = vrot.slane %v7354_v62, %v534_v23 }
 0x236   :  { %3141 = vmatpush1.bf16.msra.mxu1 %v5974_v26  ;;  %v6570_v26 = vld [vmem:[#allocation7 + $0x6c] ss:$16 sps:$4 sm:$0xff]  }
 0x237   :  { %3142 = vmatprep.subr.bf16.mxu1 %v5983_v38 }
 0x238   :  { %4832 = vmatpush1.bf16.msra.mxu0 %v6532_v28 }
 0x239   :  { %4833 = vmatprep.subr.bf16.mxu0 %v6537_v31  ;;  %v6568_v31 = vld [vmem:[#allocation7 + $0x68] ss:$16 sps:$4 sm:$0xff]  }
 0x23a   :  { %3143 = vmatpush1.bf16.msra.mxu1 %v5982_v32 }
 0x23b   :  { %3144 = vmatprep.subr.bf16.mxu1 %v5991_v35 }
 0x23c   :  { %4834 = vmatpush1.bf16.msra.mxu0 %v6535_v36  ;;  %v6576_v36 = vld [vmem:[#allocation7 + $0x8c] ss:$16 sps:$4 sm:$0xff]  }
 0x23d   :  { %4835 = vmatprep.subr.bf16.mxu0 %v6540_v40  ;;  %v6574_v40 = vld [vmem:[#allocation7 + $0x88] ss:$16 sps:$4 sm:$0xff]  }
 0x23e   :  { %3145 = vmatpush1.bf16.msra.mxu1 %v5990_v41  ;;  %v6586_v41 = vld [vmem:[#allocation7 + $0x400] ss:$16 sps:$4 sm:$0xff]  }
 0x23f   :  { %3146 = vmatprep.subr.bf16.mxu1 %v5999_v20 }
 0x240   :  { %4836 = vmatpush1.bf16.msra.mxu0 %v6538_v59  ;;  %v6579_v59 = vld [vmem:[#allocation7 + $0xac] ss:$16 sps:$4 sm:$0xff]  }
 0x241   :  { %4837 = vmatprep.subr.bf16.mxu0 %v6543_v44  ;;  %v6592_v44 = vld [vmem:[#allocation7 + $0x420] ss:$16 sps:$4 sm:$0xff]  }
 0x242   :  { %3147 = vmatpush1.bf16.msra.mxu1 %v5998_v45  ;;  %v6582_v45 = vld [vmem:[#allocation7 + $0xcc] ss:$16 sps:$4 sm:$0xff]  }
 0x243   :  { %3148 = vmatprep.subr.bf16.mxu1 %v6007_v29  ;;  %v6600_v29 = vld [vmem:[#allocation7 + $0x444] ss:$16 sps:$4 sm:$0xff]  }
 0x244   :  { %4838 = vmatpush1.bf16.msra.mxu0 %v6541_v46  ;;  %v6580_v46 = vld [vmem:[#allocation7 + $0xc8] ss:$16 sps:$4 sm:$0xff]  }
 0x245   :  { %4839 = vmatprep.subr.bf16.mxu0 %v6546_v50  ;;  %v6606_v50 = vld [vmem:[#allocation7 + $0x464] ss:$16 sps:$4 sm:$0xff]  }
 0x246   :  { %3149 = vmatpush1.bf16.msra.mxu1 %v6006_v51  ;;  %v6583_v51 = vld [vmem:[#allocation7 + $0xe8] ss:$16 sps:$4 sm:$0xff]  }
 0x247   :  { %3150 = vmatprep.subr.bf16.mxu1 %v6015_v53  ;;  %v6604_v53 = vld [vmem:[#allocation7 + $0x460] ss:$16 sps:$4 sm:$0xff]  }
 0x248   :  { %4840 = vmatpush1.bf16.msra.mxu0 %v6544_v13  ;;  %v6591_v13 = vld [vmem:[#allocation7 + $0x10c] ss:$16 sps:$4 sm:$0xff]  }
 0x249   :  { %4841 = vmatprep.subr.bf16.mxu0 %v6549_v60  ;;  %v6610_v60 = vld [vmem:[#allocation7 + $0x480] ss:$16 sps:$4 sm:$0xff]  }
 0x24a   :  { %3151 = vmatpush1.bf16.msra.mxu1 %v6014_v61  ;;  %v6597_v61 = vld [vmem:[#allocation7 + $0x12c] ss:$16 sps:$4 sm:$0xff]  }
 0x24b   :  { %3152 = vmatprep.subr.bf16.mxu1 %v6023_v63  ;;  %v6618_v63 = vld [vmem:[#allocation7 + $0x4a4] ss:$16 sps:$4 sm:$0xff]  }
 0x24c   :  { %4842 = vmatpush1.bf16.msra.mxu0 %v6547_v0  ;;  %v6595_v0 = vld [vmem:[#allocation7 + $0x128] ss:$16 sps:$4 sm:$0xff]  }
 0x24d   :  { %4843 = vmatprep.subr.bf16.mxu0 %v6555_v3  ;;  %v6624_v3 = vld [vmem:[#allocation7 + $0x4c4] ss:$16 sps:$4 sm:$0xff]  }
 0x24e   :  { %3153 = vmatpush1.bf16.msra.mxu1 %v6022_v4  ;;  %v6601_v4 = vld [vmem:[#allocation7 + $0x148] ss:$16 sps:$4 sm:$0xff]  }
 0x24f   :  { %3163 = vmatprep.subr.bf16.mxu1 %v6031_v5  ;;  %v6622_v5 = vld [vmem:[#allocation7 + $0x4c0] ss:$16 sps:$4 sm:$0xff]  }
 0x250   :  { %4844 = vmatpush1.bf16.msra.mxu0 %v6553_v18  ;;  %v6609_v18 = vld [vmem:[#allocation7 + $0x16c] ss:$16 sps:$4 sm:$0xff]  }
 0x251   :  { %4845 = vmatprep.subr.bf16.mxu0 %v6561_v6  ;;  %3155 = vmatmul.mubr.bf16.vlgmr.msra.gmra.mrb[8].mxu1 %v7314_v33  ;;  %v6949_v33 = vld [vmem:[%s7439_s0 + $0x18] ss:$0 sps:$4 sm:$0xff]   ;;  %v6630_v6 = vld [vmem:[#allocation7 + $0x4e4] ss:$16 sps:$4 sm:$0xff]  }
 0x252   :  { %3164 = vmatpush1.bf16.msra.mxu1 %v6030_v7  ;;  %3195 = vmatprep.mubr.bf16.mxu1 %v7126_v43  ;;  %v530_v43 = vsub.s32 2, %v7349_v17  ;;  %v6607_v7 = vld [vmem:[#allocation7 + $0x168] ss:$16 sps:$4 sm:$0xff]  }
 0x253   :  { %4942 = vmatprep.subr.bf16.mxu1 %v6552_v8  ;;  %v6628_v8 = vld [vmem:[#allocation7 + $0x4e0] ss:$16 sps:$4 sm:$0xff]  }
 0x254   :  { %4846 = vmatpush1.bf16.msra.mxu0 %v6559_v9  ;;  %v531_v34 = vrot.slane %v7354_v62, %v530_v43  ;;  %v6615_v9 = vld [vmem:[#allocation7 + $0x18c] ss:$16 sps:$4 sm:$0xff]  }
 0x255   :  { %4847 = vmatprep.subr.bf16.mxu0 %v6567_v10  ;;  %v6636_v10 = vld [vmem:[#allocation7 + $0x504] ss:$16 sps:$4 sm:$0xff]  }
 0x258   :  { %4848 = vmatpush1.bf16.msra.mxu0 %v6565_v11  ;;  %v6613_v11 = vld [vmem:[#allocation7 + $0x188] ss:$16 sps:$4 sm:$0xff]  }
 0x259   :  { %4849 = vmatprep.subr.bf16.mxu0 %v6573_v12  ;;  %v6634_v12 = vld [vmem:[#allocation7 + $0x500] ss:$16 sps:$4 sm:$0xff]  }
 0x25c   :  { %4850 = vmatpush1.bf16.msra.mxu0 %v6571_v14  ;;  %v6621_v14 = vld [vmem:[#allocation7 + $0x1ac] ss:$16 sps:$4 sm:$0xff]  }
 0x25d   :  { %4860 = vmatprep.subr.bf16.mxu0 %v6588_v15  ;;  %6035 = vmatmul.mubr.msk.bf16.vlgmr.msra.gmra.mrb[8].mxu1 %vm2544_vm0, %v6949_v33  ;;  %v6642_v15 = vld [vmem:[#allocation7 + $0x524] ss:$16 sps:$4 sm:$0xff]   ;;  %v6627_v33 = vld [vmem:[#allocation7 + $0x1cc] ss:$16 sps:$4 sm:$0xff]  }
 0x25e   :  { %4943 = vmatpush1.bf16.msra.mxu1 %v6550_v16  ;;  %4974 = vmatprep.mubr.bf16.mxu1 %v7369_v27  ;;  %v6619_v16 = vld [vmem:[#allocation7 + $0x1a8] ss:$16 sps:$4 sm:$0xff]  }
 0x25f   :  { %4944 = vmatprep.subr.bf16.mxu1 %v6558_v19  ;;  %v6640_v19 = vld [vmem:[#allocation7 + $0x520] ss:$16 sps:$4 sm:$0xff]  }
 0x262   :  { %4945 = vmatpush1.bf16.msra.mxu1 %v6556_v21  ;;  %v6648_v21 = vld [vmem:[#allocation7 + $0x544] ss:$16 sps:$4 sm:$0xff]  }
 0x263   :  { %4946 = vmatprep.subr.bf16.mxu1 %v6564_v24  ;;  %v6625_v24 = vld [vmem:[#allocation7 + $0x1c8] ss:$16 sps:$4 sm:$0xff]  }
 0x264   :  { %v2869_v38 = vpop.f32.mrb[4].mxu1 }
 0x265   :  { %v6361_v28 = vadd.f32 %v2869_v38, %v531_v34  ;;  %v2871_v27 = vpop.f32.mrb[5].mxu1  ;;  %v6646_v34 = vld [vmem:[#allocation7 + $0x540] ss:$16 sps:$4 sm:$0xff]  }
 0x266   :  { %4947 = vmatpush1.bf16.msra.mxu1 %v6562_v25  ;;  %v6362_v55 = vadd.f32 %v2871_v27, %v535_v54  ;;  %v2873_v30 = vpop.f32.mrb[6].mxu1  ;;  %v6633_v25 = vld [vmem:[#allocation7 + $0x1ec] ss:$16 sps:$4 sm:$0xff]   ;;  %v6654_v54 = vld [vmem:[#allocation7 + $0x564] ss:$16 sps:$4 sm:$0xff]  }
 0x267   :  { %v3206_v32 = vmax.f32 %v6361_v28, 0.0  ;;  %v2874_v35 = vpop.f32.mrb[7].mxu1  ;;  %4948 = vmatprep.subr.bf16.mxu1 %v6570_v26  ;;  %v6631_v26 = vld [vmem:[#allocation7 + $0x1e8] ss:$16 sps:$4 sm:$0xff]   ;;  %v6652_v38 = vld [vmem:[#allocation7 + $0x560] ss:$16 sps:$4 sm:$0xff]  }
 0x268   :  { %v3207_v37 = vmax.f32 %v6362_v55, 0.0  ;;  %v6639_v28 = vld [vmem:[#allocation7 + $0x20c] ss:$16 sps:$4 sm:$0xff]   ;;  %v6660_v27 = vld [vmem:[#allocation7 + $0x584] ss:$16 sps:$4 sm:$0xff]  }
 0x269   :  { %v7395_v20 = vpack.c.bf16 %v3206_v32, %v3206_v32  ;;  %v6637_v55 = vld [vmem:[#allocation7 + $0x208] ss:$16 sps:$4 sm:$0xff]   ;;  %v6645_v30 = vld [vmem:[#allocation7 + $0x22c] ss:$16 sps:$4 sm:$0xff]   ;;  %v6666_v32 = vld [vmem:[#allocation7 + $0x5a4] ss:$16 sps:$4 sm:$0xff]  }
 0x26a   :  { %v7393_v39 = vpack.c.bf16 %v3207_v37, %v3207_v37  ;;  %4949 = vmatpush1.bf16.msra.mxu1 %v6568_v31  ;;  %v6658_v31 = vld [vmem:[#allocation7 + $0x580] ss:$16 sps:$4 sm:$0xff]   ;;  %v6643_v35 = vld [vmem:[#allocation7 + $0x228] ss:$16 sps:$4 sm:$0xff]  }
 0x26b   :  { %4950 = vmatprep.subr.bf16.mxu1 %v6576_v36  ;;  %v6651_v36 = vld [vmem:[#allocation7 + $0x24c] ss:$16 sps:$4 sm:$0xff]   ;;  %v6664_v37 = vld [vmem:[#allocation7 + $0x5a0] ss:$16 sps:$4 sm:$0xff]  }
 0x26c   :  { %4851 = vmatprep.mubr.bf16.mxu0 %v7393_v39 }
 0x26d   :  { %4852 = vmatmul.mubr.bf16.vlgmr.msra.gmra.mrb[8].mxu0 %v7395_v20 }
 0x26e   :  { %4951 = vmatpush1.bf16.msra.mxu1 %v6574_v40  ;;  %4861 = vmatpush1.bf16.msra.mxu0 %v6586_v41  ;;  %v6672_v40 = vld [vmem:[#allocation7 + $0x5c4] ss:$16 sps:$4 sm:$0xff]   ;;  %v6649_v41 = vld [vmem:[#allocation7 + $0x248] ss:$16 sps:$4 sm:$0xff]  }
 0x26f   :  { %4952 = vmatprep.subr.bf16.mxu1 %v6579_v59  ;;  %4862 = vmatprep.subr.bf16.mxu0 %v6594_v42  ;;  %v6657_v59 = vld [vmem:[#allocation7 + $0x26c] ss:$16 sps:$4 sm:$0xff]   ;;  %v6670_v42 = vld [vmem:[#allocation7 + $0x5c0] ss:$16 sps:$4 sm:$0xff]  }
 0x272   :  { %4953 = vmatpush1.bf16.msra.mxu1 %v6577_v22  ;;  %4863 = vmatpush1.bf16.msra.mxu0 %v6592_v44  ;;  %v6678_v22 = vld [vmem:[#allocation7 + $0x5e4] ss:$16 sps:$4 sm:$0xff]   ;;  %v6663_v44 = vld [vmem:[#allocation7 + $0x28c] ss:$16 sps:$4 sm:$0xff]  }
 0x273   :  { %4954 = vmatprep.subr.bf16.mxu1 %v6582_v45  ;;  %4864 = vmatprep.subr.bf16.mxu0 %v6600_v29  ;;  %v6732_v45 = vld [vmem:[#allocation7 + $0x604] ss:$16 sps:$4 sm:$0xff]   ;;  %v6661_v29 = vld [vmem:[#allocation7 + $0x288] ss:$16 sps:$4 sm:$0xff]  }
 0x276   :  { %4955 = vmatpush1.bf16.msra.mxu1 %v6580_v46  ;;  %4865 = vmatpush1.bf16.msra.mxu0 %v6598_v47  ;;  %v538_v46 = vsub.s32 4, %v7349_v17  ;;  %v6669_v47 = vld [vmem:[#allocation7 + $0x2ac] ss:$16 sps:$4 sm:$0xff]  }
 0x277   :  { %4956 = vmatprep.subr.bf16.mxu1 %v6585_v48  ;;  %4866 = vmatprep.subr.bf16.mxu0 %v6606_v50  ;;  %v542_v48 = vsub.s32 5, %v7349_v17 }
 0x278   :  { %v539_v50 = vrot.slane %v7354_v62, %v538_v46  ;;  %v6792_v46 = vld [vmem:[#allocation7 + $0x744] ss:$16 sps:$4 sm:$0xff]  }
 0x27a   :  { %4957 = vmatpush1.bf16.msra.mxu1 %v6583_v51  ;;  %4867 = vmatpush1.bf16.msra.mxu0 %v6604_v53  ;;  %v6667_v51 = vld [vmem:[#allocation7 + $0x2a8] ss:$16 sps:$4 sm:$0xff]   ;;  %v543_v53 = vrot.slane %v7354_v62, %v542_v48  ;;  %v6730_v62 = vld [vmem:[#allocation7 + $0x600] ss:$16 sps:$4 sm:$0xff]   ;;  %v6714_v48 = vld [vmem:[#allocation7 + $0x44c] ss:$16 sps:$4 sm:$0xff]  }
 0x27b   :  { %4958 = vmatprep.subr.bf16.mxu1 %v6591_v13  ;;  %4868 = vmatprep.subr.bf16.mxu0 %v6612_v56  ;;  %v6675_v13 = vld [vmem:[#allocation7 + $0x2cc] ss:$16 sps:$4 sm:$0xff]  }
 0x27e   :  { %4959 = vmatpush1.bf16.msra.mxu1 %v6589_v57  ;;  %4869 = vmatpush1.bf16.msra.mxu0 %v6610_v60 }
 0x27f   :  { %4960 = vmatprep.subr.bf16.mxu1 %v6597_v61  ;;  %4870 = vmatprep.subr.bf16.mxu0 %v6618_v63  ;;  %v6673_v61 = vld [vmem:[#allocation7 + $0x2c8] ss:$16 sps:$4 sm:$0xff]  }
 0x282   :  { %4961 = vmatpush1.bf16.msra.mxu1 %v6595_v0  ;;  %4871 = vmatpush1.bf16.msra.mxu0 %v6616_v1  ;;  %v6681_v1 = vld [vmem:[#allocation7 + $0x2ec] ss:$16 sps:$4 sm:$0xff]  }
 0x283   :  { %4962 = vmatprep.subr.bf16.mxu1 %v6603_v2  ;;  %4872 = vmatprep.subr.bf16.mxu0 %v6624_v3 }
 0x286   :  { %4963 = vmatpush1.bf16.msra.mxu1 %v6601_v4  ;;  %4873 = vmatpush1.bf16.msra.mxu0 %v6622_v5  ;;  %v6679_v5 = vld [vmem:[#allocation7 + $0x2e8] ss:$16 sps:$4 sm:$0xff]  }
 0x287   :  { %4964 = vmatprep.subr.bf16.mxu1 %v6609_v18  ;;  %4874 = vmatprep.subr.bf16.mxu0 %v6630_v6  ;;  %v6684_v6 = vld [vmem:[#allocation7 + $0x30c] ss:$16 sps:$4 sm:$0xff]  }
 0x28a   :  { %4965 = vmatpush1.bf16.msra.mxu1 %v6607_v7  ;;  %4875 = vmatpush1.bf16.msra.mxu0 %v6628_v8  ;;  %v6738_v8 = vld [vmem:[#allocation7 + $0x624] ss:$16 sps:$4 sm:$0xff]  }
 0x28b   :  { %4966 = vmatprep.subr.bf16.mxu1 %v6615_v9  ;;  %4876 = vmatprep.subr.bf16.mxu0 %v6636_v10  ;;  %v6682_v9 = vld [vmem:[#allocation7 + $0x308] ss:$16 sps:$4 sm:$0xff]   ;;  %v6687_v10 = vld [vmem:[#allocation7 + $0x32c] ss:$16 sps:$4 sm:$0xff]  }
 0x28e   :  { %4967 = vmatpush1.bf16.msra.mxu1 %v6613_v11  ;;  %4877 = vmatpush1.bf16.msra.mxu0 %v6634_v12  ;;  %v6736_v11 = vld [vmem:[#allocation7 + $0x620] ss:$16 sps:$4 sm:$0xff]   ;;  %v6744_v12 = vld [vmem:[#allocation7 + $0x644] ss:$16 sps:$4 sm:$0xff]  }
 0x28f   :  { %4968 = vmatprep.subr.bf16.mxu1 %v6621_v14  ;;  %4878 = vmatprep.subr.bf16.mxu0 %v6642_v15  ;;  %v6685_v14 = vld [vmem:[#allocation7 + $0x328] ss:$16 sps:$4 sm:$0xff]   ;;  %v6690_v15 = vld [vmem:[#allocation7 + $0x34c] ss:$16 sps:$4 sm:$0xff]  }
 0x292   :  { %4969 = vmatpush1.bf16.msra.mxu1 %v6619_v16  ;;  %4879 = vmatpush1.bf16.msra.mxu0 %v6640_v19  ;;  %v6742_v16 = vld [vmem:[#allocation7 + $0x640] ss:$16 sps:$4 sm:$0xff]   ;;  %v6750_v19 = vld [vmem:[#allocation7 + $0x664] ss:$16 sps:$4 sm:$0xff]  }
 0x293   :  { %4970 = vmatprep.subr.bf16.mxu1 %v6627_v33  ;;  %4880 = vmatprep.subr.bf16.mxu0 %v6648_v21  ;;  %v6688_v33 = vld [vmem:[#allocation7 + $0x348] ss:$16 sps:$4 sm:$0xff]   ;;  %v6693_v21 = vld [vmem:[#allocation7 + $0x36c] ss:$16 sps:$4 sm:$0xff]  }
 0x296   :  { %4971 = vmatpush1.bf16.msra.mxu1 %v6625_v24  ;;  %4881 = vmatpush1.bf16.msra.mxu0 %v6646_v34  ;;  %v6748_v24 = vld [vmem:[#allocation7 + $0x660] ss:$16 sps:$4 sm:$0xff]   ;;  %v6756_v34 = vld [vmem:[#allocation7 + $0x684] ss:$16 sps:$4 sm:$0xff]  }
 0x297   :  { %4972 = vmatprep.subr.bf16.mxu1 %v6633_v25  ;;  %4882 = vmatprep.subr.bf16.mxu0 %v6654_v54  ;;  %v6691_v25 = vld [vmem:[#allocation7 + $0x368] ss:$16 sps:$4 sm:$0xff]   ;;  %v6696_v54 = vld [vmem:[#allocation7 + $0x38c] ss:$16 sps:$4 sm:$0xff]  }
 0x29a   :  { %4973 = vmatpush1.bf16.msra.mxu1 %v6631_v26  ;;  %4883 = vmatpush1.bf16.msra.mxu0 %v6652_v38  ;;  %v6754_v26 = vld [vmem:[#allocation7 + $0x680] ss:$16 sps:$4 sm:$0xff]   ;;  %v6762_v38 = vld [vmem:[#allocation7 + $0x6a4] ss:$16 sps:$4 sm:$0xff]  }
 0x29b   :  { %4983 = vmatprep.subr.bf16.mxu1 %v6639_v28  ;;  %4884 = vmatprep.subr.bf16.mxu0 %v6660_v27  ;;  %v6694_v28 = vld [vmem:[#allocation7 + $0x388] ss:$16 sps:$4 sm:$0xff]   ;;  %v6699_v27 = vld [vmem:[#allocation7 + $0x3ac] ss:$16 sps:$4 sm:$0xff]  }
 0x29d   :  { %4975 = vmatmul.mubr.bf16.vlgmr.msra.gmra.mrb[12].mxu1 %v7375_v49  ;;  %v6655_v49 = vld [vmem:[#allocation7 + $0x268] ss:$16 sps:$4 sm:$0xff]  }
 0x29e   :  { %4984 = vmatpush1.bf16.msra.mxu1 %v6637_v55  ;;  %5015 = vmatprep.mubr.bf16.mxu1 %v7393_v39  ;;  %v6676_v39 = vld [vmem:[#allocation7 + $0x5e0] ss:$16 sps:$4 sm:$0xff]  }
 0x29f   :  { %4985 = vmatprep.subr.bf16.mxu1 %v6645_v30  ;;  %4885 = vmatpush1.bf16.msra.mxu0 %v6658_v31  ;;  %v6760_v55 = vld [vmem:[#allocation7 + $0x6a0] ss:$16 sps:$4 sm:$0xff]   ;;  %v6768_v30 = vld [vmem:[#allocation7 + $0x6c4] ss:$16 sps:$4 sm:$0xff]   ;;  %v6697_v31 = vld [vmem:[#allocation7 + $0x3a8] ss:$16 sps:$4 sm:$0xff]  }
 0x2a0   :  { %4886 = vmatprep.subr.bf16.mxu0 %v6666_v32  ;;  %v6702_v32 = vld [vmem:[#allocation7 + $0x3cc] ss:$16 sps:$4 sm:$0xff]  }
 0x2a2   :  { %4986 = vmatpush1.bf16.msra.mxu1 %v6643_v35  ;;  %v6766_v35 = vld [vmem:[#allocation7 + $0x6c0] ss:$16 sps:$4 sm:$0xff]  }
 0x2a3   :  { %4987 = vmatprep.subr.bf16.mxu1 %v6651_v36  ;;  %4887 = vmatpush1.bf16.msra.mxu0 %v6664_v37  ;;  %v6774_v36 = vld [vmem:[#allocation7 + $0x6e4] ss:$16 sps:$4 sm:$0xff]   ;;  %v6700_v37 = vld [vmem:[#allocation7 + $0x3c8] ss:$16 sps:$4 sm:$0xff]  }
 0x2a4   :  { %4888 = vmatprep.subr.bf16.mxu0 %v6672_v40  ;;  %v6705_v40 = vld [vmem:[#allocation7 + $0x3ec] ss:$16 sps:$4 sm:$0xff]  }
 0x2a6   :  { %4988 = vmatpush1.bf16.msra.mxu1 %v6649_v41  ;;  %v6772_v41 = vld [vmem:[#allocation7 + $0x6e0] ss:$16 sps:$4 sm:$0xff]  }
 0x2a7   :  { %4989 = vmatprep.subr.bf16.mxu1 %v6657_v59  ;;  %4889 = vmatpush1.bf16.msra.mxu0 %v6670_v42  ;;  %v6780_v59 = vld [vmem:[#allocation7 + $0x704] ss:$16 sps:$4 sm:$0xff]   ;;  %v6703_v42 = vld [vmem:[#allocation7 + $0x3e8] ss:$16 sps:$4 sm:$0xff]  }
 0x2a8   :  { %4890 = vmatprep.subr.bf16.mxu0 %v6678_v22  ;;  %v6708_v22 = vld [vmem:[#allocation7 + $0x40c] ss:$16 sps:$4 sm:$0xff]  }
 0x2aa   :  { %4990 = vmatpush1.bf16.msra.mxu1 %v6655_v49  ;;  %v6778_v49 = vld [vmem:[#allocation7 + $0x700] ss:$16 sps:$4 sm:$0xff]  }
 0x2ab   :  { %4991 = vmatprep.subr.bf16.mxu1 %v6663_v44  ;;  %4891 = vmatpush1.bf16.msra.mxu0 %v6676_v39  ;;  %v6786_v44 = vld [vmem:[#allocation7 + $0x724] ss:$16 sps:$4 sm:$0xff]   ;;  %v6706_v39 = vld [vmem:[#allocation7 + $0x408] ss:$16 sps:$4 sm:$0xff]  }
 0x2ac   :  { %4901 = vmatprep.subr.bf16.mxu0 %v6732_v45  ;;  %v6711_v45 = vld [vmem:[#allocation7 + $0x42c] ss:$16 sps:$4 sm:$0xff]  }
 0x2ae   :  { %4992 = vmatpush1.bf16.msra.mxu1 %v6661_v29  ;;  %v6784_v29 = vld [vmem:[#allocation7 + $0x720] ss:$16 sps:$4 sm:$0xff]  }
 0x2af   :  { %4993 = vmatprep.subr.bf16.mxu1 %v6669_v47  ;;  %v6709_v47 = vld [vmem:[#allocation7 + $0x428] ss:$16 sps:$4 sm:$0xff]  }
 0x2b2   :  { %v3033_v56 = vpop.f32.mrb[4].mxu0  ;;  %4994 = vmatpush1.bf16.msra.mxu1 %v6667_v51  ;;  %v6798_v51 = vld [vmem:[#allocation7 + $0x764] ss:$16 sps:$4 sm:$0xff]  }
 0x2b3   :  { %v6363_v57 = vadd.f32 %v3033_v56, %v539_v50  ;;  %v3035_v60 = vpop.f32.mrb[5].mxu0  ;;  %4995 = vmatprep.subr.bf16.mxu1 %v6675_v13  ;;  %v6790_v50 = vld [vmem:[#allocation7 + $0x740] ss:$16 sps:$4 sm:$0xff]   ;;  %v6717_v13 = vld [vmem:[#allocation7 + $0x46c] ss:$16 sps:$4 sm:$0xff]  }
 0x2b4   :  { %v6364_v63 = vadd.f32 %v3035_v60, %v543_v53  ;;  %v3037_v0 = vpop.f32.mrb[6].mxu0  ;;  %v6712_v53 = vld [vmem:[#allocation7 + $0x448] ss:$16 sps:$4 sm:$0xff]   ;;  %v6796_v56 = vld [vmem:[#allocation7 + $0x760] ss:$16 sps:$4 sm:$0xff]  }
 0x2b5   :  { %v3208_v2 = vmax.f32 %v6363_v57, 0.0  ;;  %v3038_v3 = vpop.f32.mrb[7].mxu0  ;;  %v6804_v57 = vld [vmem:[#allocation7 + $0x784] ss:$16 sps:$4 sm:$0xff]   ;;  %v6720_v60 = vld [vmem:[#allocation7 + $0x48c] ss:$16 sps:$4 sm:$0xff]  }
 0x2b6   :  { %v3209_v4 = vmax.f32 %v6364_v63, 0.0  ;;  %4996 = vmatpush1.bf16.msra.mxu1 %v6673_v61  ;;  %v6802_v61 = vld [vmem:[#allocation7 + $0x780] ss:$16 sps:$4 sm:$0xff]   ;;  %v6810_v63 = vld [vmem:[#allocation7 + $0x7a4] ss:$16 sps:$4 sm:$0xff]  }
 0x2b7   :  { %4997 = vmatprep.subr.bf16.mxu1 %v6681_v1  ;;  %v7407_v7 = vpack.c.bf16 %v3208_v2, %v3208_v2  ;;  %v6718_v0 = vld [vmem:[#allocation7 + $0x488] ss:$16 sps:$4 sm:$0xff]   ;;  %v6723_v1 = vld [vmem:[#allocation7 + $0x4ac] ss:$16 sps:$4 sm:$0xff]   ;;  %v6808_v2 = vld [vmem:[#allocation7 + $0x7a0] ss:$16 sps:$4 sm:$0xff]  }
 0x2b8   :  { %v7405_v18 = vpack.c.bf16 %v3209_v4, %v3209_v4  ;;  %v6816_v3 = vld [vmem:[#allocation7 + $0x7c4] ss:$16 sps:$4 sm:$0xff]   ;;  %v6721_v4 = vld [vmem:[#allocation7 + $0x4a8] ss:$16 sps:$4 sm:$0xff]  }
 0x2ba   :  { %4892 = vmatprep.mubr.bf16.mxu0 %v7405_v18  ;;  %4998 = vmatpush1.bf16.msra.mxu1 %v6679_v5  ;;  %v6726_v5 = vld [vmem:[#allocation7 + $0x4cc] ss:$16 sps:$4 sm:$0xff]  }
 0x2bb   :  { %4893 = vmatmul.mubr.bf16.vlgmr.msra.gmra.mrb[8].mxu0 %v7407_v7  ;;  %4999 = vmatprep.subr.bf16.mxu1 %v6684_v6  ;;  %v6822_v6 = vld [vmem:[#allocation7 + $0x7e4] ss:$16 sps:$4 sm:$0xff]  }
 0x2bc   :  { %4902 = vmatpush1.bf16.msra.mxu0 %v6730_v62  ;;  %v6724_v62 = vld [vmem:[#allocation7 + $0x4c8] ss:$16 sps:$4 sm:$0xff]  }
 0x2bd   :  { %4903 = vmatprep.subr.bf16.mxu0 %v6738_v8  ;;  %v6729_v8 = vld [vmem:[#allocation7 + $0x4ec] ss:$16 sps:$4 sm:$0xff]  }
 0x2be   :  { %5000 = vmatpush1.bf16.msra.mxu1 %v6682_v9  ;;  %v6820_v9 = vld [vmem:[#allocation7 + $0x7e0] ss:$16 sps:$4 sm:$0xff]  }
 0x2bf   :  { %5001 = vmatprep.subr.bf16.mxu1 %v6687_v10  ;;  %v6852_v10 = vld [vmem:[#allocation10 + $0x4] ss:$8 sps:$4 sm:$0xff]  }
 0x2c0   :  { %4904 = vmatpush1.bf16.msra.mxu0 %v6736_v11  ;;  %v6727_v11 = vld [vmem:[#allocation7 + $0x4e8] ss:$16 sps:$4 sm:$0xff]  }
 0x2c1   :  { %4905 = vmatprep.subr.bf16.mxu0 %v6744_v12  ;;  %v6735_v12 = vld [vmem:[#allocation7 + $0x50c] ss:$16 sps:$4 sm:$0xff]  }
 0x2c2   :  { %5002 = vmatpush1.bf16.msra.mxu1 %v6685_v14  ;;  %v6733_v14 = vld [vmem:[#allocation7 + $0x508] ss:$16 sps:$4 sm:$0xff]  }
 0x2c3   :  { %5003 = vmatprep.subr.bf16.mxu1 %v6690_v15  ;;  %v6741_v15 = vld [vmem:[#allocation7 + $0x52c] ss:$16 sps:$4 sm:$0xff]  }
 0x2c4   :  { %4906 = vmatpush1.bf16.msra.mxu0 %v6742_v16  ;;  %v6739_v16 = vld [vmem:[#allocation7 + $0x528] ss:$16 sps:$4 sm:$0xff]  }
 0x2c5   :  { %4907 = vmatprep.subr.bf16.mxu0 %v6750_v19  ;;  %v6747_v19 = vld [vmem:[#allocation7 + $0x54c] ss:$16 sps:$4 sm:$0xff]  }
 0x2c6   :  { %5004 = vmatpush1.bf16.msra.mxu1 %v6688_v33  ;;  %v6745_v33 = vld [vmem:[#allocation7 + $0x548] ss:$16 sps:$4 sm:$0xff]  }
 0x2c7   :  { %5005 = vmatprep.subr.bf16.mxu1 %v6693_v21  ;;  %v6753_v21 = vld [vmem:[#allocation7 + $0x56c] ss:$16 sps:$4 sm:$0xff]  }
 0x2c8   :  { %4908 = vmatpush1.bf16.msra.mxu0 %v6748_v24  ;;  %v6751_v24 = vld [vmem:[#allocation7 + $0x568] ss:$16 sps:$4 sm:$0xff]  }
 0x2c9   :  { %4909 = vmatprep.subr.bf16.mxu0 %v6756_v34  ;;  %v6759_v34 = vld [vmem:[#allocation7 + $0x58c] ss:$16 sps:$4 sm:$0xff]  }
 0x2ca   :  { %5006 = vmatpush1.bf16.msra.mxu1 %v6691_v25  ;;  %v6757_v25 = vld [vmem:[#allocation7 + $0x588] ss:$16 sps:$4 sm:$0xff]  }
 0x2cb   :  { %5007 = vmatprep.subr.bf16.mxu1 %v6696_v54  ;;  %v6765_v54 = vld [vmem:[#allocation7 + $0x5ac] ss:$16 sps:$4 sm:$0xff]  }
 0x2cc   :  { %4910 = vmatpush1.bf16.msra.mxu0 %v6754_v26  ;;  %v6763_v26 = vld [vmem:[#allocation7 + $0x5a8] ss:$16 sps:$4 sm:$0xff]  }
 0x2cd   :  { %4911 = vmatprep.subr.bf16.mxu0 %v6762_v38  ;;  %v6771_v38 = vld [vmem:[#allocation7 + $0x5cc] ss:$16 sps:$4 sm:$0xff]  }
 0x2ce   :  { %5008 = vmatpush1.bf16.msra.mxu1 %v6694_v28  ;;  %v6769_v28 = vld [vmem:[#allocation7 + $0x5c8] ss:$16 sps:$4 sm:$0xff]  }
 0x2cf   :  { %5009 = vmatprep.subr.bf16.mxu1 %v6699_v27  ;;  %v6777_v27 = vld [vmem:[#allocation7 + $0x5ec] ss:$16 sps:$4 sm:$0xff]  }
 0x2d0   :  { %4912 = vmatpush1.bf16.msra.mxu0 %v6760_v55  ;;  %v6775_v55 = vld [vmem:[#allocation7 + $0x5e8] ss:$16 sps:$4 sm:$0xff]  }
 0x2d1   :  { %4913 = vmatprep.subr.bf16.mxu0 %v6768_v30  ;;  %v6783_v30 = vld [vmem:[#allocation7 + $0x60c] ss:$16 sps:$4 sm:$0xff]  }
 0x2d2   :  { %5010 = vmatpush1.bf16.msra.mxu1 %v6697_v31  ;;  %v6781_v31 = vld [vmem:[#allocation7 + $0x608] ss:$16 sps:$4 sm:$0xff]  }
 0x2d3   :  { %5011 = vmatprep.subr.bf16.mxu1 %v6702_v32  ;;  %v6789_v32 = vld [vmem:[#allocation7 + $0x62c] ss:$16 sps:$4 sm:$0xff]  }
 0x2d4   :  { %4914 = vmatpush1.bf16.msra.mxu0 %v6766_v35  ;;  %v6787_v35 = vld [vmem:[#allocation7 + $0x628] ss:$16 sps:$4 sm:$0xff]  }
 0x2d5   :  { %4915 = vmatprep.subr.bf16.mxu0 %v6774_v36  ;;  %v6795_v36 = vld [vmem:[#allocation7 + $0x64c] ss:$16 sps:$4 sm:$0xff]  }
 0x2d6   :  { %5012 = vmatpush1.bf16.msra.mxu1 %v6700_v37  ;;  %v6793_v37 = vld [vmem:[#allocation7 + $0x648] ss:$16 sps:$4 sm:$0xff]  }
 0x2d7   :  { %5013 = vmatprep.subr.bf16.mxu1 %v6705_v40  ;;  %v6801_v40 = vld [vmem:[#allocation7 + $0x66c] ss:$16 sps:$4 sm:$0xff]  }
 0x2d8   :  { %4916 = vmatpush1.bf16.msra.mxu0 %v6772_v41  ;;  %v6799_v41 = vld [vmem:[#allocation7 + $0x668] ss:$16 sps:$4 sm:$0xff]  }
 0x2d9   :  { %4917 = vmatprep.subr.bf16.mxu0 %v6780_v59  ;;  %v6807_v59 = vld [vmem:[#allocation7 + $0x68c] ss:$16 sps:$4 sm:$0xff]  }
 0x2da   :  { %5014 = vmatpush1.bf16.msra.mxu1 %v6703_v42  ;;  %v546_v42 = vsub.s32 6, %v7349_v17 }
 0x2db   :  { %5024 = vmatprep.subr.bf16.mxu1 %v6708_v22  ;;  %v6805_v22 = vld [vmem:[#allocation7 + $0x688] ss:$16 sps:$4 sm:$0xff]  }
 0x2dc   :  { %4918 = vmatpush1.bf16.msra.mxu0 %v6778_v49  ;;  %v550_v49 = vsub.s32 7, %v7349_v17 }
 0x2dd   :  { %4919 = vmatprep.subr.bf16.mxu0 %v6786_v44  ;;  %5016 = vmatmul.mubr.bf16.vlgmr.msra.gmra.mrb[12].mxu1 %v7395_v20  ;;  %v6715_v20 = vld [vmem:[#allocation7 + $0x468] ss:$16 sps:$4 sm:$0xff]  }
 0x2de   :  { %5025 = vmatpush1.bf16.msra.mxu1 %v6706_v39  ;;  %5056 = vmatprep.mubr.bf16.mxu1 %v7405_v18  ;;  %v6814_v18 = vld [vmem:[#allocation7 + $0x7c0] ss:$16 sps:$4 sm:$0xff]   ;;  %v6950_v44 = vld [vmem:[#allocation5] sm:$0xff] }
 0x2df   :  { %5026 = vmatprep.subr.bf16.mxu1 %v6711_v45  ;;  %v547_v39 = vrot.slane %v6950_v44, %v546_v42  ;;  %v6811_v45 = vld [vmem:[#allocation7 + $0x6a8] ss:$16 sps:$4 sm:$0xff]  }
 0x2e0   :  { %4920 = vmatpush1.bf16.msra.mxu0 %v6784_v29  ;;  %v551_v29 = vrot.slane %v6950_v44, %v550_v49  ;;  %v6885_v42 = vld [vmem:[#allocation10 + $0xb4] ss:$8 sps:$4 sm:$0xff]   ;;  %v6888_v49 = vld [vmem:[#allocation10 + $0xc4] ss:$8 sps:$4 sm:$0xff]  }
 0x2e1   :  { %4921 = vmatprep.subr.bf16.mxu0 %v6792_v46  ;;  %v6819_v46 = vld [vmem:[#allocation7 + $0x6cc] ss:$16 sps:$4 sm:$0xff]   ;;  %v6891_v44 = vld [vmem:[#allocation10 + $0xd4] ss:$8 sps:$4 sm:$0xff]  }
 0x2e2   :  { %5027 = vmatpush1.bf16.msra.mxu1 %v6709_v47 }
 0x2e3   :  { %5028 = vmatprep.subr.bf16.mxu1 %v6714_v48 }
 0x2e4   :  { %4922 = vmatpush1.bf16.msra.mxu0 %v6790_v50 }
 0x2e5   :  { %4923 = vmatprep.subr.bf16.mxu0 %v6798_v51 }
 0x2e6   :  { %5029 = vmatpush1.bf16.msra.mxu1 %v6712_v53 }
 0x2e7   :  { %5030 = vmatprep.subr.bf16.mxu1 %v6717_v13  ;;  %v6817_v13 = vld [vmem:[#allocation7 + $0x6c8] ss:$16 sps:$4 sm:$0xff]  }
 0x2e8   :  { %4924 = vmatpush1.bf16.msra.mxu0 %v6796_v56 }
 0x2e9   :  { %4925 = vmatprep.subr.bf16.mxu0 %v6804_v57 }
 0x2ea   :  { %5031 = vmatpush1.bf16.msra.mxu1 %v6715_v20  ;;  %v6825_v20 = vld [vmem:[#allocation7 + $0x6ec] ss:$16 sps:$4 sm:$0xff]  }
 0x2eb   :  { %5032 = vmatprep.subr.bf16.mxu1 %v6720_v60 }
 0x2ec   :  { %4926 = vmatpush1.bf16.msra.mxu0 %v6802_v61 }
 0x2ed   :  { %4927 = vmatprep.subr.bf16.mxu0 %v6810_v63  ;;  %v6823_v63 = vld [vmem:[#allocation7 + $0x6e8] ss:$16 sps:$4 sm:$0xff]  }
 0x2ee   :  { %5033 = vmatpush1.bf16.msra.mxu1 %v6718_v0  ;;  %v6850_v0 = vld [vmem:[#allocation10] ss:$8 sps:$4 sm:$0xff]  }
 0x2ef   :  { %5034 = vmatprep.subr.bf16.mxu1 %v6723_v1 }
 0x2f0   :  { %4928 = vmatpush1.bf16.msra.mxu0 %v6808_v2  ;;  %v6828_v2 = vld [vmem:[#allocation7 + $0x70c] ss:$16 sps:$4 sm:$0xff]  }
 0x2f1   :  { %4929 = vmatprep.subr.bf16.mxu0 %v6816_v3  ;;  %v6855_v3 = vld [vmem:[#allocation10 + $0x14] ss:$8 sps:$4 sm:$0xff]  }
 0x2f2   :  { %5035 = vmatpush1.bf16.msra.mxu1 %v6721_v4  ;;  %v6826_v4 = vld [vmem:[#allocation7 + $0x708] ss:$16 sps:$4 sm:$0xff]  }
 0x2f3   :  { %5036 = vmatprep.subr.bf16.mxu1 %v6726_v5  ;;  %v6853_v5 = vld [vmem:[#allocation10 + $0x10] ss:$8 sps:$4 sm:$0xff]  }
 0x2f4   :  { %4930 = vmatpush1.bf16.msra.mxu0 %v6814_v18  ;;  %v6831_v18 = vld [vmem:[#allocation7 + $0x72c] ss:$16 sps:$4 sm:$0xff]  }
 0x2f5   :  { %4931 = vmatprep.subr.bf16.mxu0 %v6822_v6  ;;  %v6858_v6 = vld [vmem:[#allocation10 + $0x24] ss:$8 sps:$4 sm:$0xff]  }
 0x2f6   :  { %5037 = vmatpush1.bf16.msra.mxu1 %v6724_v62  ;;  %v6829_v62 = vld [vmem:[#allocation7 + $0x728] ss:$16 sps:$4 sm:$0xff]  }
 0x2f7   :  { %5038 = vmatprep.subr.bf16.mxu1 %v6729_v8  ;;  %v6856_v8 = vld [vmem:[#allocation10 + $0x20] ss:$8 sps:$4 sm:$0xff]  }
 0x2f8   :  { %4932 = vmatpush1.bf16.msra.mxu0 %v6820_v9  ;;  %v6834_v9 = vld [vmem:[#allocation7 + $0x74c] ss:$16 sps:$4 sm:$0xff]  }
 0x2f9   :  { %5510 = vmatprep.subr.bf16.mxu0 %v6852_v10  ;;  %v6861_v10 = vld [vmem:[#allocation10 + $0x34] ss:$8 sps:$4 sm:$0xff]  }
 0x2fa   :  { %5039 = vmatpush1.bf16.msra.mxu1 %v6727_v11  ;;  %v6832_v11 = vld [vmem:[#allocation7 + $0x748] ss:$16 sps:$4 sm:$0xff]  }
 0x2fb   :  { %5040 = vmatprep.subr.bf16.mxu1 %v6735_v12  ;;  %v6859_v12 = vld [vmem:[#allocation10 + $0x30] ss:$8 sps:$4 sm:$0xff]  }
 0x2fe   :  { %5041 = vmatpush1.bf16.msra.mxu1 %v6733_v14  ;;  %v6837_v14 = vld [vmem:[#allocation7 + $0x76c] ss:$16 sps:$4 sm:$0xff]  }
 0x2ff   :  { %5042 = vmatprep.subr.bf16.mxu1 %v6741_v15  ;;  %v6864_v15 = vld [vmem:[#allocation10 + $0x44] ss:$8 sps:$4 sm:$0xff]  }
 0x302   :  { %5043 = vmatpush1.bf16.msra.mxu1 %v6739_v16  ;;  %v6835_v16 = vld [vmem:[#allocation7 + $0x768] ss:$16 sps:$4 sm:$0xff]  }
 0x303   :  { %5044 = vmatprep.subr.bf16.mxu1 %v6747_v19  ;;  %v6862_v19 = vld [vmem:[#allocation10 + $0x40] ss:$8 sps:$4 sm:$0xff]  }
 0x306   :  { %5045 = vmatpush1.bf16.msra.mxu1 %v6745_v33  ;;  %v6840_v33 = vld [vmem:[#allocation7 + $0x78c] ss:$16 sps:$4 sm:$0xff]  }
 0x307   :  { %5046 = vmatprep.subr.bf16.mxu1 %v6753_v21  ;;  %v6867_v21 = vld [vmem:[#allocation10 + $0x54] ss:$8 sps:$4 sm:$0xff]  }
 0x30a   :  { %5047 = vmatpush1.bf16.msra.mxu1 %v6751_v24  ;;  %v6838_v24 = vld [vmem:[#allocation7 + $0x788] ss:$16 sps:$4 sm:$0xff]  }
 0x30b   :  { %5048 = vmatprep.subr.bf16.mxu1 %v6759_v34  ;;  %v6865_v34 = vld [vmem:[#allocation10 + $0x50] ss:$8 sps:$4 sm:$0xff]  }
 0x30e   :  { %5049 = vmatpush1.bf16.msra.mxu1 %v6757_v25  ;;  %v6843_v25 = vld [vmem:[#allocation7 + $0x7ac] ss:$16 sps:$4 sm:$0xff]  }
 0x30f   :  { %5050 = vmatprep.subr.bf16.mxu1 %v6765_v54  ;;  %v6870_v54 = vld [vmem:[#allocation10 + $0x64] ss:$8 sps:$4 sm:$0xff]  }
 0x312   :  { %5051 = vmatpush1.bf16.msra.mxu1 %v6763_v26  ;;  %v6841_v26 = vld [vmem:[#allocation7 + $0x7a8] ss:$16 sps:$4 sm:$0xff]  }
 0x313   :  { %5052 = vmatprep.subr.bf16.mxu1 %v6771_v38  ;;  %v6868_v38 = vld [vmem:[#allocation10 + $0x60] ss:$8 sps:$4 sm:$0xff]  }
 0x316   :  { %5053 = vmatpush1.bf16.msra.mxu1 %v6769_v28  ;;  %v6846_v28 = vld [vmem:[#allocation7 + $0x7cc] ss:$16 sps:$4 sm:$0xff]  }
 0x317   :  { %5054 = vmatprep.subr.bf16.mxu1 %v6777_v27  ;;  %v6873_v27 = vld [vmem:[#allocation10 + $0x74] ss:$8 sps:$4 sm:$0xff]  }
 0x31a   :  { %5055 = vmatpush1.bf16.msra.mxu1 %v6775_v55  ;;  %v6844_v55 = vld [vmem:[#allocation7 + $0x7c8] ss:$16 sps:$4 sm:$0xff]  }
 0x31b   :  { %5065 = vmatprep.subr.bf16.mxu1 %v6783_v30  ;;  %v6871_v30 = vld [vmem:[#allocation10 + $0x70] ss:$8 sps:$4 sm:$0xff]  }
 0x31d   :  { %5057 = vmatmul.mubr.bf16.vlgmr.msra.gmra.mrb[12].mxu1 %v7407_v7  ;;  %v6813_v7 = vld [vmem:[#allocation7 + $0x6ac] ss:$16 sps:$4 sm:$0xff]  }
 0x31e   :  { %5066 = vmatpush1.bf16.msra.mxu1 %v6781_v31  ;;  %v6849_v31 = vld [vmem:[#allocation7 + $0x7ec] ss:$16 sps:$4 sm:$0xff]  }
 0x31f   :  { %5067 = vmatprep.subr.bf16.mxu1 %v6789_v32  ;;  %v6876_v32 = vld [vmem:[#allocation10 + $0x84] ss:$8 sps:$4 sm:$0xff]  }
 0x322   :  { %5068 = vmatpush1.bf16.msra.mxu1 %v6787_v35  ;;  %v6847_v35 = vld [vmem:[#allocation7 + $0x7e8] ss:$16 sps:$4 sm:$0xff]  }
 0x323   :  { %5069 = vmatprep.subr.bf16.mxu1 %v6795_v36  ;;  %v6874_v36 = vld [vmem:[#allocation10 + $0x80] ss:$8 sps:$4 sm:$0xff]  }
 0x326   :  { %5070 = vmatpush1.bf16.msra.mxu1 %v6793_v37  ;;  %v6879_v37 = vld [vmem:[#allocation10 + $0x94] ss:$8 sps:$4 sm:$0xff]  }
 0x327   :  { %5071 = vmatprep.subr.bf16.mxu1 %v6801_v40  ;;  %v6877_v40 = vld [vmem:[#allocation10 + $0x90] ss:$8 sps:$4 sm:$0xff]  }
 0x32a   :  { %5072 = vmatpush1.bf16.msra.mxu1 %v6799_v41  ;;  %v6882_v41 = vld [vmem:[#allocation10 + $0xa4] ss:$8 sps:$4 sm:$0xff]  }
 0x32b   :  { %5073 = vmatprep.subr.bf16.mxu1 %v6807_v59  ;;  %v6880_v59 = vld [vmem:[#allocation10 + $0xa0] ss:$8 sps:$4 sm:$0xff]  }
 0x32e   :  { %5074 = vmatpush1.bf16.msra.mxu1 %v6805_v22  ;;  %v6883_v22 = vld [vmem:[#allocation10 + $0xb0] ss:$8 sps:$4 sm:$0xff]  }
 0x32f   :  { %5075 = vmatprep.subr.bf16.mxu1 %v6813_v7  ;;  %v6886_v7 = vld [vmem:[#allocation10 + $0xc0] ss:$8 sps:$4 sm:$0xff]  }
 0x330   :  { %v3197_v47 = vpop.f32.mrb[8].mxu1 }
 0x331   :  { %v6365_v48 = vadd.f32 %v3197_v47, %v547_v39  ;;  %v3199_v50 = vpop.f32.mrb[9].mxu1  ;;  %v6889_v39 = vld [vmem:[#allocation10 + $0xd0] ss:$8 sps:$4 sm:$0xff]  }
 0x332   :  { %v6366_v51 = vadd.f32 %v3199_v50, %v551_v29  ;;  %5076 = vmatpush1.bf16.msra.mxu1 %v6811_v45  ;;  %v3201_v53 = vpop.f32.mrb[10].mxu1  ;;  %v6894_v45 = vld [vmem:[#allocation10 + $0xe4] ss:$8 sps:$4 sm:$0xff]   ;;  %v6892_v29 = vld [vmem:[#allocation10 + $0xe0] ss:$8 sps:$4 sm:$0xff]  }
 0x333   :  { %v3210_v56 = vmax.f32 %v6365_v48, 0.0  ;;  %v3202_v57 = vpop.f32.mrb[11].mxu1  ;;  %5077 = vmatprep.subr.bf16.mxu1 %v6819_v46  ;;  %v6897_v46 = vld [vmem:[#allocation10 + $0xf4] ss:$8 sps:$4 sm:$0xff]   ;;  %v6895_v47 = vld [vmem:[#allocation10 + $0xf0] ss:$8 sps:$4 sm:$0xff]  }
 0x334   :  { %v3211_v60 = vmax.f32 %v6366_v51, 0.0  ;;  %v6900_v48 = vld [vmem:[#allocation10 + $0x104] ss:$8 sps:$4 sm:$0xff]   ;;  %v7420_v50 = vld [vmem:[#allocation8] sm:$0xf] }
 0x335   :  { %v7416_v1 = vpack.c.bf16 %v3210_v56, %v3210_v56  ;;  %v3481_v51 = vrot.slane %v7420_v50, %v7352_v52  ;;  %v3485_v53 = vrot.slane %v7420_v50, %v7357_v58 }
 0x336   :  { %v3219_v61 = vpack.c.bf16 %v3211_v60, %v3211_v60  ;;  %5078 = vmatpush1.bf16.msra.mxu1 %v6817_v13 }
 0x337   :  { %5079 = vmatprep.subr.bf16.mxu1 %v6825_v20 }
 0x338   :  { %4933 = vmatprep.mubr.bf16.mxu0 %v3219_v61  ;;  %5097 = vmatprep.mubr.bf16.mxu1 %v3219_v61 }
 0x339   :  { %4934 = vmatmul.mubr.bf16.vlgmr.msra.gmra.mrb[8].mxu0 %v7416_v1 }
 0x33a   :  { %5080 = vmatpush1.bf16.msra.mxu1 %v6823_v63  ;;  %5511 = vmatpush1.bf16.msra.mxu0 %v6850_v0 }
 0x33b   :  { %5081 = vmatprep.subr.bf16.mxu1 %v6828_v2  ;;  %5512 = vmatprep.subr.bf16.mxu0 %v6855_v3  ;;  %v6898_v2 = vld [vmem:[#allocation10 + $0x100] ss:$8 sps:$4 sm:$0xff]  }
 0x33e   :  { %5082 = vmatpush1.bf16.msra.mxu1 %v6826_v4  ;;  %5513 = vmatpush1.bf16.msra.mxu0 %v6853_v5  ;;  %v6903_v4 = vld [vmem:[#allocation10 + $0x114] ss:$8 sps:$4 sm:$0xff]   ;;  %v6901_v5 = vld [vmem:[#allocation10 + $0x110] ss:$8 sps:$4 sm:$0xff]  }
 0x33f   :  { %5083 = vmatprep.subr.bf16.mxu1 %v6831_v18  ;;  %5514 = vmatprep.subr.bf16.mxu0 %v6858_v6  ;;  %v6906_v18 = vld [vmem:[#allocation10 + $0x124] ss:$8 sps:$4 sm:$0xff]   ;;  %v6904_v6 = vld [vmem:[#allocation10 + $0x120] ss:$8 sps:$4 sm:$0xff]  }
 0x342   :  { %5084 = vmatpush1.bf16.msra.mxu1 %v6829_v62  ;;  %5515 = vmatpush1.bf16.msra.mxu0 %v6856_v8  ;;  %v6909_v62 = vld [vmem:[#allocation10 + $0x134] ss:$8 sps:$4 sm:$0xff]   ;;  %v6907_v8 = vld [vmem:[#allocation10 + $0x130] ss:$8 sps:$4 sm:$0xff]  }
 0x343   :  { %5085 = vmatprep.subr.bf16.mxu1 %v6834_v9  ;;  %5516 = vmatprep.subr.bf16.mxu0 %v6861_v10  ;;  %v6912_v9 = vld [vmem:[#allocation10 + $0x144] ss:$8 sps:$4 sm:$0xff]   ;;  %v6910_v10 = vld [vmem:[#allocation10 + $0x140] ss:$8 sps:$4 sm:$0xff]  }
 0x346   :  { %5086 = vmatpush1.bf16.msra.mxu1 %v6832_v11  ;;  %5517 = vmatpush1.bf16.msra.mxu0 %v6859_v12  ;;  %v6915_v11 = vld [vmem:[#allocation10 + $0x154] ss:$8 sps:$4 sm:$0xff]   ;;  %v6913_v12 = vld [vmem:[#allocation10 + $0x150] ss:$8 sps:$4 sm:$0xff]  }
 0x347   :  { %5087 = vmatprep.subr.bf16.mxu1 %v6837_v14  ;;  %5518 = vmatprep.subr.bf16.mxu0 %v6864_v15  ;;  %v6918_v14 = vld [vmem:[#allocation10 + $0x164] ss:$8 sps:$4 sm:$0xff]   ;;  %v6916_v15 = vld [vmem:[#allocation10 + $0x160] ss:$8 sps:$4 sm:$0xff]  }
 0x34a   :  { %5088 = vmatpush1.bf16.msra.mxu1 %v6835_v16  ;;  %5519 = vmatpush1.bf16.msra.mxu0 %v6862_v19  ;;  %v6921_v16 = vld [vmem:[#allocation10 + $0x174] ss:$8 sps:$4 sm:$0xff]   ;;  %v3493_v19 = vrot.slane %v7420_v50, %v534_v23  ;;  %v6928_v23 = vld [vmem:[#allocation10 + $0x1a0] ss:$8 sps:$4 sm:$0xff]  }
 0x34b   :  { %5089 = vmatprep.subr.bf16.mxu1 %v6840_v33  ;;  %5520 = vmatprep.subr.bf16.mxu0 %v6867_v21  ;;  %v6919_v33 = vld [vmem:[#allocation10 + $0x170] ss:$8 sps:$4 sm:$0xff]   ;;  %v6924_v21 = vld [vmem:[#allocation10 + $0x184] ss:$8 sps:$4 sm:$0xff]  }
 0x34e   :  { %5090 = vmatpush1.bf16.msra.mxu1 %v6838_v24  ;;  %5521 = vmatpush1.bf16.msra.mxu0 %v6865_v34 }
 0x34f   :  { %5091 = vmatprep.subr.bf16.mxu1 %v6843_v25  ;;  %5522 = vmatprep.subr.bf16.mxu0 %v6870_v54 }
 0x352   :  { %5092 = vmatpush1.bf16.msra.mxu1 %v6841_v26  ;;  %5523 = vmatpush1.bf16.msra.mxu0 %v6868_v38  ;;  %v6922_v26 = vld [vmem:[#allocation10 + $0x180] ss:$8 sps:$4 sm:$0xff]  }
 0x353   :  { %5093 = vmatprep.subr.bf16.mxu1 %v6846_v28  ;;  %5524 = vmatprep.subr.bf16.mxu0 %v6873_v27  ;;  %v6927_v28 = vld [vmem:[#allocation10 + $0x194] ss:$8 sps:$4 sm:$0xff]  }
 0x356   :  { %5094 = vmatpush1.bf16.msra.mxu1 %v6844_v55  ;;  %5525 = vmatpush1.bf16.msra.mxu0 %v6871_v30  ;;  %v6925_v30 = vld [vmem:[#allocation10 + $0x190] ss:$8 sps:$4 sm:$0xff]  }
 0x357   :  { %5095 = vmatprep.subr.bf16.mxu1 %v6849_v31  ;;  %5526 = vmatprep.subr.bf16.mxu0 %v6876_v32  ;;  %v6930_v31 = vld [vmem:[#allocation10 + $0x1a4] ss:$8 sps:$4 sm:$0xff]   ;;  %v6933_v32 = vld [vmem:[#allocation10 + $0x1b4] ss:$8 sps:$4 sm:$0xff]  }
 0x35a   :  { %5096 = vmatpush1.bf16.msra.mxu1 %v6847_v35  ;;  %5527 = vmatpush1.bf16.msra.mxu0 %v6874_v36  ;;  %v6931_v35 = vld [vmem:[#allocation10 + $0x1b0] ss:$8 sps:$4 sm:$0xff]   ;;  %v6936_v36 = vld [vmem:[#allocation10 + $0x1c4] ss:$8 sps:$4 sm:$0xff]  }
 0x35b   :  { %5528 = vmatprep.subr.bf16.mxu0 %v6879_v37  ;;  %v6934_v37 = vld [vmem:[#allocation10 + $0x1c0] ss:$8 sps:$4 sm:$0xff]  }
 0x35d   :  { %5098 = vmatmul.mubr.bf16.vlgmr.msra.gmra.mrb[12].mxu1 %v7416_v1 }
 0x35e   :  { %5529 = vmatpush1.bf16.msra.mxu0 %v6877_v40  ;;  %v6939_v40 = vld [vmem:[#allocation10 + $0x1d4] ss:$8 sps:$4 sm:$0xff]  }
 0x35f   :  { %5530 = vmatprep.subr.bf16.mxu0 %v6882_v41  ;;  %v6937_v41 = vld [vmem:[#allocation10 + $0x1d0] ss:$8 sps:$4 sm:$0xff]  }
 0x362   :  { %5531 = vmatpush1.bf16.msra.mxu0 %v6880_v59  ;;  %v3489_v59 = vrot.slane %v7420_v50, %v530_v43  ;;  %v5594_v43 = vld [vmem:[#allocation13] sm:$0x3] }
 0x363   :  { %5532 = vmatprep.subr.bf16.mxu0 %v6885_v42  ;;  %v6942_v42 = vld [vmem:[#allocation10 + $0x1e4] ss:$8 sps:$4 sm:$0xff]  }
 0x366   :  { %5533 = vmatpush1.bf16.msra.mxu0 %v6883_v22  ;;  %v6940_v22 = vld [vmem:[#allocation10 + $0x1e0] ss:$8 sps:$4 sm:$0xff]  }
 0x367   :  { %5534 = vmatprep.subr.bf16.mxu0 %v6888_v49 }
 0x36a   :  { %5535 = vmatpush1.bf16.msra.mxu0 %v6886_v7  ;;  %v6945_v7 = vld [vmem:[#allocation10 + $0x1f4] ss:$8 sps:$4 sm:$0xff]  }
 0x36b   :  { %5536 = vmatprep.subr.bf16.mxu0 %v6891_v44  ;;  %v6943_v44 = vld [vmem:[#allocation10 + $0x1f0] ss:$8 sps:$4 sm:$0xff]  }
 0x36e   :  { %5537 = vmatpush1.bf16.msra.mxu0 %v6889_v39 }
 0x36f   :  { %5538 = vmatprep.subr.bf16.mxu0 %v6894_v45 }
 0x372   :  { %5539 = vmatpush1.bf16.msra.mxu0 %v6892_v29  ;;  %v5178_v29 = vld [vmem:[#allocation11] sm:$0x3] }
 0x373   :  { %5540 = vmatprep.subr.bf16.mxu0 %v6897_v46  ;;  %v5183_v46 = vrot.slane %v5178_v29, %v7352_v52  ;;  %v5187_v17 = vrot.slane %v5178_v29, %v7357_v58 }
 0x376   :  { %5541 = vmatpush1.bf16.msra.mxu0 %v6895_v47 }
 0x377   :  { %5551 = vmatprep.subr.bf16.mxu0 %v6900_v48 }
 0x40c   :  { %v4935_v13 = vpop.f32.mrb[8].mxu0 }
 0x40d   :  { %v6367_v56 = vadd.f32 %v4935_v13, %v3481_v51  ;;  %v4937_v57 = vpop.f32.mrb[9].mxu0  ;;  %v5599_v51 = vrot.slane %v5594_v43, %v7352_v52 }
 0x40e   :  { %v6368_v20 = vadd.f32 %v4937_v57, %v3485_v53  ;;  %v4939_v60 = vpop.f32.mrb[10].mxu0 }
 0x40f   :  { %v5106_v61 = vmax.f32 %v6367_v56, 0.0  ;;  %v4940_v63 = vpop.f32.mrb[11].mxu0  ;;  %v5603_v56 = vrot.slane %v5594_v43, %v7357_v58 }
 0x410   :  { %v5107_v0 = vmax.f32 %v6368_v20, 0.0 }
 0x411   :  { %v5110_v3 = vpack.c.bf16 %v5106_v61, %v5106_v61 }
 0x412   :  { %v5111_v1 = vpack.c.bf16 %v5107_v0, %v5107_v0 }
 0x414   :  { %5542 = vmatprep.mubr.bf16.mxu0 %v5111_v1  ;;  %v6356_v1 = vld [vmem:[#allocation2] ss:$0 sm:$0xff] }
 0x415   :  { %5543 = vmatmul.mubr.bf16.vlgmr.msra.gmra.mrb[12].mxu0 %v5110_v3 }
 0x416   :  { %5552 = vmatpush1.bf16.msra.mxu0 %v6898_v2 }
 0x417   :  { %5553 = vmatprep.subr.bf16.mxu0 %v6903_v4 }
 0x41a   :  { %5554 = vmatpush1.bf16.msra.mxu0 %v6901_v5 }
 0x41b   :  { %5555 = vmatprep.subr.bf16.mxu0 %v6906_v18 }
 0x41e   :  { %5556 = vmatpush1.bf16.msra.mxu0 %v6904_v6 }
 0x41f   :  { %5557 = vmatprep.subr.bf16.mxu0 %v6909_v62 }
 0x422   :  { %5558 = vmatpush1.bf16.msra.mxu0 %v6907_v8 }
 0x423   :  { %5559 = vmatprep.subr.bf16.mxu0 %v6912_v9 }
 0x426   :  { %5560 = vmatpush1.bf16.msra.mxu0 %v6910_v10 }
 0x427   :  { %5561 = vmatprep.subr.bf16.mxu0 %v6915_v11 }
 0x42a   :  { %5562 = vmatpush1.bf16.msra.mxu0 %v6913_v12 }
 0x42b   :  { %5563 = vmatprep.subr.bf16.mxu0 %v6918_v14 }
 0x42e   :  { %5564 = vmatpush1.bf16.msra.mxu0 %v6916_v15 }
 0x42f   :  { %5565 = vmatprep.subr.bf16.mxu0 %v6921_v16 }
 0x430   :  { %v5099_v24 = vpop.f32.mrb[12].mxu1 }
 0x431   :  { %v5101_v34 = vpop.f32.mrb[13].mxu1  ;;  %v6369_v49 = vadd.f32 %v5099_v24, %v3489_v59 }
 0x432   :  { %v6370_v25 = vadd.f32 %v5101_v34, %v3493_v19  ;;  %v5103_v54 = vpop.f32.mrb[14].mxu1  ;;  %5566 = vmatpush1.bf16.msra.mxu0 %v6919_v33 }
 0x433   :  { %v5104_v38 = vpop.f32.mrb[15].mxu1  ;;  %5567 = vmatprep.subr.bf16.mxu0 %v6924_v21  ;;  %v5108_v39 = vmax.f32 %v6369_v49, 0.0 }
 0x434   :  { %v5109_v27 = vmax.f32 %v6370_v25, 0.0 }
 0x435   :  { %v5112_v45 = vpack.c.bf16 %v5108_v39, %v5108_v39 }
 0x436   :  { %v5113_v55 = vpack.c.bf16 %v5109_v27, %v5109_v27  ;;  %5568 = vmatpush1.bf16.msra.mxu0 %v6922_v26 }
 0x437   :  { %5569 = vmatprep.subr.bf16.mxu0 %v6927_v28 }
 0x438   :  { %5583 = vmatprep.mubr.bf16.mxu0 %v5113_v55 }
 0x43a   :  { %5570 = vmatpush1.bf16.msra.mxu0 %v6925_v30 }
 0x43b   :  { %5571 = vmatprep.subr.bf16.mxu0 %v6930_v31 }
 0x43e   :  { %5572 = vmatpush1.bf16.msra.mxu0 %v6928_v23 }
 0x43f   :  { %5573 = vmatprep.subr.bf16.mxu0 %v6933_v32 }
 0x442   :  { %5574 = vmatpush1.bf16.msra.mxu0 %v6931_v35 }
 0x443   :  { %5575 = vmatprep.subr.bf16.mxu0 %v6936_v36 }
 0x446   :  { %5576 = vmatpush1.bf16.msra.mxu0 %v6934_v37 }
 0x447   :  { %5577 = vmatprep.subr.bf16.mxu0 %v6939_v40 }
 0x44a   :  { %5578 = vmatpush1.bf16.msra.mxu0 %v6937_v41 }
 0x44b   :  { %5579 = vmatprep.subr.bf16.mxu0 %v6942_v42 }
 0x44e   :  { %5580 = vmatpush1.bf16.msra.mxu0 %v6940_v22 }
 0x44f   :  { %5581 = vmatprep.subr.bf16.mxu0 %v6945_v7 }
 0x452   :  { %5582 = vmatpush1.bf16.msra.mxu0 %v6943_v44 }
 0x455   :  { %5584 = vmatmul.mubr.bf16.vlgmr.msra.gmra.mrb[12].mxu0 %v5112_v45 }
 0x528   :  { %v5585_v47 = vpop.f32.mrb[12].mxu0 }
 0x529   :  { %v6371_v48 = vadd.f32 %v5585_v47, %v5183_v46  ;;  %v5587_v50 = vpop.f32.mrb[13].mxu0 }
 0x52a   :  { %v6372_v53 = vadd.f32 %v5587_v50, %v5187_v17  ;;  %v5589_v13 = vpop.f32.mrb[14].mxu0 }
 0x52b   :  { %v5592_v57 = vmax.f32 %v6371_v48, 0.0  ;;  %v5590_v20 = vpop.f32.mrb[15].mxu0 }
 0x52c   :  { %v5593_v60 = vmax.f32 %v6372_v53, 0.0 }
 0x52d   :  { %v5606_v61 = vmul.f32 %v5599_v51, %v5592_v57 }
 0x52e   :  { %v5607_v63 = vmul.f32 %v5603_v56, %v5593_v60 }
 0x530   :  { %v5608_v0 = vadd.f32 %v5607_v63, %v5606_v61 }
 0x532   :  { %5609 = vadd.xlane.f32.xlu0 %v5608_v0 }
 0x5bf   :  { %v5610_v2 = vpop.xlane.xlu0 %5609 }
 0x5c0   :  { %v5618_v3 = vadd.f32 %v6356_v1, %v5610_v2 }
 0x5c2   :  { %v5619_v4 = vmul.f32 0.5, %v5618_v3 }
 0x5c4   :  { %6946 = vtanh.f32 %v5619_v4 }
 0x5ce   :  { %v6947_v5 = vpop.eup %6946 }
 0x5cf   :  { %v5621_v18 = vadd.f32 1.0, %v6947_v5 }
 0x5d1   :  { %v5622_v52 = vmul.f32 0.5, %v5621_v18 }
 0x5d3   :  { %5624 = vst.msk [vmem:[%s7448_s9] sm:$0xff] %vm5623_vm1, %v5622_v52 }
 0x5d4   :  { %5629 = vsyncpa [#allocation4], 1 }
 0x5d5   :  { %5630 = vsyncpa [#allocation6], 1 }
 0x5d6   :  { %5631 = vsyncpa [#allocation9], 1 }
 0x5d7   :  { %5632 = vsyncpa [#allocation12], 1 }

</bundles_post_ra>
